<compile_context>
chip_gen: v7x
topology: tpu7x:2x2x1
jax: 0.10.0
libtpu: 0.0.40
codegen_flags: <defaults>
</compile_context>

<pallas_src>
import numpy as np

import jax
import jax.numpy as jnp
from jax.experimental import pallas as pl
from jax.experimental.pallas import tpu as pltpu


# ----------------------------------------------------------------------------- kernel
def memory_updater_kernel(
    mem_ref, minput_ref, drep_ref,
    wq_ref, bq_ref,
    wkr_ref, wkt_ref, bk_ref,
    wvr_ref, wvt_ref, bv_ref,
    tw_ref,
    sscore_ref, bseg_ref, eexp_ref, rgat_ref,
    mean_ref, ln_g_ref, ln_b_ref,
    wm_ref, bm_ref,
    out_ref):
    """One grid step = `tile_rows` packed rows (P nodes per 128-lane row).

    Lane layouts (per packed row; p = packed node, m = mailbox slot, h = head):
      mem    : p*dim_out + c
      minput : p*M*dim_in + m*dim_in + d
      drep   : p*M*dim_time + m*dim_time + j        (time delta, repeated)
      K/V/Q  : p*M*dim_out + m*dim_out + h*Dh + d
      scores : p*H*M + h*M + m
      out    : p*dim_out + c
    All index-group reductions are precomputed 0/1 matrices applied on the MXU,
    so the body never slices below vreg granularity.
    """
    f32 = jnp.float32
    mem = mem_ref[...]
    mails = minput_ref[...]

    # Time features for every (node, slot) at once: one broadcast, one cos.
    tf = jnp.cos(drep_ref[...] * tw_ref[...])

    # Q tiled across mailbox slots; K/V fused across all P nodes and M slots.
    q = jnp.dot(mem, wq_ref[...], preferred_element_type=f32) + bq_ref[...]
    k = (jnp.dot(mails, wkr_ref[...], preferred_element_type=f32)
         + jnp.dot(tf, wkt_ref[...], preferred_element_type=f32) + bk_ref[...])
    v = (jnp.dot(mails, wvr_ref[...], preferred_element_type=f32)
         + jnp.dot(tf, wvt_ref[...], preferred_element_type=f32) + bv_ref[...])

    # Attention scores: per (node, head, slot) = sum_d Q*K  (MXU reduction).
    scores = jnp.dot(q * k, sscore_ref[...], preferred_element_type=f32)
    scores = jnp.where(scores >= 0.0, scores, 0.2 * scores)        # LeakyReLU(0.2)

    # Softmax over mailbox slots.  Subtracting the per-row max is valid for
    # every packed segment (shift invariance); segment sums via block-ones.
    scores = scores - jnp.max(scores, axis=-1, keepdims=True)
    e = jnp.exp(scores)
    denom = jnp.dot(e, bseg_ref[...], preferred_element_type=f32)
    att = e / jnp.maximum(denom, 1e-30)
    # att_dropout: identity (inference)

    # rst[n, h*Dh+d] = sum_m att[n,h,m] * V[n,m,h,d]  (expand + weighted gather)
    att_full = jnp.dot(att, eexp_ref[...], preferred_element_type=f32)
    rst = jnp.dot(att_full * v, rgat_ref[...], preferred_element_type=f32)

    rst = rst + mem

    # Per-node LayerNorm (eps = 1e-5); segment means via block matrix on MXU.
    mu = jnp.dot(rst, mean_ref[...], preferred_element_type=f32)
    cen = rst - mu
    var = jnp.dot(cen * cen, mean_ref[...], preferred_element_type=f32)
    rst = cen * jax.lax.rsqrt(var + 1e-5)
    rst = rst * ln_g_ref[...] + ln_b_ref[...]

    # MLP + ReLU (dropout identity at inference); 128-lane-dense store.
    rst = jnp.dot(rst, wm_ref[...], preferred_element_type=f32) + bm_ref[...]
    out_ref[...] = jnp.maximum(rst, 0.0)


# ----------------------------------------------------------------------------- packed weights
def _build_packed_weights(params, *, M, H, dim_in, dim_out, dim_time, P):
    """Expand module weights for the packed (P nodes / row, M slots) layout."""
    f32 = jnp.float32
    Dh = dim_out // H
    eyeP = jnp.eye(P, dtype=f32)
    eyePM = jnp.eye(P * M, dtype=f32)

    wq_big = jnp.kron(eyeP, jnp.tile(params["wq"].astype(f32), (1, M)))
    bq_big = jnp.tile(params["bq"].astype(f32), (1, P * M))
    wkr_big = jnp.kron(eyePM, params["wk_raw"].astype(f32))
    wkt_big = jnp.kron(eyePM, params["wk_time"].astype(f32))
    bk_big = jnp.tile(params["bk"].astype(f32), (1, P * M))
    wvr_big = jnp.kron(eyePM, params["wv_raw"].astype(f32))
    wvt_big = jnp.kron(eyePM, params["wv_time"].astype(f32))
    bv_big = jnp.tile(params["bv"].astype(f32), (1, P * M))
    tw_big = jnp.tile(params["time_w"].astype(f32), (1, P * M))

    # Selection matrix: lane (p, m, h, d) -> score column (p, h, m).
    s1 = np.zeros((M * dim_out, H * M), np.float32)
    for m in range(M):
        for h in range(H):
            s1[m * dim_out + h * Dh:m * dim_out + (h + 1) * Dh, h * M + m] = 1.0
    s_score = jnp.asarray(np.kron(np.eye(P, dtype=np.float32), s1))
    e_expand = s_score.T                                    # (P*H*M, P*M*dim_out)
    b_seg = jnp.asarray(np.kron(np.eye(P * H, dtype=np.float32),
                                np.ones((M, M), np.float32)))
    r_gather = jnp.asarray(np.kron(np.eye(P, dtype=np.float32),
                                   np.tile(np.eye(dim_out, dtype=np.float32), (M, 1))))
    mean_mat = jnp.asarray(np.kron(np.eye(P, dtype=np.float32),
                                   np.full((dim_out, dim_out), 1.0 / dim_out,
                                           np.float32)))

    ln_g_big = jnp.tile(params["ln_g"].astype(f32), (1, P))
    ln_b_big = jnp.tile(params["ln_b"].astype(f32), (1, P))
    wm_big = jnp.kron(eyeP, params["wm"].astype(f32))
    bm_big = jnp.tile(params["bm"].astype(f32), (1, P))

    return [wq_big, bq_big, wkr_big, wkt_big, bk_big, wvr_big, wvt_big, bv_big,
            tw_big, s_score, b_seg, e_expand, r_gather,
            mean_mat, ln_g_big, ln_b_big, wm_big, bm_big]


# ----------------------------------------------------------------------------- wrapper
def transformer_memory_updater(mem, mem_input, ts, mail_ts, nid, params, *,
                               mailbox_size, att_head, dim_time, tile_nodes=1024):
    N, dim_out = mem.shape
    M, H = mailbox_size, att_head
    dim_in = mem_input.shape[1] // M

    # Pack P nodes per 128-lane row (lane-dense loads/stores). Falls back to
    # P = 1 when dim_out does not divide 128.
    P = 128 // dim_out if (dim_out <= 128 and 128 % dim_out == 0) else 1

    # Fold ts / mail_ts into one lane-dense delta slab (repeated per time lane).
    delta = ts.reshape(N, 1).astype(jnp.float32) - mail_ts.astype(jnp.float32)
    delta_rep = jnp.repeat(delta, dim_time, axis=1)          # (N, M*dim_time)

    # Tile sizing: big tiles, multiple of 8 packed rows, and (best effort) at
    # least two grid steps so both v7x TensorCores get work.
    R0 = -(-N // P)                                          # packed rows (unpadded)
    half_rows = max(8, (((R0 + 1) // 2) + 7) // 8 * 8)
    tr = max(8, min(max(8, tile_nodes // P), half_rows))
    tr = max(8, (tr // 8) * 8)
    R = -(-R0 // tr) * tr                                    # padded packed rows
    Npad = R * P

    def pack_rows(x):
        x = x.astype(jnp.float32)
        pad = Npad - N
        if pad:
            x = jnp.pad(x, ((0, pad), (0, 0)))
        return x.reshape(R, P * x.shape[1])

    mem_p = pack_rows(mem)                                   # (R, P*dim_out)
    minput_p = pack_rows(mem_input)                          # (R, P*M*dim_in)
    drep_p = pack_rows(delta_rep)                            # (R, P*M*dim_time)

    weights = _build_packed_weights(params, M=M, H=H, dim_in=dim_in,
                                    dim_out=dim_out, dim_time=dim_time, P=P)

    def row_spec(cols):
        return pl.BlockSpec((tr, cols), lambda i: (i, 0))

    def full_spec(w):
        return pl.BlockSpec(w.shape, lambda i: (0, 0))

    rst_p = pl.pallas_call(
        memory_updater_kernel,
        out_shape=jax.ShapeDtypeStruct((R, P * dim_out), jnp.float32),
        grid=(R // tr,),
        in_specs=[row_spec(P * dim_out),
                  row_spec(P * M * dim_in),
                  row_spec(P * M * dim_time)]
                 + [full_spec(w) for w in weights],
        out_specs=row_spec(P * dim_out),
        compiler_params=pltpu.CompilerParams(
            dimension_semantics=("parallel",),
            vmem_limit_bytes=48 * 1024 * 1024),
    )(mem_p, minput_p, drep_p, *weights)

    rst = rst_p.reshape(Npad, dim_out)[:N]
    return {"last_updated_nid": nid,
            "last_updated_memory": rst,
            "last_updated_ts": ts}


# ----------------------------------------------------------------------------- reference (pure JAX)
def reference_forward(mem, mem_input, ts, mail_ts, params, *,
                      mailbox_size, att_head, dim_time):
    N, dim_out = mem.shape
    H = att_head
    dim_in = mem_input.shape[1] // mailbox_size
    Dh = dim_out // H

    Q = (mem @ params["wq"] + params["bq"]).reshape(N, H, Dh)
    mails = mem_input.reshape(N, mailbox_size, dim_in)
    delta = ts[:, None] - mail_ts
    tf = jnp.cos(delta[..., None] * params["time_w"][0][None, None, :])
    mails = jnp.concatenate([mails, tf], axis=2)
    wk = jnp.concatenate([params["wk_raw"], params["wk_time"]], axis=0)
    wv = jnp.concatenate([params["wv_raw"], params["wv_time"]], axis=0)
    K = (mails @ wk + params["bk"]).reshape(N, mailbox_size, H, Dh)
    V = (mails @ wv + params["bv"]).reshape(N, mailbox_size, H, Dh)
    att = (Q[:, None, :, :] * K).sum(3)
    att = jnp.where(att >= 0, att, 0.2 * att)
    att = jax.nn.softmax(att, axis=1)
    rst = (att[:, :, :, None] * V).sum(1).reshape(N, -1)
    rst = rst + mem
    mu = rst.mean(-1, keepdims=True)
    var = ((rst - mu) ** 2).mean(-1, keepdims=True)
    rst = (rst - mu) / jnp.sqrt(var + 1e-5) * params["ln_g"] + params["ln_b"]
    rst = rst @ params["wm"] + params["bm"]
    return jnp.maximum(rst, 0.0)


# ----------------------------------------------------------------------------- main
if __name__ == "__main__":
    # module hyper-params
    mailbox_size, att_head = 4, 2
    dim_in, dim_out, dim_time = 16, 32, 16
    N = 250  # deliberately NOT a multiple of the packing / tile size

    key = jax.random.PRNGKey(0)
    ks = jax.random.split(key, 16)

    def lin_w(k, din, dout):
        return (jax.random.normal(k, (din, dout), jnp.float32) / jnp.sqrt(din)).astype(jnp.float32)

    def lin_b(k, dout):
        return (0.05 * jax.random.normal(k, (1, dout), jnp.float32)).astype(jnp.float32)

    # TimeEncode: fixed w = 1/10^linspace(0,9,dim_time), bias 0 -> cos(dt * w)
    time_w = (1.0 / 10.0 ** jnp.linspace(0.0, 9.0, dim_time)).astype(jnp.float32).reshape(1, dim_time)

    wk_full = lin_w(ks[2], dim_in + dim_time, dim_out)
    wv_full = lin_w(ks[4], dim_in + dim_time, dim_out)
    params = {
        "wq": lin_w(ks[0], dim_out, dim_out), "bq": lin_b(ks[1], dim_out),
        "wk_raw": wk_full[:dim_in], "wk_time": wk_full[dim_in:], "bk": lin_b(ks[3], dim_out),
        "wv_raw": wv_full[:dim_in], "wv_time": wv_full[dim_in:], "bv": lin_b(ks[5], dim_out),
        "time_w": time_w,
        "ln_g": jnp.ones((1, dim_out), jnp.float32), "ln_b": jnp.zeros((1, dim_out), jnp.float32),
        "wm": lin_w(ks[6], dim_out, dim_out), "bm": lin_b(ks[7], dim_out),
    }

    # batch data (b.srcdata['mem'], ['mem_input'], ['ts'], ['mail_ts'], ['ID'])
    mem = jax.random.normal(ks[8], (N, dim_out), jnp.float32)
    mem_input = jax.random.normal(ks[9], (N, mailbox_size * dim_in), jnp.float32)
    ts = jax.random.uniform(ks[10], (N,), jnp.float32, 50.0, 100.0)
    mail_ts = jax.random.uniform(ks[11], (N, mailbox_size), jnp.float32, 0.0, 50.0)
    nid = jnp.arange(N, dtype=jnp.int32)

    ref = reference_forward(mem, mem_input, ts, mail_ts, params,
                            mailbox_size=mailbox_size, att_head=att_head, dim_time=dim_time)

    # default (large) tiles -> exercises padding + the >=2-grid-step clamp
    out = transformer_memory_updater(
        mem, mem_input, ts, mail_ts, nid, params,
        mailbox_size=mailbox_size, att_head=att_head, dim_time=dim_time)
    jax.block_until_ready(out["last_updated_memory"])
    assert jnp.allclose(out["last_updated_memory"], ref, rtol=1e-3, atol=1e-3), "mismatch (default tiles)"

    # small tiles -> exercises a longer grid with the same kernel
    out_small = transformer_memory_updater(
        mem, mem_input, ts, mail_ts, nid, params,
        mailbox_size=mailbox_size, att_head=att_head, dim_time=dim_time, tile_nodes=32)
    jax.block_until_ready(out_small["last_updated_memory"])
    assert jnp.allclose(out_small["last_updated_memory"], ref, rtol=1e-3, atol=1e-3), "mismatch (small tiles)"

    assert out["last_updated_memory"].shape == (N, dim_out)
    assert out["last_updated_nid"].shape == (N,)
    assert out["last_updated_ts"].shape == (N,)

    print("KERNEL_OK")
</pallas_src>

<mosaic_0001>
module attributes {stable_mosaic.version = 11 : i64} {
  func.func @memory_updater_kernel(%arg0: i32, %arg1: memref<32x128xf32, #tpu.memory_space<vmem>>, %arg2: memref<32x256xf32, #tpu.memory_space<vmem>>, %arg3: memref<32x256xf32, #tpu.memory_space<vmem>>, %arg4: memref<128x512xf32, #tpu.memory_space<vmem>>, %arg5: memref<1x512xf32, #tpu.memory_space<vmem>>, %arg6: memref<256x512xf32, #tpu.memory_space<vmem>>, %arg7: memref<256x512xf32, #tpu.memory_space<vmem>>, %arg8: memref<1x512xf32, #tpu.memory_space<vmem>>, %arg9: memref<256x512xf32, #tpu.memory_space<vmem>>, %arg10: memref<256x512xf32, #tpu.memory_space<vmem>>, %arg11: memref<1x512xf32, #tpu.memory_space<vmem>>, %arg12: memref<1x256xf32, #tpu.memory_space<vmem>>, %arg13: memref<512x32xf32, #tpu.memory_space<vmem>>, %arg14: memref<32x32xf32, #tpu.memory_space<vmem>>, %arg15: memref<32x512xf32, #tpu.memory_space<vmem>>, %arg16: memref<512x128xf32, #tpu.memory_space<vmem>>, %arg17: memref<128x128xf32, #tpu.memory_space<vmem>>, %arg18: memref<1x128xf32, #tpu.memory_space<vmem>>, %arg19: memref<1x128xf32, #tpu.memory_space<vmem>>, %arg20: memref<128x128xf32, #tpu.memory_space<vmem>>, %arg21: memref<1x128xf32, #tpu.memory_space<vmem>>, %arg22: memref<32x128xf32, #tpu.memory_space<vmem>>) attributes {dimension_semantics = [#tpu.dimension_semantics<parallel>], iteration_bounds = array<i64: 2>, scalar_prefetch = 0 : i64, scratch_operands = 0 : i64, tpu.core_type = #tpu.core_type<tc>, window_params = [{transform_indices = @transform_0, window_bounds = array<i64: 32, 128>}, {transform_indices = @transform_1, window_bounds = array<i64: 32, 256>}, {transform_indices = @transform_2, window_bounds = array<i64: 32, 256>}, {pipeline_mode = #tpu.pipeline_mode<synchronous>, transform_indices = @transform_3, window_bounds = array<i64: 128, 512>}, {pipeline_mode = #tpu.pipeline_mode<synchronous>, transform_indices = @transform_4, window_bounds = array<i64: 1, 512>}, {pipeline_mode = #tpu.pipeline_mode<synchronous>, transform_indices = @transform_5, window_bounds = array<i64: 256, 512>}, {pipeline_mode = #tpu.pipeline_mode<synchronous>, transform_indices = @transform_6, window_bounds = array<i64: 256, 512>}, {pipeline_mode = #tpu.pipeline_mode<synchronous>, transform_indices = @transform_7, window_bounds = array<i64: 1, 512>}, {pipeline_mode = #tpu.pipeline_mode<synchronous>, transform_indices = @transform_8, window_bounds = array<i64: 256, 512>}, {pipeline_mode = #tpu.pipeline_mode<synchronous>, transform_indices = @transform_9, window_bounds = array<i64: 256, 512>}, {pipeline_mode = #tpu.pipeline_mode<synchronous>, transform_indices = @transform_10, window_bounds = array<i64: 1, 512>}, {pipeline_mode = #tpu.pipeline_mode<synchronous>, transform_indices = @transform_11, window_bounds = array<i64: 1, 256>}, {pipeline_mode = #tpu.pipeline_mode<synchronous>, transform_indices = @transform_12, window_bounds = array<i64: 512, 32>}, {pipeline_mode = #tpu.pipeline_mode<synchronous>, transform_indices = @transform_13, window_bounds = array<i64: 32, 32>}, {pipeline_mode = #tpu.pipeline_mode<synchronous>, transform_indices = @transform_14, window_bounds = array<i64: 32, 512>}, {pipeline_mode = #tpu.pipeline_mode<synchronous>, transform_indices = @transform_15, window_bounds = array<i64: 512, 128>}, {pipeline_mode = #tpu.pipeline_mode<synchronous>, transform_indices = @transform_16, window_bounds = array<i64: 128, 128>}, {pipeline_mode = #tpu.pipeline_mode<synchronous>, transform_indices = @transform_17, window_bounds = array<i64: 1, 128>}, {pipeline_mode = #tpu.pipeline_mode<synchronous>, transform_indices = @transform_18, window_bounds = array<i64: 1, 128>}, {pipeline_mode = #tpu.pipeline_mode<synchronous>, transform_indices = @transform_19, window_bounds = array<i64: 128, 128>}, {pipeline_mode = #tpu.pipeline_mode<synchronous>, transform_indices = @transform_20, window_bounds = array<i64: 1, 128>}, {transform_indices = @transform_21, window_bounds = array<i64: 32, 128>}]} {
    %c0 = arith.constant 0 : index
    %c0_0 = arith.constant 0 : index
    %0 = vector.load %arg1[%c0, %c0_0] : memref<32x128xf32, #tpu.memory_space<vmem>>, vector<32x128xf32>
    %c0_1 = arith.constant 0 : index
    %c0_2 = arith.constant 0 : index
    %1 = vector.load %arg2[%c0_1, %c0_2] : memref<32x256xf32, #tpu.memory_space<vmem>>, vector<32x256xf32>
    %c0_3 = arith.constant 0 : index
    %c0_4 = arith.constant 0 : index
    %2 = vector.load %arg3[%c0_3, %c0_4] : memref<32x256xf32, #tpu.memory_space<vmem>>, vector<32x256xf32>
    %c0_5 = arith.constant 0 : index
    %c0_6 = arith.constant 0 : index
    %3 = vector.load %arg12[%c0_5, %c0_6] : memref<1x256xf32, #tpu.memory_space<vmem>>, vector<1x256xf32>
    %4 = vector.broadcast %3 : vector<1x256xf32> to vector<32x256xf32>
    %5 = arith.mulf %2, %4 : vector<32x256xf32>
    %6 = math.cos %5 : vector<32x256xf32>
    %c0_7 = arith.constant 0 : index
    %c0_8 = arith.constant 0 : index
    %7 = vector.load %arg4[%c0_7, %c0_8] : memref<128x512xf32, #tpu.memory_space<vmem>>, vector<128x512xf32>
    %cst = arith.constant dense<0.000000e+00> : vector<32x512xf32>
    %8 = tpu.matmul %0, %7, %cst {dimension_numbers = #tpu.dot_dimension_numbers<[1], [0], [0], [1], [0, 0, 1, 1], [], []>} : vector<32x128xf32>, vector<128x512xf32>, vector<32x512xf32> -> vector<32x512xf32>
    %c0_9 = arith.constant 0 : index
    %c0_10 = arith.constant 0 : index
    %9 = vector.load %arg5[%c0_9, %c0_10] : memref<1x512xf32, #tpu.memory_space<vmem>>, vector<1x512xf32>
    %10 = vector.broadcast %9 : vector<1x512xf32> to vector<32x512xf32>
    %11 = arith.addf %8, %10 : vector<32x512xf32>
    %c0_11 = arith.constant 0 : index
    %c0_12 = arith.constant 0 : index
    %12 = vector.load %arg6[%c0_11, %c0_12] : memref<256x512xf32, #tpu.memory_space<vmem>>, vector<256x512xf32>
    %cst_13 = arith.constant dense<0.000000e+00> : vector<32x512xf32>
    %13 = tpu.matmul %1, %12, %cst_13 {dimension_numbers = #tpu.dot_dimension_numbers<[1], [0], [0], [1], [0, 0, 1, 1], [], []>} : vector<32x256xf32>, vector<256x512xf32>, vector<32x512xf32> -> vector<32x512xf32>
    %c0_14 = arith.constant 0 : index
    %c0_15 = arith.constant 0 : index
    %14 = vector.load %arg7[%c0_14, %c0_15] : memref<256x512xf32, #tpu.memory_space<vmem>>, vector<256x512xf32>
    %cst_16 = arith.constant dense<0.000000e+00> : vector<32x512xf32>
    %15 = tpu.matmul %6, %14, %cst_16 {dimension_numbers = #tpu.dot_dimension_numbers<[1], [0], [0], [1], [0, 0, 1, 1], [], []>} : vector<32x256xf32>, vector<256x512xf32>, vector<32x512xf32> -> vector<32x512xf32>
    %16 = arith.addf %13, %15 : vector<32x512xf32>
    %c0_17 = arith.constant 0 : index
    %c0_18 = arith.constant 0 : index
    %17 = vector.load %arg8[%c0_17, %c0_18] : memref<1x512xf32, #tpu.memory_space<vmem>>, vector<1x512xf32>
    %18 = vector.broadcast %17 : vector<1x512xf32> to vector<32x512xf32>
    %19 = arith.addf %16, %18 : vector<32x512xf32>
    %c0_19 = arith.constant 0 : index
    %c0_20 = arith.constant 0 : index
    %20 = vector.load %arg9[%c0_19, %c0_20] : memref<256x512xf32, #tpu.memory_space<vmem>>, vector<256x512xf32>
    %cst_21 = arith.constant dense<0.000000e+00> : vector<32x512xf32>
    %21 = tpu.matmul %1, %20, %cst_21 {dimension_numbers = #tpu.dot_dimension_numbers<[1], [0], [0], [1], [0, 0, 1, 1], [], []>} : vector<32x256xf32>, vector<256x512xf32>, vector<32x512xf32> -> vector<32x512xf32>
    %c0_22 = arith.constant 0 : index
    %c0_23 = arith.constant 0 : index
    %22 = vector.load %arg10[%c0_22, %c0_23] : memref<256x512xf32, #tpu.memory_space<vmem>>, vector<256x512xf32>
    %cst_24 = arith.constant dense<0.000000e+00> : vector<32x512xf32>
    %23 = tpu.matmul %6, %22, %cst_24 {dimension_numbers = #tpu.dot_dimension_numbers<[1], [0], [0], [1], [0, 0, 1, 1], [], []>} : vector<32x256xf32>, vector<256x512xf32>, vector<32x512xf32> -> vector<32x512xf32>
    %24 = arith.addf %21, %23 : vector<32x512xf32>
    %c0_25 = arith.constant 0 : index
    %c0_26 = arith.constant 0 : index
    %25 = vector.load %arg11[%c0_25, %c0_26] : memref<1x512xf32, #tpu.memory_space<vmem>>, vector<1x512xf32>
    %26 = vector.broadcast %25 : vector<1x512xf32> to vector<32x512xf32>
    %27 = arith.addf %24, %26 : vector<32x512xf32>
    %28 = arith.mulf %11, %19 : vector<32x512xf32>
    %c0_27 = arith.constant 0 : index
    %c0_28 = arith.constant 0 : index
    %29 = vector.load %arg13[%c0_27, %c0_28] : memref<512x32xf32, #tpu.memory_space<vmem>>, vector<512x32xf32>
    %cst_29 = arith.constant dense<0.000000e+00> : vector<32x32xf32>
    %30 = tpu.matmul %28, %29, %cst_29 {dimension_numbers = #tpu.dot_dimension_numbers<[1], [0], [0], [1], [0, 0, 1, 1], [], []>} : vector<32x512xf32>, vector<512x32xf32>, vector<32x32xf32> -> vector<32x32xf32>
    %cst_30 = arith.constant 0.000000e+00 : f32
    %31 = vector.broadcast %cst_30 : f32 to vector<32x32xf32>
    %32 = arith.cmpf oge, %30, %31 : vector<32x32xf32>
    %cst_31 = arith.constant 2.000000e-01 : f32
    %33 = vector.broadcast %cst_31 : f32 to vector<32x32xf32>
    %34 = arith.mulf %33, %30 : vector<32x32xf32>
    %35 = arith.select %32, %30, %34 : vector<32x32xi1>, vector<32x32xf32>
    %cst_32 = arith.constant dense<0xFF800000> : vector<32xf32>
    %36 = vector.multi_reduction <maximumf>, %35, %cst_32 [1] : vector<32x32xf32> to vector<32xf32>
    %37 = vector.shape_cast %36 : vector<32xf32> to vector<32x1xf32>
    %38 = vector.broadcast %37 : vector<32x1xf32> to vector<32x32xf32>
    %39 = arith.subf %35, %38 : vector<32x32xf32>
    %40 = math.exp %39 : vector<32x32xf32>
    %c0_33 = arith.constant 0 : index
    %c0_34 = arith.constant 0 : index
    %41 = vector.load %arg14[%c0_33, %c0_34] : memref<32x32xf32, #tpu.memory_space<vmem>>, vector<32x32xf32>
    %cst_35 = arith.constant dense<0.000000e+00> : vector<32x32xf32>
    %42 = tpu.matmul %40, %41, %cst_35 {dimension_numbers = #tpu.dot_dimension_numbers<[1], [0], [0], [1], [0, 0, 1, 1], [], []>} : vector<32x32xf32>, vector<32x32xf32>, vector<32x32xf32> -> vector<32x32xf32>
    %cst_36 = arith.constant 1.000000e-30 : f32
    %43 = vector.broadcast %cst_36 : f32 to vector<32x32xf32>
    %44 = arith.maximumf %42, %43 : vector<32x32xf32>
    %45 = arith.divf %40, %44 : vector<32x32xf32>
    %c0_37 = arith.constant 0 : index
    %c0_38 = arith.constant 0 : index
    %46 = vector.load %arg15[%c0_37, %c0_38] : memref<32x512xf32, #tpu.memory_space<vmem>>, vector<32x512xf32>
    %cst_39 = arith.constant dense<0.000000e+00> : vector<32x512xf32>
    %47 = tpu.matmul %45, %46, %cst_39 {dimension_numbers = #tpu.dot_dimension_numbers<[1], [0], [0], [1], [0, 0, 1, 1], [], []>} : vector<32x32xf32>, vector<32x512xf32>, vector<32x512xf32> -> vector<32x512xf32>
    %48 = arith.mulf %47, %27 : vector<32x512xf32>
    %c0_40 = arith.constant 0 : index
    %c0_41 = arith.constant 0 : index
    %49 = vector.load %arg16[%c0_40, %c0_41] : memref<512x128xf32, #tpu.memory_space<vmem>>, vector<512x128xf32>
    %cst_42 = arith.constant dense<0.000000e+00> : vector<32x128xf32>
    %50 = tpu.matmul %48, %49, %cst_42 {dimension_numbers = #tpu.dot_dimension_numbers<[1], [0], [0], [1], [0, 0, 1, 1], [], []>} : vector<32x512xf32>, vector<512x128xf32>, vector<32x128xf32> -> vector<32x128xf32>
    %51 = arith.addf %50, %0 : vector<32x128xf32>
    %c0_43 = arith.constant 0 : index
    %c0_44 = arith.constant 0 : index
    %52 = vector.load %arg17[%c0_43, %c0_44] : memref<128x128xf32, #tpu.memory_space<vmem>>, vector<128x128xf32>
    %cst_45 = arith.constant dense<0.000000e+00> : vector<32x128xf32>
    %53 = tpu.matmul %51, %52, %cst_45 {dimension_numbers = #tpu.dot_dimension_numbers<[1], [0], [0], [1], [0, 0, 1, 1], [], []>} : vector<32x128xf32>, vector<128x128xf32>, vector<32x128xf32> -> vector<32x128xf32>
    %54 = arith.subf %51, %53 : vector<32x128xf32>
    %55 = arith.mulf %54, %54 : vector<32x128xf32>
    %c0_46 = arith.constant 0 : index
    %c0_47 = arith.constant 0 : index
    %56 = vector.load %arg17[%c0_46, %c0_47] : memref<128x128xf32, #tpu.memory_space<vmem>>, vector<128x128xf32>
    %cst_48 = arith.constant dense<0.000000e+00> : vector<32x128xf32>
    %57 = tpu.matmul %55, %56, %cst_48 {dimension_numbers = #tpu.dot_dimension_numbers<[1], [0], [0], [1], [0, 0, 1, 1], [], []>} : vector<32x128xf32>, vector<128x128xf32>, vector<32x128xf32> -> vector<32x128xf32>
    %cst_49 = arith.constant 9.99999974E-6 : f32
    %58 = vector.broadcast %cst_49 : f32 to vector<32x128xf32>
    %59 = arith.addf %57, %58 : vector<32x128xf32>
    %60 = math.rsqrt %59 : vector<32x128xf32>
    %61 = arith.mulf %54, %60 : vector<32x128xf32>
    %c0_50 = arith.constant 0 : index
    %c0_51 = arith.constant 0 : index
    %62 = vector.load %arg18[%c0_50, %c0_51] : memref<1x128xf32, #tpu.memory_space<vmem>>, vector<1x128xf32>
    %63 = vector.broadcast %62 : vector<1x128xf32> to vector<32x128xf32>
    %64 = arith.mulf %61, %63 : vector<32x128xf32>
    %c0_52 = arith.constant 0 : index
    %c0_53 = arith.constant 0 : index
    %65 = vector.load %arg19[%c0_52, %c0_53] : memref<1x128xf32, #tpu.memory_space<vmem>>, vector<1x128xf32>
    %66 = vector.broadcast %65 : vector<1x128xf32> to vector<32x128xf32>
    %67 = arith.addf %64, %66 : vector<32x128xf32>
    %c0_54 = arith.constant 0 : index
    %c0_55 = arith.constant 0 : index
    %68 = vector.load %arg20[%c0_54, %c0_55] : memref<128x128xf32, #tpu.memory_space<vmem>>, vector<128x128xf32>
    %cst_56 = arith.constant dense<0.000000e+00> : vector<32x128xf32>
    %69 = tpu.matmul %67, %68, %cst_56 {dimension_numbers = #tpu.dot_dimension_numbers<[1], [0], [0], [1], [0, 0, 1, 1], [], []>} : vector<32x128xf32>, vector<128x128xf32>, vector<32x128xf32> -> vector<32x128xf32>
    %c0_57 = arith.constant 0 : index
    %c0_58 = arith.constant 0 : index
    %70 = vector.load %arg21[%c0_57, %c0_58] : memref<1x128xf32, #tpu.memory_space<vmem>>, vector<1x128xf32>
    %71 = vector.broadcast %70 : vector<1x128xf32> to vector<32x128xf32>
    %72 = arith.addf %69, %71 : vector<32x128xf32>
    %cst_59 = arith.constant 0.000000e+00 : f32
    %73 = vector.broadcast %cst_59 : f32 to vector<32x128xf32>
    %74 = arith.maximumf %72, %73 : vector<32x128xf32>
    %c0_60 = arith.constant 0 : index
    %c0_61 = arith.constant 0 : index
    %75 = vector.load %arg22[%c0_60, %c0_61] : memref<32x128xf32, #tpu.memory_space<vmem>>, vector<32x128xf32>
    tpu.vector_store %arg22[%c0_60, %c0_61], %74 {strides = array<i32>} : memref<32x128xf32, #tpu.memory_space<vmem>>, vector<32x128xf32>,
    return
  }
  func.func @transform_0(%arg0: i32) -> (i32, i32) {
    %c0_i32 = arith.constant 0 : i32
    %c0_i32_0 = arith.constant 0 : i32
    return %arg0, %c0_i32 : i32, i32
  }
  func.func @transform_1(%arg0: i32) -> (i32, i32) {
    %c0_i32 = arith.constant 0 : i32
    %c0_i32_0 = arith.constant 0 : i32
    return %arg0, %c0_i32 : i32, i32
  }
  func.func @transform_2(%arg0: i32) -> (i32, i32) {
    %c0_i32 = arith.constant 0 : i32
    %c0_i32_0 = arith.constant 0 : i32
    return %arg0, %c0_i32 : i32, i32
  }
  func.func @transform_3(%arg0: i32) -> (i32, i32) {
    %c0_i32 = arith.constant 0 : i32
    %c0_i32_0 = arith.constant 0 : i32
    %c0_i32_1 = arith.constant 0 : i32
    return %c0_i32, %c0_i32_0 : i32, i32
  }
  func.func @transform_4(%arg0: i32) -> (i32, i32) {
    %c0_i32 = arith.constant 0 : i32
    %c0_i32_0 = arith.constant 0 : i32
    %c0_i32_1 = arith.constant 0 : i32
    return %c0_i32, %c0_i32_0 : i32, i32
  }
  func.func @transform_5(%arg0: i32) -> (i32, i32) {
    %c0_i32 = arith.constant 0 : i32
    %c0_i32_0 = arith.constant 0 : i32
    %c0_i32_1 = arith.constant 0 : i32
    return %c0_i32, %c0_i32_0 : i32, i32
  }
  func.func @transform_6(%arg0: i32) -> (i32, i32) {
    %c0_i32 = arith.constant 0 : i32
    %c0_i32_0 = arith.constant 0 : i32
    %c0_i32_1 = arith.constant 0 : i32
    return %c0_i32, %c0_i32_0 : i32, i32
  }
  func.func @transform_7(%arg0: i32) -> (i32, i32) {
    %c0_i32 = arith.constant 0 : i32
    %c0_i32_0 = arith.constant 0 : i32
    %c0_i32_1 = arith.constant 0 : i32
    return %c0_i32, %c0_i32_0 : i32, i32
  }
  func.func @transform_8(%arg0: i32) -> (i32, i32) {
    %c0_i32 = arith.constant 0 : i32
    %c0_i32_0 = arith.constant 0 : i32
    %c0_i32_1 = arith.constant 0 : i32
    return %c0_i32, %c0_i32_0 : i32, i32
  }
  func.func @transform_9(%arg0: i32) -> (i32, i32) {
    %c0_i32 = arith.constant 0 : i32
    %c0_i32_0 = arith.constant 0 : i32
    %c0_i32_1 = arith.constant 0 : i32
    return %c0_i32, %c0_i32_0 : i32, i32
  }
  func.func @transform_10(%arg0: i32) -> (i32, i32) {
    %c0_i32 = arith.constant 0 : i32
    %c0_i32_0 = arith.constant 0 : i32
    %c0_i32_1 = arith.constant 0 : i32
    return %c0_i32, %c0_i32_0 : i32, i32
  }
  func.func @transform_11(%arg0: i32) -> (i32, i32) {
    %c0_i32 = arith.constant 0 : i32
    %c0_i32_0 = arith.constant 0 : i32
    %c0_i32_1 = arith.constant 0 : i32
    return %c0_i32, %c0_i32_0 : i32, i32
  }
  func.func @transform_12(%arg0: i32) -> (i32, i32) {
    %c0_i32 = arith.constant 0 : i32
    %c0_i32_0 = arith.constant 0 : i32
    %c0_i32_1 = arith.constant 0 : i32
    return %c0_i32, %c0_i32_0 : i32, i32
  }
  func.func @transform_13(%arg0: i32) -> (i32, i32) {
    %c0_i32 = arith.constant 0 : i32
    %c0_i32_0 = arith.constant 0 : i32
    %c0_i32_1 = arith.constant 0 : i32
    return %c0_i32, %c0_i32_0 : i32, i32
  }
  func.func @transform_14(%arg0: i32) -> (i32, i32) {
    %c0_i32 = arith.constant 0 : i32
    %c0_i32_0 = arith.constant 0 : i32
    %c0_i32_1 = arith.constant 0 : i32
    return %c0_i32, %c0_i32_0 : i32, i32
  }
  func.func @transform_15(%arg0: i32) -> (i32, i32) {
    %c0_i32 = arith.constant 0 : i32
    %c0_i32_0 = arith.constant 0 : i32
    %c0_i32_1 = arith.constant 0 : i32
    return %c0_i32, %c0_i32_0 : i32, i32
  }
  func.func @transform_16(%arg0: i32) -> (i32, i32) {
    %c0_i32 = arith.constant 0 : i32
    %c0_i32_0 = arith.constant 0 : i32
    %c0_i32_1 = arith.constant 0 : i32
    return %c0_i32, %c0_i32_0 : i32, i32
  }
  func.func @transform_17(%arg0: i32) -> (i32, i32) {
    %c0_i32 = arith.constant 0 : i32
    %c0_i32_0 = arith.constant 0 : i32
    %c0_i32_1 = arith.constant 0 : i32
    return %c0_i32, %c0_i32_0 : i32, i32
  }
  func.func @transform_18(%arg0: i32) -> (i32, i32) {
    %c0_i32 = arith.constant 0 : i32
    %c0_i32_0 = arith.constant 0 : i32
    %c0_i32_1 = arith.constant 0 : i32
    return %c0_i32, %c0_i32_0 : i32, i32
  }
  func.func @transform_19(%arg0: i32) -> (i32, i32) {
    %c0_i32 = arith.constant 0 : i32
    %c0_i32_0 = arith.constant 0 : i32
    %c0_i32_1 = arith.constant 0 : i32
    return %c0_i32, %c0_i32_0 : i32, i32
  }
  func.func @transform_20(%arg0: i32) -> (i32, i32) {
    %c0_i32 = arith.constant 0 : i32
    %c0_i32_0 = arith.constant 0 : i32
    %c0_i32_1 = arith.constant 0 : i32
    return %c0_i32, %c0_i32_0 : i32, i32
  }
  func.func @transform_21(%arg0: i32) -> (i32, i32) {
    %c0_i32 = arith.constant 0 : i32
    %c0_i32_0 = arith.constant 0 : i32
    return %arg0, %c0_i32 : i32, i32
  }
}

</mosaic_0001>

<bundles_post_ra>
// kernel: tpu_custom_call.1
= control target key start
LH: loop header
LB: loop body
LE: loop exit
PB: predicated region body
PF: predicated region fallthrough
CT: control target
= control target key end

     0   :  { %s9617_s0 = inlined_call_operand.hbm [shape: f32[64,128], index: 0, kind: input, shape index: {}]   ;;  %s9618_s1 = inlined_call_operand.vmem [shape: f32[64,256], index: 1, kind: input, shape index: {}]   ;;  %s9619_s2 = inlined_call_operand.hbm [shape: f32[64,256], index: 2, kind: input, shape index: {}]   ;;  %s9620_s3 = inlined_call_operand.vmem [shape: f32[128,512], index: 3, kind: input, shape index: {}]   ;;  %s9621_s4 = inlined_call_operand.vmem [shape: f32[1,512], index: 4, kind: input, shape index: {}]   ;;  %s9622_s5 = inlined_call_operand.hbm [shape: f32[256,512], index: 5, kind: input, shape index: {}]   ;;  %s9623_s6 = inlined_call_operand.hbm [shape: f32[256,512], index: 6, kind: input, shape index: {}]   ;;  %s9624_s7 = inlined_call_operand.hbm [shape: f32[1,512], index: 7, kind: input, shape index: {}]   ;;  %s9625_s8 = inlined_call_operand.hbm [shape: f32[256,512], index: 8, kind: input, shape index: {}]   ;;  %s9626_s9 = inlined_call_operand.hbm [shape: f32[256,512], index: 9, kind: input, shape index: {}]   ;;  %s9627_s10 = inlined_call_operand.hbm [shape: f32[1,512], index: 10, kind: input, shape index: {}]   ;;  %s9628_s11 = inlined_call_operand.hbm [shape: f32[1,256], index: 11, kind: input, shape index: {}]   ;;  %s9629_s12 = inlined_call_operand.vmem [shape: f32[512,32], index: 12, kind: input, shape index: {}]   ;;  %s9630_s13 = inlined_call_operand.vmem [shape: f32[32,32], index: 13, kind: input, shape index: {}]   ;;  %s9631_s14 = inlined_call_operand.hbm [shape: f32[32,512], index: 14, kind: input, shape index: {}]   ;;  %s9632_s15 = inlined_call_operand.hbm [shape: f32[512,128], index: 15, kind: input, shape index: {}]   ;;  %s9633_s16 = inlined_call_operand.hbm [shape: f32[128,128], index: 16, kind: input, shape index: {}]   ;;  %s9634_s17 = inlined_call_operand.vmem [shape: f32[1,128], index: 17, kind: input, shape index: {}]   ;;  %s9635_s18 = inlined_call_operand.vmem [shape: f32[1,128], index: 18, kind: input, shape index: {}]   ;;  %s9636_s19 = inlined_call_operand.hbm [shape: f32[128,128], index: 19, kind: input, shape index: {}]   ;;  %s9637_s20 = inlined_call_operand.vmem [shape: f32[1,128], index: 20, kind: input, shape index: {}]   ;;  %s9638_s21 = inlined_call_operand.hbm [shape: f32[64,128], index: 21, kind: output, shape index: {}]  }
   0x1   :  { %9758 = sst [smem:[#allocation109_spill]] %s9617_s0 }
   0x2   :  { %9759 = sst [smem:[#allocation110_spill]] %s9618_s1 }
   0x3   :  { %9760 = sst [smem:[#allocation111_spill]] %s9619_s2 }
   0x4   :  { %9761 = sst [smem:[#allocation112_spill]] %s9620_s3 }
   0x5   :  { %9762 = sst [smem:[#allocation113_spill]] %s9621_s4 }
   0x6   :  { %9763 = sst [smem:[#allocation114_spill]] %s9622_s5 }
   0x7   :  { %9764 = sst [smem:[#allocation115_spill]] %s9623_s6 }
   0x8   :  { %9765 = sst [smem:[#allocation116_spill]] %s9624_s7 }
   0x9   :  { %9766 = sst [smem:[#allocation117_spill]] %s9625_s8 }
   0xa   :  { %9767 = sst [smem:[#allocation118_spill]] %s9626_s9 }
   0xb   :  { %9768 = sst [smem:[#allocation119_spill]] %s9627_s10 }
   0xc   :  { %9769 = sst [smem:[#allocation120_spill]] %s9628_s11 }
   0xd   :  { %9770 = sst [smem:[#allocation121_spill]] %s9629_s12 }
   0xe   :  { %9771 = sst [smem:[#allocation122_spill]] %s9630_s13 }
   0xf   :  { %9772 = sst [smem:[#allocation123_spill]] %s9631_s14 }
  0x10   :  { %9773 = sst [smem:[#allocation124_spill]] %s9634_s17 }
  0x11   :  { %9774 = sst [smem:[#allocation125_spill]] %s9635_s18 }
  0x12   :  { %9775 = sst [smem:[#allocation126_spill]] %s9637_s20 }
  0x13   :  { %9776 = sst [smem:[#allocation127_spill]] %s9638_s21 }
  0x14   :  { %26 = vsyncpa [#allocation3], 0 }
  0x15   :  { %28 = vsyncpa [#allocation3 + $0x1], 0 }
  0x16   :  { %29 = vsyncpa [#allocation6], 0 }
  0x17   :  { %31 = vsyncpa [#allocation6 + $0x1], 0 }
  0x18   :  { %32 = vsyncpa [#allocation9], 0 }
  0x19   :  { %33 = vsyncpa [#allocation12], 0 }
  0x1a   :  { %34 = vsyncpa [#allocation15], 0 }
  0x1b   :  { %35 = vsyncpa [#allocation18], 0 }
  0x1c   :  { %36 = vsyncpa [#allocation21], 0 }
  0x1d   :  { %37 = vsyncpa [#allocation4], 0 }
  0x1e   :  { %39 = vsyncpa [#allocation4 + $0x1], 0  ;;  %s6950_s2 = smov 0   ;;  %s6952_s25 = smov 0  }
  0x1f   :  { %s6954_s26 = smov 0   ;;  %s6956_s27 = smov 0  }
  0x20 LB: > { %s6811_s3 = smov [#allocation7]   ;;  %s6971_s29 = sadd.s32 4294967295, %s6809_s27   ;;  %s6809_s27 = sphi %s6956_s27, %s10083_s27   ;;  %s6805_s26 = sphi %s6954_s26, %s10082_s26   ;;  %s6801_s25 = sphi %s6952_s25, %s10081_s25   ;;  %s6797_s2 = sphi %s6950_s2, %s10080_s2  }
  0x21   : > { %s550_s28 = sshll.u32 %s6811_s3, 4  ;;  %9777 = sst [smem:[#allocation33_spill]] %s6971_s29  ;;  %s6976_s28 = int_to_ptr.vmem [resolvable:$true] %s550_s28 }
  0x22   : > { %p4748_p0 = scmp.ge.s32.totalorder %s6809_s27, 1  ;;  %p9651_p1 = scmp.eq.s32.totalorder %s6971_s29, 0 }
  0x23   : > { %p532_p2 = scmp.lt.s32.totalorder %s6809_s27, 3  ;;  %s6812_s4 = smov [#allocation8]  }
  0x24   : > { %s563_s30 = sshll.u32 %s6812_s4, 4  ;;  %s6813_s22 = smov [#allocation11]   ;;  %s6991_s30 = int_to_ptr.vmem [resolvable:$true] %s563_s30 }
  0x25   : > { %p6978_p3 = pnand %p4748_p0, %p532_p2  ;;  %s587_s23 = sshll.u32 %s6813_s22, 4  ;;  %s6993_s23 = int_to_ptr.vmem [resolvable:$true] %s587_s23 }
  0x26   : > { %s9781_s3 = sld [smem:[#allocation114_spill]] }
  0x27   : > { %s9778_s0 = scalar_select %p6978_p3, 1, 0 }
  0x28   : > { %p6153_p5 = pneg %p6978_p3 }
  0x29   : > { %9779 = sst [smem:[#allocation34_spill]] %s9778_s0 }
  0x2a   : > { %p6987_p6 = pnand %p6153_p5, %p9651_p1 }
  0x2c   : > { %s6347_s21 = scalar_lea.hbm %s9781_s3, 16384  ;;  %p7003_p8 = pneg %p6987_p6 }
  0x2d   : > { %p6348_p7 = scmp.ne.s32.totalorder %s9781_s3, %s6347_s21  ;;  %p6354_p11 = scmp.lt.u32.totalorder %s6347_s21, %s9781_s3 }
  0x2f   : > { %p6350_p9 = pnand %p7003_p8, %p6348_p7 }
  0x31   : > { %p6351_p10 = pneg %p6350_p9 }
  0x33   : > { %p6356_p12 = pnand %p6354_p11, %p6351_p10 }
  0x35   : > { %6359 = shalt.err (!%p6356_p12)
}
  0x36   : > { %s6360_s18 = scalar_lea.vmem %s6976_s28, 16384  ;;  %p6368_p5 = scmp.lt.s32.totalorder %s6976_s28, %s6976_s28 }
  0x37   : > { %p6361_p13 = scmp.ne.s32.totalorder %s6976_s28, %s6360_s18  ;;  %p6369_p4 = scmp.lt.s32.totalorder %s6360_s18, %s6360_s18 }
  0x39   : > { %p6363_p0 = pnand %p6361_p13, %p7003_p8  ;;  %p6370_p7 = por %p6369_p4, %p6368_p5 }
  0x3b   : > { %p6364_p2 = pneg %p6363_p0 }
  0x3d   : > { %p6371_p9 = pnand %p6370_p7, %p6364_p2 }
  0x3f   : > { %6374 = shalt.err (!%p6371_p9)
}
  0x40   : > { %s6814_s20 = smov 512   ;;  %s6815_s17 = smov 32  }
  0x41   : > { %6156 = dma.hbm_to_vmem [thread:$0]  (!%p6987_p6), %s9781_s3, 16384, %s6976_s28, [#allocation6], %s6814_s20, %s6814_s20, %s6815_s17  }
  0x42   : > { %s9783_s6 = sld [smem:[#allocation115_spill]] }
  0x48   : > { %s6375_s18 = scalar_lea.hbm %s9783_s6, 16384 }
  0x49   : > { %p6376_p4 = scmp.ne.s32.totalorder %s9783_s6, %s6375_s18  ;;  %p6382_p12 = scmp.lt.u32.totalorder %s6375_s18, %s9783_s6 }
  0x4b   : > { %p6378_p10 = pnand %p6376_p4, %p7003_p8 }
  0x4d   : > { %p6379_p11 = pneg %p6378_p10 }
  0x4f   : > { %p6384_p13 = pnand %p6382_p12, %p6379_p11 }
  0x51   : > { %6387 = shalt.err (!%p6384_p13)
}
  0x52   : > { %s6388_s28 = scalar_lea.vmem %s6991_s30, 16384  ;;  %p6396_p7 = scmp.lt.s32.totalorder %s6991_s30, %s6991_s30 }
  0x53   : > { %p6389_p0 = scmp.ne.s32.totalorder %s6991_s30, %s6388_s28  ;;  %p6397_p9 = scmp.lt.s32.totalorder %s6388_s28, %s6388_s28 }
  0x55   : > { %p6391_p2 = pnand %p6389_p0, %p7003_p8  ;;  %p6398_p4 = por %p6397_p9, %p6396_p7 }
  0x57   : > { %p6392_p5 = pneg %p6391_p2 }
  0x59   : > { %p6399_p10 = pnand %p6398_p4, %p6392_p5 }
  0x5b   : > { %6402 = shalt.err (!%p6399_p10)
}
  0x5c   : > { %6159 = dma.hbm_to_vmem [thread:$0]  (!%p6987_p6), %s9783_s6, 16384, %s6991_s30, [#allocation9], %s6814_s20, %s6814_s20, %s6815_s17  }
  0x5d   : > { %s9784_s8 = sld [smem:[#allocation117_spill]] }
  0x63   : > { %s6403_s21 = scalar_lea.hbm %s9784_s8, 16384 }
  0x64   : > { %p6404_p11 = scmp.ne.s32.totalorder %s9784_s8, %s6403_s21  ;;  %p6410_p0 = scmp.lt.u32.totalorder %s6403_s21, %s9784_s8 }
  0x66   : > { %p6406_p12 = pnand %p6404_p11, %p7003_p8 }
  0x68   : > { %p6407_p13 = pneg %p6406_p12 }
  0x6a   : > { %p6412_p2 = pnand %p6410_p0, %p6407_p13 }
  0x6c   : > { %6415 = shalt.err (!%p6412_p2)
}
  0x6d   : > { %s6416_s30 = scalar_lea.vmem %s6993_s23, 16384  ;;  %p6424_p4 = scmp.lt.s32.totalorder %s6993_s23, %s6993_s23 }
  0x6e   : > { %p6417_p5 = scmp.ne.s32.totalorder %s6993_s23, %s6416_s30  ;;  %p6425_p10 = scmp.lt.s32.totalorder %s6416_s30, %s6416_s30 }
  0x70   : > { %p6419_p7 = pnand %p6417_p5, %p7003_p8  ;;  %p6426_p11 = por %p6425_p10, %p6424_p4 }
  0x72   : > { %p6420_p9 = pneg %p6419_p7 }
  0x74   : > { %p6427_p12 = pnand %p6426_p11, %p6420_p9 }
  0x76   : > { %6430 = shalt.err (!%p6427_p12)
}
  0x77   : > { %6165 = dma.hbm_to_vmem [thread:$0]  (!%p6987_p6), %s9784_s8, 16384, %s6993_s23, [#allocation12], %s6814_s20, %s6814_s20, %s6815_s17  }
  0x78   : > { %s6816_s13 = smov [#allocation14]   ;;  %s6817_s0 = smov [#allocation17]  }
  0x79   : > { %s614_s29 = sshll.u32 %s6816_s13, 4  ;;  %s641_s21 = sshll.u32 %s6817_s0, 4  ;;  %s615_s29 = int_to_ptr.vmem [resolvable:$true] %s614_s29  ;;  %s642_s21 = int_to_ptr.vmem [resolvable:$true] %s641_s21 }
  0x7a   : > { %s9785_s10 = sld [smem:[#allocation119_spill]] }
  0x80   : > { %s6431_s22 = scalar_lea.hbm %s9785_s10, 64 }
  0x81   : > { %p6432_p13 = scmp.ne.s32.totalorder %s9785_s10, %s6431_s22  ;;  %p6438_p5 = scmp.lt.u32.totalorder %s6431_s22, %s9785_s10 }
  0x83   : > { %p6434_p0 = pnand %p6432_p13, %p7003_p8 }
  0x85   : > { %p6435_p2 = pneg %p6434_p0 }
  0x87   : > { %p6440_p7 = pnand %p6438_p5, %p6435_p2 }
  0x89   : > { %6443 = shalt.err (!%p6440_p7)
}
  0x8a   : > { %s6444_s23 = scalar_lea.vmem %s615_s29, 64  ;;  %p6452_p11 = scmp.lt.s32.totalorder %s615_s29, %s615_s29 }
  0x8b   : > { %p6445_p9 = scmp.ne.s32.totalorder %s615_s29, %s6444_s23  ;;  %p6453_p12 = scmp.lt.s32.totalorder %s6444_s23, %s6444_s23 }
  0x8d   : > { %p6447_p4 = pnand %p6445_p9, %p7003_p8  ;;  %p6454_p1 = por %p6453_p12, %p6452_p11 }
  0x8f   : > { %p6448_p10 = pneg %p6447_p4 }
  0x91   : > { %p6455_p3 = pnand %p6454_p1, %p6448_p10 }
  0x93   : > { %6458 = shalt.err (!%p6455_p3)
}
  0x94   : > { %6171 = dma.hbm_to_vmem [thread:$0]  (!%p6987_p6), %s9785_s10, 64, %s615_s29, [#allocation15]  }
  0x95   : > { %s9786_s14 = sld [smem:[#allocation123_spill]] }
  0x9b   : > { %s6459_s1 = scalar_lea.hbm %s9786_s14, 2048 }
  0x9c   : > { %p6460_p13 = scmp.ne.s32.totalorder %s9786_s14, %s6459_s1  ;;  %p6466_p3 = scmp.lt.u32.totalorder %s6459_s1, %s9786_s14 }
  0x9e   : > { %p6462_p0 = pnand %p6460_p13, %p7003_p8 }
  0xa0   : > { %p6463_p1 = pneg %p6462_p0 }
  0xa2   : > { %p6468_p2 = pnand %p6466_p3, %p6463_p1 }
  0xa4   : > { %6471 = shalt.err (!%p6468_p2)
}
  0xa5   : > { %s6472_s28 = scalar_lea.vmem %s642_s21, 2048  ;;  %p6480_p4 = scmp.lt.s32.totalorder %s642_s21, %s642_s21 }
  0xa6   : > { %p6473_p5 = scmp.ne.s32.totalorder %s642_s21, %s6472_s28  ;;  %p6481_p10 = scmp.lt.s32.totalorder %s6472_s28, %s6472_s28 }
  0xa8   : > { %p6475_p7 = pnand %p6473_p5, %p7003_p8  ;;  %p6482_p11 = por %p6481_p10, %p6480_p4 }
  0xaa   : > { %p6476_p9 = pneg %p6475_p7 }
  0xac   : > { %p6483_p12 = pnand %p6482_p11, %p6476_p9 }
  0xae   : > { %6486 = shalt.err (!%p6483_p12)
}
  0xaf   : > { %6177 = dma.hbm_to_vmem [thread:$0]  (!%p6987_p6), %s9786_s14, 2048, %s642_s21, [#allocation18], %s6814_s20, %s6814_s20, %s6815_s17  }
  0xb0   : > { %s6818_s12 = smov [#allocation20]   ;;  %s6819_s3 = smov [#allocation10]  }
  0xb1   : > { %s667_s13 = sshll.u32 %s6818_s12, 4  ;;  %s577_s0 = sshll.u32 %s6819_s3, 4  ;;  %s668_s13 = int_to_ptr.vmem [resolvable:$true] %s667_s13  ;;  %s578_s0 = int_to_ptr.vmem [resolvable:$true] %s577_s0 }
  0xb2   : > { %s6487_s22 = scalar_lea.hbm %s9633_s16, 2048 }
  0xb3   : > { %p6488_p13 = scmp.ne.s32.totalorder %s9633_s16, %s6487_s22  ;;  %p6494_p3 = scmp.lt.u32.totalorder %s6487_s22, %s9633_s16 }
  0xb5   : > { %p6490_p0 = pnand %p6488_p13, %p7003_p8 }
  0xb7   : > { %p6491_p1 = pneg %p6490_p0 }
  0xb9   : > { %p6496_p2 = pnand %p6494_p3, %p6491_p1 }
  0xbb   : > { %6499 = shalt.err (!%p6496_p2)
}
  0xbc   : > { %s6500_s21 = scalar_lea.vmem %s668_s13, 2048  ;;  %p6508_p4 = scmp.lt.s32.totalorder %s668_s13, %s668_s13 }
  0xbd   : > { %p6501_p5 = scmp.ne.s32.totalorder %s668_s13, %s6500_s21  ;;  %p6509_p10 = scmp.lt.s32.totalorder %s6500_s21, %s6500_s21 }
  0xbf   : > { %p6503_p7 = pnand %p6501_p5, %p7003_p8  ;;  %p6510_p11 = por %p6509_p10, %p6508_p4 }
  0xc1   : > { %p6504_p9 = pneg %p6503_p7 }
  0xc3   : > { %p6511_p12 = pnand %p6510_p11, %p6504_p9 }
  0xc5   : > { %6514 = shalt.err (!%p6511_p12)
}
  0xc6   : > { %s9653_s23 = smov 128   ;;  %s9655_s12 = smov 8  }
  0xc7   : > { %6183 = dma.hbm_to_vmem [thread:$0]  (!%p6987_p6), %s9633_s16, 2048, %s668_s13, [#allocation21], %s9653_s23, %s9653_s23, %s9655_s12  }
  0xc8   : > { %s9787_s7 = sld [smem:[#allocation116_spill]] }
  0xce   : > { %s6515_s18 = scalar_lea.hbm %s9787_s7, 64 }
  0xcf   : > { %p6516_p13 = scmp.ne.s32.totalorder %s9787_s7, %s6515_s18  ;;  %p6522_p3 = scmp.lt.u32.totalorder %s6515_s18, %s9787_s7 }
  0xd1   : > { %p6518_p0 = pnand %p6516_p13, %p7003_p8 }
  0xd3   : > { %p6519_p1 = pneg %p6518_p0 }
  0xd5   : > { %p6524_p2 = pnand %p6522_p3, %p6519_p1 }
  0xd7   : > { %6527 = shalt.err (!%p6524_p2)
}
  0xd8   : > { %s6528_s3 = scalar_lea.vmem %s578_s0, 64  ;;  %p6536_p4 = scmp.lt.s32.totalorder %s578_s0, %s578_s0 }
  0xd9   : > { %p6529_p5 = scmp.ne.s32.totalorder %s578_s0, %s6528_s3  ;;  %p6537_p10 = scmp.lt.s32.totalorder %s6528_s3, %s6528_s3 }
  0xdb   : > { %p6531_p7 = pnand %p6529_p5, %p7003_p8  ;;  %p6538_p11 = por %p6537_p10, %p6536_p4 }
  0xdd   : > { %p6532_p9 = pneg %p6531_p7 }
  0xdf   : > { %p6539_p12 = pnand %p6538_p11, %p6532_p9 }
  0xe1   : > { %6542 = shalt.err (!%p6539_p12)
}
  0xe2   : > { %6162 = dma.hbm_to_vmem [thread:$0]  (!%p6987_p6), %s9787_s7, 64, %s578_s0, [#allocation9]  }
  0xe3   : > { %s6822_s24 = smov [#allocation13]   ;;  %s6823_s18 = smov [#allocation16]  }
  0xe4   : > { %s600_s22 = sshll.u32 %s6822_s24, 4  ;;  %s625_s30 = sshll.u32 %s6823_s18, 4  ;;  %s601_s22 = int_to_ptr.vmem [resolvable:$true] %s600_s22  ;;  %s626_s30 = int_to_ptr.vmem [resolvable:$true] %s625_s30 }
  0xe5   : > { %s9788_s9 = sld [smem:[#allocation118_spill]] }
  0xeb   : > { %s6543_s21 = scalar_lea.hbm %s9788_s9, 16384 }
  0xec   : > { %p6544_p13 = scmp.ne.s32.totalorder %s9788_s9, %s6543_s21  ;;  %p6550_p3 = scmp.lt.u32.totalorder %s6543_s21, %s9788_s9 }
  0xee   : > { %p6546_p0 = pnand %p6544_p13, %p7003_p8 }
  0xf0   : > { %p6547_p1 = pneg %p6546_p0 }
  0xf2   : > { %p6552_p2 = pnand %p6550_p3, %p6547_p1 }
  0xf4   : > { %6555 = shalt.err (!%p6552_p2)
}
  0xf5   : > { %s6556_s0 = scalar_lea.vmem %s601_s22, 16384  ;;  %p6564_p4 = scmp.lt.s32.totalorder %s601_s22, %s601_s22 }
  0xf6   : > { %p6557_p5 = scmp.ne.s32.totalorder %s601_s22, %s6556_s0  ;;  %p6565_p10 = scmp.lt.s32.totalorder %s6556_s0, %s6556_s0 }
  0xf8   : > { %p6559_p7 = pnand %p6557_p5, %p7003_p8  ;;  %p6566_p11 = por %p6565_p10, %p6564_p4 }
  0xfa   : > { %p6560_p9 = pneg %p6559_p7 }
  0xfc   : > { %p6567_p12 = pnand %p6566_p11, %p6560_p9 }
  0xfe   : > { %6570 = shalt.err (!%p6567_p12)
}
  0xff   : > { %6168 = dma.hbm_to_vmem [thread:$0]  (!%p6987_p6), %s9788_s9, 16384, %s601_s22, [#allocation12], %s6814_s20, %s6814_s20, %s6815_s17  }
 0x100   : > { %s9789_s11 = sld [smem:[#allocation120_spill]] }
 0x106   : > { %s6571_s18 = scalar_lea.hbm %s9789_s11, 32 }
 0x107   : > { %p6572_p13 = scmp.ne.s32.totalorder %s9789_s11, %s6571_s18  ;;  %p6578_p3 = scmp.lt.u32.totalorder %s6571_s18, %s9789_s11 }
 0x109   : > { %p6574_p0 = pnand %p6572_p13, %p7003_p8 }
 0x10b   : > { %p6575_p1 = pneg %p6574_p0 }
 0x10d   : > { %p6580_p2 = pnand %p6578_p3, %p6575_p1 }
 0x10f   : > { %6583 = shalt.err (!%p6580_p2)
}
 0x110   : > { %s6584_s13 = scalar_lea.vmem %s626_s30, 32  ;;  %p6592_p4 = scmp.lt.s32.totalorder %s626_s30, %s626_s30 }
 0x111   : > { %p6585_p5 = scmp.ne.s32.totalorder %s626_s30, %s6584_s13  ;;  %p6593_p10 = scmp.lt.s32.totalorder %s6584_s13, %s6584_s13 }
 0x113   : > { %p6587_p7 = pnand %p6585_p5, %p7003_p8  ;;  %p6594_p11 = por %p6593_p10, %p6592_p4 }
 0x115   : > { %p6588_p9 = pneg %p6587_p7 }
 0x117   : > { %p6595_p12 = pnand %p6594_p11, %p6588_p9 }
 0x119   : > { %6598 = shalt.err (!%p6595_p12)
}
 0x11a   : > { %6174 = dma.hbm_to_vmem [thread:$0]  (!%p6987_p6), %s9789_s11, 32, %s626_s30, [#allocation15]  }
 0x11b   : > { %s6824_s22 = smov [#allocation19]   ;;  %s6825_s23 = smov [#allocation22]  }
 0x11c   : > { %s654_s0 = sshll.u32 %s6824_s22, 4  ;;  %s686_s12 = sshll.u32 %s6825_s23, 4  ;;  %s655_s0 = int_to_ptr.vmem [resolvable:$true] %s654_s0  ;;  %s687_s12 = int_to_ptr.vmem [resolvable:$true] %s686_s12 }
 0x11d   : > { %s6599_s18 = scalar_lea.hbm %s9632_s15, 8192 }
 0x11e   : > { %p6600_p13 = scmp.ne.s32.totalorder %s9632_s15, %s6599_s18  ;;  %p6606_p3 = scmp.lt.u32.totalorder %s6599_s18, %s9632_s15 }
 0x120   : > { %p6602_p0 = pnand %p6600_p13, %p7003_p8 }
 0x122   : > { %p6603_p1 = pneg %p6602_p0 }
 0x124   : > { %p6608_p2 = pnand %p6606_p3, %p6603_p1 }
 0x126   : > { %6611 = shalt.err (!%p6608_p2)
}
 0x127   : > { %s6612_s30 = scalar_lea.vmem %s655_s0, 8192  ;;  %p6620_p4 = scmp.lt.s32.totalorder %s655_s0, %s655_s0 }
 0x128   : > { %p6613_p5 = scmp.ne.s32.totalorder %s655_s0, %s6612_s30  ;;  %p6621_p10 = scmp.lt.s32.totalorder %s6612_s30, %s6612_s30 }
 0x12a   : > { %p6615_p7 = pnand %p6613_p5, %p7003_p8  ;;  %p6622_p11 = por %p6621_p10, %p6620_p4 }
 0x12c   : > { %p6616_p9 = pneg %p6615_p7 }
 0x12e   : > { %p6623_p12 = pnand %p6622_p11, %p6616_p9 }
 0x130   : > { %6626 = shalt.err (!%p6623_p12)
}
 0x131   : > { %s9790_s13 = smov 8   ;;  %s9791_s20 = smov 128  }
 0x132   : > { %6180 = dma.hbm_to_vmem [thread:$0]  (!%p6987_p6), %s9632_s15, 8192, %s655_s0, [#allocation18], %s9791_s20, %s9791_s20, %s9790_s13  }
 0x133   : > { %s6627_s24 = scalar_lea.hbm %s9636_s19, 2048 }
 0x134   : > { %p6628_p13 = scmp.ne.s32.totalorder %s9636_s19, %s6627_s24  ;;  %p6634_p3 = scmp.lt.u32.totalorder %s6627_s24, %s9636_s19 }
 0x136   : > { %p6630_p0 = pnand %p6628_p13, %p7003_p8 }
 0x138   : > { %p6631_p1 = pneg %p6630_p0 }
 0x13a   : > { %p6636_p2 = pnand %p6634_p3, %p6631_p1 }
 0x13c   : > { %6639 = shalt.err (!%p6636_p2)
}
 0x13d   : > { %s6640_s3 = scalar_lea.vmem %s687_s12, 2048  ;;  %p6648_p4 = scmp.lt.s32.totalorder %s687_s12, %s687_s12 }
 0x13e   : > { %p6641_p5 = scmp.ne.s32.totalorder %s687_s12, %s6640_s3  ;;  %p6649_p10 = scmp.lt.s32.totalorder %s6640_s3, %s6640_s3 }
 0x140   : > { %p6643_p7 = pnand %p6641_p5, %p7003_p8  ;;  %p6650_p11 = por %p6649_p10, %p6648_p4 }
 0x142   : > { %p6644_p9 = pneg %p6643_p7 }
 0x144   : > { %p6651_p12 = pnand %p6650_p11, %p6644_p9 }
 0x146   : > { %6654 = shalt.err (!%p6651_p12)
}
 0x147   : > { %s9792_s4 = sld [smem:[#allocation33_spill]]  ;;  %s4747_s5 = sadd.s32 4294967294, %s6809_s27  }
 0x148   : > { %6186 = dma.hbm_to_vmem [thread:$0]  (!%p6987_p6), %s9636_s19, 2048, %s687_s12, [#allocation21], %s9791_s20, %s9791_s20, %s9790_s13  }
 0x149   : > { %s7240_s17 = sadd.s32 1, %s6809_s27   ;;  %s52_s22 = sadd.s32 1, %s6805_s26 }
 0x14a   : > { %s49_s23 = ssub.s32 %s6809_s27, %s7240_s17  ;;  %p59_p8 = scmp.ne.s32.totalorder %s6805_s26, %s6801_s25 }
 0x14b   : > { %p50_p13 = scmp.eq.s32.totalorder %s49_s23, 0  ;;  %p60_p0 = scmp.eq.s32.totalorder %s6809_s27, 0 }
 0x14c   : > { %p65_p1 = scmp.ne.s32.totalorder %s6801_s25, %s6797_s2  ;;  %p525_p9 = scmp.eq.s32.totalorder %s4747_s5, 1 }
 0x14d   : > { %p519_p3 = scmp.eq.s32.totalorder %s9792_s4, 1  ;;  %p61_p2 = por %p60_p0, %p59_p8 }
 0x14e   : > { %s7252_s1 = scalar_select %p50_p13, %s6805_s26, %s52_s22  }
 0x14f   : > { %p9793_p5 = scmp.eq.s32.totalorder %s9792_s4, 0  ;;  %p7260_p6 = por %p519_p3, %p59_p8 }
 0x150   : > { %p6209_p4 = scmp.lt.s32.totalorder %s6809_s27, 2  ;;  %s7266_s18 = sand.u32 1, %s6805_s26  }
 0x151   : > { %p7256_p7 = por %p9793_p5, %p65_p1  ;;  %p7268_p10 = por %p525_p9, %p65_p1 }
 0x152   : > { %s9795_s24 = scalar_select %p7260_p6, 1, 0 }
 0x153   : > { %s9796_s28 = scalar_select %p7268_p10, 1, 0 }
 0x154   : > { %s4761_s29 = sshll.u32 %s7266_s18, 5  ;;  %s4838_s21 = sshll.u32 %s6809_s27, 9 }
 0x155   : > { %s9797_s30 = sld [smem:[#allocation109_spill]]  ;;  %s707_s5 = scalar_lea.vmem [#allocation2], %s4761_s29 }
 0x156   : > { %s714_s22 = sshll.u32 %s707_s5, 4  ;;  %p7279_p11 = pnand %p6209_p4, %p61_p2  ;;  %s7283_s22 = int_to_ptr.vmem [resolvable:$true] %s714_s22 }
 0x157   : > { %s704_s7 = scalar_lea.sflag [#allocation3], %s7266_s18 }
 0x158   : > { %p6657_p8 = pneg %p7279_p11 }
 0x15b   : > { %s7277_s4 = scalar_lea.hbm %s9797_s30, %s4838_s21  ;;  %s6660_s3 = scalar_lea.hbm %s9797_s30, 1024 }
 0x15c   : > { %s6655_s8 = scalar_lea.hbm %s7277_s4, 512  ;;  %p6661_p1 = scmp.lt.u32.totalorder %s7277_s4, %s9797_s30 }
 0x15d   : > { %p6656_p12 = scmp.ne.s32.totalorder %s7277_s4, %s6655_s8  ;;  %p6662_p3 = scmp.lt.u32.totalorder %s6660_s3, %s6655_s8 }
 0x15e   : > { %p6664_p5 = scmp.lt.u32.totalorder %s6655_s8, %s7277_s4 }
 0x15f   : > { %p6658_p13 = pnand %p6657_p8, %p6656_p12  ;;  %p6663_p2 = por %p6662_p3, %p6661_p1 }
 0x161   : > { %p6659_p0 = pneg %p6658_p13  ;;  %p6665_p9 = por %p6664_p5, %p6663_p2 }
 0x163   : > { %p6666_p4 = pnand %p6665_p9, %p6659_p0 }
 0x165   : > { %6669 = shalt.err (!%p6666_p4)
}
 0x166   : > { %s6670_s6 = scalar_lea.vmem %s7283_s22, 512  ;;  %s6826_s29 = smov [#allocation2]  }
 0x167   : > { %p6671_p12 = scmp.ne.s32.totalorder %s7283_s22, %s6670_s6  ;;  %s6675_s21 = sshll.u32 %s6826_s29, 4  ;;  %s6676_s21 = int_to_ptr.vmem [resolvable:$false] %s6675_s21 }
 0x168   : > { %s6677_s0 = scalar_lea.vmem %s6676_s21, 1024  ;;  %p6678_p6 = scmp.lt.s32.totalorder %s7283_s22, %s6676_s21 }
 0x169   : > { %p6673_p13 = pnand %p6671_p12, %p6657_p8  ;;  %p6679_p1 = scmp.lt.s32.totalorder %s6677_s0, %s6670_s6 }
 0x16b   : > { %p6674_p10 = pneg %p6673_p13  ;;  %p6680_p3 = por %p6679_p1, %p6678_p6 }
 0x16d   : > { %p6681_p2 = pnand %p6680_p3, %p6674_p10 }
 0x16f   : > { %6684 = shalt.err (!%p6681_p2)
}
 0x170   : > { %6190 = dma.hbm_to_vmem [thread:$0]  (!%p7279_p11), %s7277_s4, 512, %s7283_s22, %s704_s7, %s9791_s20, %s9791_s20, %s9790_s13  }
 0x171   : > { %s4764_s8 = sshll.u32 %s7266_s18, 6  ;;  %s4840_s3 = sshll.u32 %s6809_s27, 10 }
 0x172   : > { %s9799_s29 = sld [smem:[#allocation111_spill]]  ;;  %s738_s0 = scalar_lea.vmem [#allocation5], %s4764_s8 }
 0x173   : > { %s746_s9 = sshll.u32 %s738_s0, 4  ;;  %s9800_s10 = sand.u32 1, %s6809_s27   ;;  %s7324_s9 = int_to_ptr.vmem [resolvable:$true] %s746_s9 }
 0x174   : > { %s7328_s11 = scalar_lea.sflag [#allocation6], %s9800_s10 }
 0x178   : > { %s7322_s21 = scalar_lea.hbm %s9799_s29, %s4840_s3  ;;  %s6690_s20 = scalar_lea.hbm %s9799_s29, 2048 }
 0x179   : > { %s6685_s14 = scalar_lea.hbm %s7322_s21, 1024  ;;  %p6691_p5 = scmp.lt.u32.totalorder %s7322_s21, %s9799_s29 }
 0x17a   : > { %p6686_p6 = scmp.ne.s32.totalorder %s7322_s21, %s6685_s14  ;;  %p6692_p9 = scmp.lt.u32.totalorder %s6690_s20, %s6685_s14 }
 0x17b   : > { %p6694_p12 = scmp.lt.u32.totalorder %s6685_s14, %s7322_s21 }
 0x17c   : > { %p6688_p10 = pnand %p6686_p6, %p6657_p8  ;;  %p6693_p4 = por %p6692_p9, %p6691_p5 }
 0x17e   : > { %p6689_p0 = pneg %p6688_p10  ;;  %p6695_p13 = por %p6694_p12, %p6693_p4 }
 0x180   : > { %p6696_p1 = pnand %p6695_p13, %p6689_p0 }
 0x182   : > { %6699 = shalt.err (!%p6696_p1)
}
 0x183   : > { %s6700_s10 = scalar_lea.vmem %s7324_s9, 1024  ;;  %s6827_s22 = smov [#allocation5]  }
 0x184   : > { %p6701_p3 = scmp.ne.s32.totalorder %s7324_s9, %s6700_s10  ;;  %s6705_s8 = sshll.u32 %s6827_s22, 4  ;;  %s6706_s8 = int_to_ptr.vmem [resolvable:$false] %s6705_s8 }
 0x185   : > { %s6707_s3 = scalar_lea.vmem %s6706_s8, 2048  ;;  %p6708_p10 = scmp.lt.s32.totalorder %s7324_s9, %s6706_s8 }
 0x186   : > { %p6703_p2 = pnand %p6701_p3, %p6657_p8  ;;  %p6709_p5 = scmp.lt.s32.totalorder %s6707_s3, %s6700_s10 }
 0x188   : > { %p6704_p6 = pneg %p6703_p2  ;;  %p6710_p9 = por %p6709_p5, %p6708_p10 }
 0x18a   : > { %p6711_p4 = pnand %p6710_p9, %p6704_p6 }
 0x18c   : > { %6714 = shalt.err (!%p6711_p4)
}
 0x18d   : > { %s6828_s14 = smov 256   ;;  %s6829_s6 = smov 16  }
 0x18e   : > { %6193 = dma.hbm_to_vmem [thread:$0]  (!%p7279_p11), %s7322_s21, 1024, %s7324_s9, %s7328_s11, %s6828_s14, %s6828_s14, %s6829_s6  }
 0x18f   : > { %s9801_s5 = sld [smem:[#allocation34_spill]] }
 0x195   : > { %p9802_p8 = scmp.ne.s32.totalorder %s9801_s5, 0 }
 0x197   : > { %758 = sbr.rel (%p9802_p8) target bundleno = 2766 (0xace), region = 104 }
 0x19e   : > { %s7357_s0 = sand.u32 1, %s6801_s25  }
 0x19f   : > { %s9757_s7 = sshll.u32 %s7357_s0, 5  ;;  %s761_s13 = scalar_lea.sflag [#allocation3], %s7357_s0 }
 0x1a0   : > { %s7363_s20 = scalar_lea.vmem [#allocation2], %s9757_s7 }
 0x1a1   : > { %6760 = dma.done.wait (%p7256_p7), %s761_s13, 512  }
 0x1a2   : > { %6762 = vsyncadd (%p7256_p7), %s761_s13, 4294966784  ;;  %s9803_s9 = sld [smem:[#allocation33_spill]]  ;;  %s4770_s23 = sshll.u32 %s7357_s0, 6 }
 0x1a3   : > { %s7371_s18 = scalar_lea.vmem [#allocation5], %s4770_s23 }
 0x1a8   : > { %s769_s11 = sand.u32 1, %s9803_s9  }
 0x1a9   : > { %s770_s21 = scalar_lea.sflag [#allocation6], %s769_s11 }
 0x1aa   : > { %6764 = dma.done.wait (%p7256_p7), %s770_s21, 1024  }
 0x1ab   : > { %6766 = vsyncadd (%p7256_p7), %s770_s21, 4294966272  ;;  %p9804_p11 = scmp.eq.s32.totalorder %s9803_s9, 0 }
 0x1ad   : > { %6768 = dma.done.wait (%p9804_p11), [#allocation6], 16384   ;;  %p9805_p0 = pmov %p9804_p11 }
 0x1af   : > { %6770 = vsyncadd (%p9805_p0), [#allocation6], 4294950912  ;;  %p9806_p12 = pmov %p9805_p0 }
 0x1b0   : > { %p9807_p13 = pmov %p9805_p0 }
 0x1b1   : > { %6772 = dma.done.wait (%p9806_p12), [#allocation9], 16448  }
 0x1b2   : > { %6774 = vsyncadd (%p9807_p13), [#allocation9], 4294950848  ;;  %p9808_p1 = pmov %p9805_p0 }
 0x1b3   : > { %p9809_p3 = pmov %p9805_p0 }
 0x1b4   : > { %6776 = dma.done.wait (%p9808_p1), [#allocation12], 32768  }
 0x1b5   : > { %6778 = vsyncadd (%p9809_p3), [#allocation12], 4294934528  ;;  %p9810_p7 = pmov %p9805_p0 }
 0x1b6   : > { %p9811_p2 = pmov %p9805_p0 }
 0x1b7   : > { %6780 = dma.done.wait (%p9810_p7), [#allocation15], 96  }
 0x1b8   : > { %6782 = vsyncadd (%p9811_p2), [#allocation15], 4294967200  ;;  %p9812_p6 = pmov %p9805_p0 }
 0x1b9   : > { %p9813_p10 = pmov %p9805_p0 }
 0x1ba   : > { %6784 = dma.done.wait (%p9812_p6), [#allocation18], 10240  }
 0x1bb   : > { %6786 = vsyncadd (%p9813_p10), [#allocation18], 4294957056  ;;  %p9814_p5 = pmov %p9805_p0 }
 0x1bc   : > { %p9815_p9 = pmov %p9805_p0 }
 0x1bd   : > { %6788 = dma.done.wait (%p9814_p5), [#allocation21], 4096  }
 0x1be   : > { %6790 = vsyncadd (%p9815_p9), [#allocation21], 4294963200  ;;  %v9658_v0 = vmov 0.0   ;;  %s9816_s10 = sld [smem:[#allocation112_spill]]  ;;  %s10062_s21 = sld [smem:[#allocation110_spill]] }
 0x1bf   : > { %1911 = vmatprep.mubr.f32.mxu0 %v9658_v0  ;;  %2000 = vmatprep.mubr.f32.mxu1 %v9658_v0  ;;  %s10065_s8 = sld [smem:[#allocation121_spill]]  ;;  %s10070_s23 = sld [smem:[#allocation122_spill]] }
 0x1c0   : > { %s10074_s4 = sld [smem:[#allocation126_spill]]  ;;  %s10075_s22 = sshll.u32 %s7357_s0, 5 }
 0x1c1   : > { %s886_s3 = scalar_lea.vmem [#allocation23], %s10075_s22  ;;  %s4842_s14 = sshll.u32 %s9803_s9, 9 }
 0x1c2   : > { %s4535_s7 = sshll.u32 %s886_s3, 4  ;;  %p10077_p11 = scmp.ne.s32.totalorder %s9795_s24, 0  ;;  %s9568_s7 = int_to_ptr.vmem [resolvable:$true] %s4535_s7 }
 0x1c4   : > { %v1762_v1 = vld [vmem:[%s9816_s10 + $0x8] sm:$0xff]  ;;  %v1764_v3 = vld [vmem:[%s9816_s10 + $0x18] sm:$0xff]  ;;  %v1761_v6 = vld [vmem:[%s9816_s10] sm:$0xff] }
 0x1c5   : > { %v1766_v2 = vld [vmem:[%s9816_s10 + $0x28] sm:$0xff]  ;;  %v1768_v5 = vld [vmem:[%s9816_s10 + $0x38] sm:$0xff]  ;;  %v1765_v7 = vld [vmem:[%s9816_s10 + $0x20] sm:$0xff] }
 0x1c6   : > { %v5215_v4 = vpack.c.bf16 %v1766_v2, %v1762_v1  ;;  %v5247_v8 = vpack.c.bf16 %v1768_v5, %v1764_v3  ;;  %v5217_v9 = vpack.c.bf16 %v1765_v7, %v1761_v6  ;;  %v1763_v10 = vld [vmem:[%s9816_s10 + $0x10] sm:$0xff]  ;;  %v1770_v12 = vld [vmem:[%s9816_s10 + $0x48] sm:$0xff]  ;;  %v1772_v15 = vld [vmem:[%s9816_s10 + $0x58] sm:$0xff] }
 0x1c7   : > { %v1767_v11 = vld [vmem:[%s9816_s10 + $0x30] sm:$0xff]  ;;  %v1774_v14 = vld [vmem:[%s9816_s10 + $0x68] sm:$0xff]  ;;  %v1776_v16 = vld [vmem:[%s9816_s10 + $0x78] sm:$0xff] }
 0x1c8   : > { %5216 = vmatprep.subr.bf16.mxu0 %v5215_v4  ;;  %v5249_v13 = vpack.c.bf16 %v1767_v11, %v1763_v10  ;;  %5248 = vmatprep.subr.bf16.mxu1 %v5247_v8  ;;  %v5219_v17 = vpack.c.bf16 %v1774_v14, %v1770_v12  ;;  %v5251_v18 = vpack.c.bf16 %v1776_v16, %v1772_v15  ;;  %v1769_v19 = vld [vmem:[%s9816_s10 + $0x40] sm:$0xff]  ;;  %v1771_v21 = vld [vmem:[%s9816_s10 + $0x50] sm:$0xff]  ;;  %v1778_v24 = vld [vmem:[%s9816_s10 + $0x88] sm:$0xff] }
 0x1c9   : > { %5218 = vmatpush1.bf16.msra.mxu0 %v5217_v9  ;;  %v1773_v20 = vld [vmem:[%s9816_s10 + $0x60] sm:$0xff]  ;;  %v1775_v23 = vld [vmem:[%s9816_s10 + $0x70] sm:$0xff]  ;;  %v1782_v25 = vld [vmem:[%s9816_s10 + $0xa8] sm:$0xff] }
 0x1ca   : > { %5250 = vmatpush1.bf16.msra.mxu1 %v5249_v13  ;;  %v5221_v22 = vpack.c.bf16 %v1773_v20, %v1769_v19  ;;  %5220 = vmatprep.subr.bf16.mxu0 %v5219_v17  ;;  %v5253_v26 = vpack.c.bf16 %v1775_v23, %v1771_v21  ;;  %v5223_v27 = vpack.c.bf16 %v1782_v25, %v1778_v24  ;;  %v1780_v28 = vld [vmem:[%s9816_s10 + $0x98] sm:$0xff]  ;;  %v1777_v30 = vld [vmem:[%s9816_s10 + $0x80] sm:$0xff]  ;;  %v1779_v33 = vld [vmem:[%s9816_s10 + $0x90] sm:$0xff] }
 0x1cb   : > { %5252 = vmatprep.subr.bf16.mxu1 %v5251_v18  ;;  %v1784_v29 = vld [vmem:[%s9816_s10 + $0xb8] sm:$0xff]  ;;  %v1781_v32 = vld [vmem:[%s9816_s10 + $0xa0] sm:$0xff]  ;;  %v1783_v34 = vld [vmem:[%s9816_s10 + $0xb0] sm:$0xff] }
 0x1cc   : > { %v5255_v31 = vpack.c.bf16 %v1784_v29, %v1780_v28  ;;  %v5225_v35 = vpack.c.bf16 %v1781_v32, %v1777_v30  ;;  %v1786_v36 = vld [vmem:[%s9816_s10 + $0xc8] sm:$0xff]  ;;  %v1788_v38 = vld [vmem:[%s9816_s10 + $0xd8] sm:$0xff]  ;;  %v5257_v39 = vpack.c.bf16 %v1783_v34, %v1779_v33  ;;  %v1785_v42 = vld [vmem:[%s9816_s10 + $0xc0] sm:$0xff] }
 0x1cd   : > { %5222 = vmatpush1.bf16.msra.mxu0 %v5221_v22  ;;  %v1790_v37 = vld [vmem:[%s9816_s10 + $0xe8] sm:$0xff]  ;;  %v1792_v41 = vld [vmem:[%s9816_s10 + $0xf8] sm:$0xff]  ;;  %v1789_v43 = vld [vmem:[%s9816_s10 + $0xe0] sm:$0xff] }
 0x1ce   : > { %5254 = vmatpush1.bf16.msra.mxu1 %v5253_v26  ;;  %5224 = vmatprep.subr.bf16.mxu0 %v5223_v27  ;;  %v5227_v40 = vpack.c.bf16 %v1790_v37, %v1786_v36  ;;  %v5259_v44 = vpack.c.bf16 %v1792_v41, %v1788_v38  ;;  %v1787_v45 = vld [vmem:[%s9816_s10 + $0xd0] sm:$0xff]  ;;  %v1794_v47 = vld [vmem:[%s9816_s10 + $0x108] sm:$0xff]  ;;  %v1796_v49 = vld [vmem:[%s9816_s10 + $0x118] sm:$0xff]  ;;  %v5229_v51 = vpack.c.bf16 %v1789_v43, %v1785_v42 }
 0x1cf   : > { %5256 = vmatprep.subr.bf16.mxu1 %v5255_v31  ;;  %v1791_v46 = vld [vmem:[%s9816_s10 + $0xf0] sm:$0xff]  ;;  %v1798_v48 = vld [vmem:[%s9816_s10 + $0x128] sm:$0xff]  ;;  %v1800_v50 = vld [vmem:[%s9816_s10 + $0x138] sm:$0xff] }
 0x1d0   : > { %v5261_v52 = vpack.c.bf16 %v1791_v46, %v1787_v45  ;;  %v5231_v53 = vpack.c.bf16 %v1798_v48, %v1794_v47  ;;  %v1793_v54 = vld [vmem:[%s9816_s10 + $0x100] sm:$0xff]  ;;  %v1795_v56 = vld [vmem:[%s9816_s10 + $0x110] sm:$0xff]  ;;  %v5263_v57 = vpack.c.bf16 %v1800_v50, %v1796_v49  ;;  %v1802_v59 = vld [vmem:[%s9816_s10 + $0x148] sm:$0xff] }
 0x1d1   : > { %5226 = vmatpush1.bf16.msra.mxu0 %v5225_v35  ;;  %v1797_v55 = vld [vmem:[%s9816_s10 + $0x120] sm:$0xff]  ;;  %v1799_v58 = vld [vmem:[%s9816_s10 + $0x130] sm:$0xff]  ;;  %v1806_v60 = vld [vmem:[%s9816_s10 + $0x168] sm:$0xff] }
 0x1d2   : > { %5258 = vmatpush1.bf16.msra.mxu1 %v5257_v39  ;;  %5228 = vmatprep.subr.bf16.mxu0 %v5227_v40  ;;  %v1804_v61 = vld [vmem:[%s9816_s10 + $0x158] sm:$0xff]  ;;  %v5233_v63 = vpack.c.bf16 %v1797_v55, %v1793_v54  ;;  %v5265_v1 = vpack.c.bf16 %v1799_v58, %v1795_v56  ;;  %v5235_v2 = vpack.c.bf16 %v1806_v60, %v1802_v59  ;;  %v1801_v3 = vld [vmem:[%s9816_s10 + $0x140] sm:$0xff]  ;;  %v1803_v5 = vld [vmem:[%s9816_s10 + $0x150] sm:$0xff] }
 0x1d3   : > { %5260 = vmatprep.subr.bf16.mxu1 %v5259_v44  ;;  %v1808_v62 = vld [vmem:[%s9816_s10 + $0x178] sm:$0xff]  ;;  %v1805_v4 = vld [vmem:[%s9816_s10 + $0x160] sm:$0xff]  ;;  %v1807_v7 = vld [vmem:[%s9816_s10 + $0x170] sm:$0xff] }
 0x1d4   : > { %v5267_v6 = vpack.c.bf16 %v1808_v62, %v1804_v61  ;;  %v1810_v8 = vld [vmem:[%s9816_s10 + $0x188] sm:$0xff]  ;;  %v1812_v10 = vld [vmem:[%s9816_s10 + $0x198] sm:$0xff]  ;;  %v5237_v12 = vpack.c.bf16 %v1805_v4, %v1801_v3  ;;  %v5269_v13 = vpack.c.bf16 %v1807_v7, %v1803_v5  ;;  %v1809_v15 = vld [vmem:[%s9816_s10 + $0x180] sm:$0xff] }
 0x1d5   : > { %5230 = vmatpush1.bf16.msra.mxu0 %v5229_v51  ;;  %v1814_v9 = vld [vmem:[%s9816_s10 + $0x1a8] sm:$0xff]  ;;  %v1816_v11 = vld [vmem:[%s9816_s10 + $0x1b8] sm:$0xff]  ;;  %v1813_v16 = vld [vmem:[%s9816_s10 + $0x1a0] sm:$0xff] }
 0x1d6   : > { %5262 = vmatpush1.bf16.msra.mxu1 %v5261_v52  ;;  %5232 = vmatprep.subr.bf16.mxu0 %v5231_v53  ;;  %v5239_v14 = vpack.c.bf16 %v1814_v9, %v1810_v8  ;;  %v1811_v17 = vld [vmem:[%s9816_s10 + $0x190] sm:$0xff]  ;;  %v5271_v18 = vpack.c.bf16 %v1816_v11, %v1812_v10  ;;  %v1818_v20 = vld [vmem:[%s9816_s10 + $0x1c8] sm:$0xff]  ;;  %v1820_v22 = vld [vmem:[%s9816_s10 + $0x1d8] sm:$0xff]  ;;  %v5241_v24 = vpack.c.bf16 %v1813_v16, %v1809_v15 }
 0x1d7   : > { %5264 = vmatprep.subr.bf16.mxu1 %v5263_v57  ;;  %v1815_v19 = vld [vmem:[%s9816_s10 + $0x1b0] sm:$0xff]  ;;  %v1822_v21 = vld [vmem:[%s9816_s10 + $0x1e8] sm:$0xff]  ;;  %v1824_v23 = vld [vmem:[%s9816_s10 + $0x1f8] sm:$0xff] }
 0x1d8   : > { %v5273_v25 = vpack.c.bf16 %v1815_v19, %v1811_v17  ;;  %v5243_v26 = vpack.c.bf16 %v1822_v21, %v1818_v20  ;;  %v1817_v27 = vld [vmem:[%s9816_s10 + $0x1c0] sm:$0xff]  ;;  %v1819_v29 = vld [vmem:[%s9816_s10 + $0x1d0] sm:$0xff]  ;;  %v5275_v30 = vpack.c.bf16 %v1824_v23, %v1820_v22  ;;  %v2154_v32 = vld [vmem:[#allocation8 + $0x8] sm:$0xff] }
 0x1d9   : > { %5234 = vmatpush1.bf16.msra.mxu0 %v5233_v63  ;;  %v1821_v28 = vld [vmem:[%s9816_s10 + $0x1e0] sm:$0xff]  ;;  %v1823_v31 = vld [vmem:[%s9816_s10 + $0x1f0] sm:$0xff]  ;;  %v2158_v33 = vld [vmem:[#allocation8 + $0x28] sm:$0xff] }
 0x1da   : > { %5266 = vmatpush1.bf16.msra.mxu1 %v5265_v1  ;;  %5236 = vmatprep.subr.bf16.mxu0 %v5235_v2  ;;  %v2156_v34 = vld [vmem:[#allocation8 + $0x18] sm:$0xff]  ;;  %v5245_v36 = vpack.c.bf16 %v1821_v28, %v1817_v27  ;;  %v5277_v37 = vpack.c.bf16 %v1823_v31, %v1819_v29  ;;  %v5279_v38 = vpack.c.bf16 %v2158_v33, %v2154_v32  ;;  %v2153_v39 = vld [vmem:[#allocation8] sm:$0xff]  ;;  %v2155_v41 = vld [vmem:[#allocation8 + $0x10] sm:$0xff] }
 0x1db   : > { %5268 = vmatprep.subr.bf16.mxu1 %v5267_v6  ;;  %v2160_v35 = vld [vmem:[#allocation8 + $0x38] sm:$0xff]  ;;  %v2157_v40 = vld [vmem:[#allocation8 + $0x20] sm:$0xff]  ;;  %v2159_v43 = vld [vmem:[#allocation8 + $0x30] sm:$0xff] }
 0x1dc   : > { %v5343_v42 = vpack.c.bf16 %v2160_v35, %v2156_v34  ;;  %v2162_v44 = vld [vmem:[#allocation8 + $0x48] sm:$0xff]  ;;  %v2164_v46 = vld [vmem:[#allocation8 + $0x58] sm:$0xff]  ;;  %v897_v48 = vld [vmem:[%s7363_s20] sm:$0xff]  ;;  %v5281_v49 = vpack.c.bf16 %v2157_v40, %v2153_v39  ;;  %v5345_v50 = vpack.c.bf16 %v2159_v43, %v2155_v41 }
 0x1dd   : > { %5238 = vmatpush1.bf16.msra.mxu0 %v5237_v12  ;;  %v2166_v45 = vld [vmem:[#allocation8 + $0x68] sm:$0xff]  ;;  %v2168_v47 = vld [vmem:[#allocation8 + $0x78] sm:$0xff]  ;;  %v2161_v52 = vld [vmem:[#allocation8 + $0x40] sm:$0xff] }
 0x1de   : > { %5270 = vmatpush1.bf16.msra.mxu1 %v5269_v13  ;;  %5240 = vmatprep.subr.bf16.mxu0 %v5239_v14  ;;  %v5283_v51 = vpack.c.bf16 %v2166_v45, %v2162_v44  ;;  %v2165_v53 = vld [vmem:[#allocation8 + $0x60] sm:$0xff]  ;;  %v2163_v54 = vld [vmem:[#allocation8 + $0x50] sm:$0xff]  ;;  %v5347_v55 = vpack.c.bf16 %v2168_v47, %v2164_v46  ;;  %v2170_v57 = vld [vmem:[#allocation8 + $0x88] sm:$0xff] }
 0x1df   : > { %5272 = vmatprep.subr.bf16.mxu1 %v5271_v18  ;;  %v2167_v56 = vld [vmem:[#allocation8 + $0x70] sm:$0xff]  ;;  %v2174_v58 = vld [vmem:[#allocation8 + $0xa8] sm:$0xff]  ;;  %v2172_v59 = vld [vmem:[#allocation8 + $0x98] sm:$0xff]  ;;  %v5285_v61 = vpack.c.bf16 %v2165_v53, %v2161_v52 }
 0x1e0   : > { %v2176_v60 = vld [vmem:[#allocation8 + $0xb8] sm:$0xff]  ;;  %v5349_v62 = vpack.c.bf16 %v2167_v56, %v2163_v54  ;;  %v5287_v63 = vpack.c.bf16 %v2174_v58, %v2170_v57  ;;  %v2169_v1 = vld [vmem:[#allocation8 + $0x80] sm:$0xff]  ;;  %v2171_v3 = vld [vmem:[#allocation8 + $0x90] sm:$0xff]  ;;  %v919_v56 = vlaneseq }
 0x1e1   : > { %5242 = vmatpush1.bf16.msra.mxu0 %v5241_v24  ;;  %v2173_v2 = vld [vmem:[#allocation8 + $0xa0] sm:$0xff]  ;;  %v5351_v4 = vpack.c.bf16 %v2176_v60, %v2172_v59  ;;  %v2175_v5 = vld [vmem:[#allocation8 + $0xb0] sm:$0xff]  ;;  %v2178_v6 = vld [vmem:[#allocation8 + $0xc8] sm:$0xff] }
 0x1e2   : > { %5274 = vmatpush1.bf16.msra.mxu1 %v5273_v25  ;;  %5244 = vmatprep.subr.bf16.mxu0 %v5243_v26  ;;  %v2182_v7 = vld [vmem:[#allocation8 + $0xe8] sm:$0xff]  ;;  %v2180_v8 = vld [vmem:[#allocation8 + $0xd8] sm:$0xff]  ;;  %v5289_v10 = vpack.c.bf16 %v2173_v2, %v2169_v1  ;;  %v5353_v11 = vpack.c.bf16 %v2175_v5, %v2171_v3  ;;  %v2177_v13 = vld [vmem:[#allocation8 + $0xc0] sm:$0xff] }
 0x1e3   : > { %5276 = vmatprep.subr.bf16.mxu1 %v5275_v30  ;;  %v2184_v9 = vld [vmem:[#allocation8 + $0xf8] sm:$0xff]  ;;  %v5291_v12 = vpack.c.bf16 %v2182_v7, %v2178_v6  ;;  %v2181_v14 = vld [vmem:[#allocation8 + $0xe0] sm:$0xff]  ;;  %v2179_v15 = vld [vmem:[#allocation8 + $0xd0] sm:$0xff]  ;;  %v7599_v7 = vshrl.u32 %v919_v56, 7 }
 0x1e4   : > { %v5355_v16 = vpack.c.bf16 %v2184_v9, %v2180_v8  ;;  %v2183_v17 = vld [vmem:[#allocation8 + $0xf0] sm:$0xff]  ;;  %v2186_v18 = vld [vmem:[#allocation8 + $0x108] sm:$0xff]  ;;  %v2188_v20 = vld [vmem:[#allocation8 + $0x118] sm:$0xff]  ;;  %v5293_v22 = vpack.c.bf16 %v2181_v14, %v2177_v13 }
 0x1e5   : > { %5246 = vmatpush1.bf16.msra.mxu0 %v5245_v36  ;;  %v2190_v19 = vld [vmem:[#allocation8 + $0x128] sm:$0xff]  ;;  %v2192_v21 = vld [vmem:[#allocation8 + $0x138] sm:$0xff]  ;;  %v5357_v23 = vpack.c.bf16 %v2183_v17, %v2179_v15  ;;  %v2185_v25 = vld [vmem:[#allocation8 + $0x100] sm:$0xff]  ;;  %9817 = vst [vmem:[#allocation35_spill] sm:$0xff] %v7599_v7 }
 0x1e6   : > { %5278 = vmatpush1.bf16.msra.mxu1 %v5277_v37  ;;  %5280 = vmatprep.subr.bf16.mxu0 %v5279_v38  ;;  %v5295_v24 = vpack.c.bf16 %v2190_v19, %v2186_v18  ;;  %v2189_v26 = vld [vmem:[#allocation8 + $0x120] sm:$0xff]  ;;  %v2187_v27 = vld [vmem:[#allocation8 + $0x110] sm:$0xff]  ;;  %v5359_v28 = vpack.c.bf16 %v2192_v21, %v2188_v20  ;;  %v2194_v30 = vld [vmem:[#allocation8 + $0x148] sm:$0xff] }
 0x1e7   : > { %5344 = vmatprep.subr.bf16.mxu1 %v5343_v42  ;;  %v2191_v29 = vld [vmem:[#allocation8 + $0x130] sm:$0xff]  ;;  %v2198_v31 = vld [vmem:[#allocation8 + $0x168] sm:$0xff]  ;;  %v2196_v32 = vld [vmem:[#allocation8 + $0x158] sm:$0xff]  ;;  %v5297_v34 = vpack.c.bf16 %v2189_v26, %v2185_v25 }
 0x1e8   : > { %1912 = vmatmul.mubr.f32.vlgmr.msra.gmra.mrb[0].mxu0 %v897_v48  ;;  %v2200_v33 = vld [vmem:[#allocation8 + $0x178] sm:$0xff]  ;;  %v5361_v35 = vpack.c.bf16 %v2191_v29, %v2187_v27  ;;  %v5299_v36 = vpack.c.bf16 %v2198_v31, %v2194_v30  ;;  %v2193_v37 = vld [vmem:[#allocation8 + $0x140] sm:$0xff]  ;;  %v2195_v39 = vld [vmem:[#allocation8 + $0x150] sm:$0xff] }
 0x1e9   : > { %2001 = vmatmul.mubr.f32.vlgmr.msra.gmra.mrb[0].mxu1 %v897_v48  ;;  %5282 = vmatpush1.bf16.msra.mxu0 %v5281_v49  ;;  %v2197_v38 = vld [vmem:[#allocation8 + $0x160] sm:$0xff]  ;;  %v5363_v40 = vpack.c.bf16 %v2200_v33, %v2196_v32  ;;  %v2199_v41 = vld [vmem:[#allocation8 + $0x170] sm:$0xff]  ;;  %v2202_v42 = vld [vmem:[#allocation8 + $0x188] sm:$0xff] }
 0x1ea   : > { %5346 = vmatpush1.bf16.msra.mxu1 %v5345_v50  ;;  %5284 = vmatprep.subr.bf16.mxu0 %v5283_v51  ;;  %v2206_v43 = vld [vmem:[#allocation8 + $0x1a8] sm:$0xff]  ;;  %v2204_v44 = vld [vmem:[#allocation8 + $0x198] sm:$0xff]  ;;  %v5301_v46 = vpack.c.bf16 %v2197_v38, %v2193_v37  ;;  %v5365_v47 = vpack.c.bf16 %v2199_v41, %v2195_v39  ;;  %v2201_v49 = vld [vmem:[#allocation8 + $0x180] sm:$0xff] }
 0x1eb   : > { %5348 = vmatprep.subr.bf16.mxu1 %v5347_v55  ;;  %1917 = vmatprep.mubr.f32.mxu0 %v9658_v0  ;;  %v2208_v45 = vld [vmem:[#allocation8 + $0x1b8] sm:$0xff]  ;;  %v5303_v48 = vpack.c.bf16 %v2206_v43, %v2202_v42  ;;  %v2205_v50 = vld [vmem:[#allocation8 + $0x1a0] sm:$0xff]  ;;  %v2203_v51 = vld [vmem:[#allocation8 + $0x190] sm:$0xff] }
 0x1ec   : > { %2006 = vmatprep.mubr.f32.mxu1 %v9658_v0  ;;  %v5367_v52 = vpack.c.bf16 %v2208_v45, %v2204_v44  ;;  %v2207_v53 = vld [vmem:[#allocation8 + $0x1b0] sm:$0xff]  ;;  %v2210_v54 = vld [vmem:[#allocation8 + $0x1c8] sm:$0xff]  ;;  %v2212_v57 = vld [vmem:[#allocation8 + $0x1d8] sm:$0xff]  ;;  %v5305_v59 = vpack.c.bf16 %v2205_v50, %v2201_v49 }
 0x1ed   : > { %5286 = vmatpush1.bf16.msra.mxu0 %v5285_v61  ;;  %v2214_v55 = vld [vmem:[#allocation8 + $0x1e8] sm:$0xff]  ;;  %v2216_v58 = vld [vmem:[#allocation8 + $0x1f8] sm:$0xff]  ;;  %v5369_v61 = vpack.c.bf16 %v2207_v53, %v2203_v51  ;;  %v2213_v1 = vld [vmem:[#allocation8 + $0x1e0] sm:$0xff] }
 0x1ee   : > { %5350 = vmatpush1.bf16.msra.mxu1 %v5349_v62  ;;  %5288 = vmatprep.subr.bf16.mxu0 %v5287_v63  ;;  %v898_v60 = vld [vmem:[%s7363_s20 + $0x8] sm:$0xff]  ;;  %v5307_v62 = vpack.c.bf16 %v2214_v55, %v2210_v54  ;;  %v2209_v63 = vld [vmem:[#allocation8 + $0x1c0] sm:$0xff]  ;;  %v2211_v2 = vld [vmem:[#allocation8 + $0x1d0] sm:$0xff]  ;;  %v5371_v3 = vpack.c.bf16 %v2216_v58, %v2212_v57 }
 0x1ef   : > { %5352 = vmatprep.subr.bf16.mxu1 %v5351_v4  ;;  %v2215_v4 = vld [vmem:[#allocation8 + $0x1f0] sm:$0xff]  ;;  %v2218_v5 = vld [vmem:[#allocation8 + $0x208] sm:$0xff]  ;;  %1918 = vmatmul.mubr.f32.gmra.mrb[2].mxu0 %v898_v60  ;;  %v2220_v8 = vld [vmem:[#allocation8 + $0x218] sm:$0xff] }
 0x1f0   : > { %v2222_v6 = vld [vmem:[#allocation8 + $0x228] sm:$0xff]  ;;  %v2224_v9 = vld [vmem:[#allocation8 + $0x238] sm:$0xff]  ;;  %2007 = vmatmul.mubr.f32.gmra.mrb[2].mxu1 %v898_v60  ;;  %1923 = vmatprep.mubr.f32.mxu0 %v9658_v0  ;;  %v2221_v13 = vld [vmem:[#allocation8 + $0x220] sm:$0xff]  ;;  %v5373_v14 = vpack.c.bf16 %v2215_v4, %v2211_v2 }
 0x1f1   : > { %5290 = vmatpush1.bf16.msra.mxu0 %v5289_v10  ;;  %v899_v10 = vld [vmem:[%s7363_s20 + $0x10] sm:$0xff]  ;;  %2012 = vmatprep.mubr.f32.mxu1 %v9658_v0  ;;  %v5311_v15 = vpack.c.bf16 %v2222_v6, %v2218_v5  ;;  %v2226_v18 = vld [vmem:[#allocation8 + $0x248] sm:$0xff]  ;;  %v5375_v19 = vpack.c.bf16 %v2224_v9, %v2220_v8  ;;  %v2228_v21 = vld [vmem:[#allocation8 + $0x258] sm:$0xff] }
 0x1f2   : > { %5354 = vmatpush1.bf16.msra.mxu1 %v5353_v11  ;;  %5292 = vmatprep.subr.bf16.mxu0 %v5291_v12  ;;  %v5309_v11 = vpack.c.bf16 %v2213_v1, %v2209_v63  ;;  %v2217_v12 = vld [vmem:[#allocation8 + $0x200] sm:$0xff]  ;;  %v2223_v17 = vld [vmem:[#allocation8 + $0x230] sm:$0xff]  ;;  %v2230_v20 = vld [vmem:[#allocation8 + $0x268] sm:$0xff] }
 0x1f3   : > { %5356 = vmatprep.subr.bf16.mxu1 %v5355_v16  ;;  %v2219_v16 = vld [vmem:[#allocation8 + $0x210] sm:$0xff]  ;;  %1924 = vmatmul.mubr.f32.gmra.mrb[4].mxu0 %v899_v10  ;;  %v7610_v25 = vld [vmem:[#allocation8 + $0x240] sm:$0xff]  ;;  %v900_v27 = vld [vmem:[%s7363_s20 + $0x18] sm:$0xff] }
 0x1f4   : > { %v7612_v26 = vld [vmem:[#allocation8 + $0x260] sm:$0xff]  ;;  %2013 = vmatmul.mubr.f32.gmra.mrb[4].mxu1 %v899_v10  ;;  %1929 = vmatprep.mubr.f32.mxu0 %v9658_v0  ;;  %v7616_v29 = vld [vmem:[#allocation8 + $0x250] sm:$0xff]  ;;  %v7620_v31 = vld [vmem:[#allocation8 + $0x288] sm:$0xff]  ;;  %v5377_v33 = vpack.c.bf16 %v2223_v17, %v2219_v16 }
 0x1f5   : > { %5294 = vmatpush1.bf16.msra.mxu0 %v5293_v22  ;;  %v2232_v22 = vld [vmem:[#allocation8 + $0x278] sm:$0xff]  ;;  %v7618_v30 = vld [vmem:[#allocation8 + $0x270] sm:$0xff]  ;;  %v7622_v32 = vld [vmem:[#allocation8 + $0x2a8] sm:$0xff]  ;;  %2018 = vmatprep.mubr.f32.mxu1 %v9658_v0  ;;  %v5317_v54 = vpack.c.bf16 %v7612_v26, %v7610_v25 }
 0x1f6   : > { %5358 = vmatpush1.bf16.msra.mxu1 %v5357_v23  ;;  %5296 = vmatprep.subr.bf16.mxu0 %v5295_v24  ;;  %v7605_v23 = vsub.s32 0, %v7599_v7  ;;  %v7608_v24 = vsub.s32 1, %v7599_v7  ;;  %v910_v37 = vld [vmem:[%s7371_s18 + $0x8] sm:$0xff]  ;;  %v5379_v39 = vpack.c.bf16 %v2232_v22, %v2228_v21  ;;  %v7632_v41 = vld [vmem:[#allocation8 + $0x2a0] sm:$0xff]  ;;  %v7634_v42 = vld [vmem:[#allocation8 + $0x290] sm:$0xff]  ;;  %v5381_v60 = vpack.c.bf16 %v7618_v30, %v7616_v29 }
 0x1f7   : > { %5360 = vmatprep.subr.bf16.mxu1 %v5359_v28  ;;  %v5313_v28 = vpack.c.bf16 %v2221_v13, %v2217_v12  ;;  %v917_v38 = vld [vmem:[#allocation16] sm:$0x3]  ;;  %v7636_v43 = vld [vmem:[#allocation8 + $0x2b0] sm:$0xff]  ;;  %1930 = vmatmul.mubr.f32.gmra.mrb[6].mxu0 %v900_v27  ;;  %v7650_v49 = vld [vmem:[#allocation8 + $0x2f8] sm:$0xff] }
 0x1f8   : > { %9818 = vst [vmem:[#allocation36_spill] sm:$0xff] %v7605_v23  ;;  %9819 = vst [vmem:[#allocation37_spill] sm:$0xff] %v7608_v24  ;;  %v7638_v44 = vld [vmem:[#allocation8 + $0x2c8] sm:$0xff]  ;;  %v7652_v50 = vld [vmem:[#allocation8 + $0x2c0] sm:$0xff]  ;;  %2019 = vmatmul.mubr.f32.gmra.mrb[6].mxu1 %v900_v27  ;;  %v5385_v16 = vpack.c.bf16 %v7636_v43, %v7634_v42 }
 0x1f9   : > { %5298 = vmatpush1.bf16.msra.mxu0 %v5297_v34  ;;  %v5315_v34 = vpack.c.bf16 %v2230_v20, %v2226_v18  ;;  %v7640_v45 = vld [vmem:[#allocation8 + $0x2e8] sm:$0xff]  ;;  %v7654_v51 = vld [vmem:[#allocation8 + $0x2e0] sm:$0xff]  ;;  %v7661_v55 = vld [vmem:[#allocation8 + $0x2f0] sm:$0xff] }
 0x1fa   : > { %5362 = vmatpush1.bf16.msra.mxu1 %v5361_v35  ;;  %5300 = vmatprep.subr.bf16.mxu0 %v5299_v36  ;;  %v7625_v35 = vld [vmem:[#allocation8 + $0x298] sm:$0xff]  ;;  %v909_v53 = vld [vmem:[%s7371_s18] sm:$0xff]  ;;  %v7663_v56 = vld [vmem:[#allocation8 + $0x308] sm:$0xff]  ;;  %v5323_v17 = vpack.c.bf16 %v7640_v45, %v7638_v44  ;;  %v5325_v27 = vpack.c.bf16 %v7654_v51, %v7652_v50 }
 0x1fb   : > { %5364 = vmatprep.subr.bf16.mxu1 %v5363_v40  ;;  %v7627_v36 = vld [vmem:[#allocation8 + $0x2b8] sm:$0xff]  ;;  %v7630_v40 = vld [vmem:[#allocation8 + $0x280] sm:$0xff]  ;;  %v7665_v57 = vld [vmem:[#allocation8 + $0x328] sm:$0xff] }
 0x1fc   : > { %v7679_v63 = vld [vmem:[#allocation8 + $0x338] sm:$0xff]  ;;  %v7681_v1 = vld [vmem:[#allocation8 + $0x300] sm:$0xff]  ;;  %v7687_v4 = vld [vmem:[#allocation8 + $0x330] sm:$0xff]  ;;  %v5383_v5 = vpack.c.bf16 %v7627_v36, %v7625_v35 }
 0x1fd   : > { %5302 = vmatpush1.bf16.msra.mxu0 %v5301_v46  ;;  %v7643_v46 = vrot.slane %v917_v38, %v7605_v23  ;;  %v7683_v2 = vld [vmem:[#allocation8 + $0x320] sm:$0xff]  ;;  %v7691_v6 = vld [vmem:[#allocation8 + $0x348] sm:$0xff]  ;;  %v7695_v9 = vld [vmem:[#allocation8 + $0x358] sm:$0xff] }
 0x1fe   : > { %5366 = vmatpush1.bf16.msra.mxu1 %v5365_v47  ;;  %5304 = vmatprep.subr.bf16.mxu0 %v5303_v48  ;;  %v7646_v47 = vrot.slane %v917_v38, %v7608_v24  ;;  %v7648_v48 = vld [vmem:[#allocation8 + $0x2d8] sm:$0xff]  ;;  %v7693_v8 = vld [vmem:[#allocation8 + $0x368] sm:$0xff]  ;;  %v7701_v12 = vld [vmem:[#allocation8 + $0x360] sm:$0xff] }
 0x1ff   : > { %5368 = vmatprep.subr.bf16.mxu1 %v5367_v52  ;;  %9820 = vst [vmem:[#allocation38_spill] sm:$0xff] %v7643_v46  ;;  %v7656_v52 = vld [vmem:[#allocation8 + $0x2d0] sm:$0xff]  ;;  %v7697_v10 = vld [vmem:[#allocation8 + $0x378] sm:$0xff]  ;;  %v7715_v20 = vld [vmem:[#allocation8 + $0x388] sm:$0xff]  ;;  %v5387_v26 = vpack.c.bf16 %v7650_v49, %v7648_v48  ;;  %v5331_v45 = vpack.c.bf16 %v7693_v8, %v7691_v6 }
 0x200   : > { %9821 = vst [vmem:[#allocation39_spill] sm:$0xff] %v7646_v47  ;;  %v7668_v58 = vmul.f32 %v7646_v47, %v910_v37  ;;  %v7711_v18 = vld [vmem:[#allocation8 + $0x350] sm:$0xff]  ;;  %v7717_v21 = vld [vmem:[#allocation8 + $0x3a8] sm:$0xff]  ;;  %v7719_v22 = vld [vmem:[#allocation8 + $0x398] sm:$0xff] }
 0x201   : > { %5306 = vmatpush1.bf16.msra.mxu0 %v5305_v59  ;;  %v7671_v59 = vmul.f32 %v7643_v46, %v909_v53  ;;  %v7728_v29 = vld [vmem:[#allocation8 + $0x3b8] sm:$0xff]  ;;  %v7730_v30 = vld [vmem:[#allocation8 + $0x380] sm:$0xff]  ;;  %v7749_v42 = vld [vmem:[#allocation8 + $0x3c8] sm:$0xff] }
 0x202   : > { %5370 = vmatpush1.bf16.msra.mxu1 %v5369_v61  ;;  %5308 = vmatprep.subr.bf16.mxu0 %v5307_v62  ;;  %v5319_v61 = vpack.c.bf16 %v7622_v32, %v7620_v31  ;;  %v7677_v62 = vld [vmem:[#allocation8 + $0x318] sm:$0xff]  ;;  %v9661_v13 = vand.u32 2147483647, %v7668_v58  ;;  %v7732_v31 = vld [vmem:[#allocation8 + $0x3a0] sm:$0xff]  ;;  %v7751_v43 = vld [vmem:[#allocation8 + $0x3e8] sm:$0xff]  ;;  %vm1042_vm12 = vcmp.lt.s32.totalorder %v7668_v58, 0 }
 0x203   : > { %5372 = vmatprep.subr.bf16.mxu1 %v5371_v3  ;;  %v7685_v3 = vld [vmem:[#allocation8 + $0x310] sm:$0xff]  ;;  %v940_v25 = vand.u32 2139095040, %v7671_v59  ;;  %v9660_v36 = vand.u32 2147483647, %v7671_v59  ;;  %v5391_v38 = vpack.c.bf16 %v7679_v63, %v7677_v62  ;;  %v7759_v50 = vld [vmem:[#allocation8 + $0x3d8] sm:$0xff]  ;;  %v8094_v23 = vld [vmem:[#allocation7 + $0x1a8] sm:$0xff] }
 0x204   : > { %v1047_v35 = vand.u32 8388607, %v9661_v13  ;;  %v7761_v51 = vld [vmem:[#allocation8 + $0x3f8] sm:$0xff]  ;;  %9861 = vst [vmem:[#allocation62_spill] sm:$0xff] %v8094_v23  ;;  %v8115_v24 = vld [vmem:[#allocation7 + $0x1a0] sm:$0xff]  ;;  %vm939_vm15 = vcmp.lt.s32.totalorder %v7671_v59, 0 }
 0x205   : > { %5310 = vmatpush1.bf16.msra.mxu0 %v5309_v11  ;;  %v7699_v11 = vld [vmem:[#allocation8 + $0x340] sm:$0xff]  ;;  %v941_v37 = vshrl.u32 %v940_v25, 23  ;;  %v7785_v25 = vand.u32 8388607, %v9660_v36  ;;  %9865 = vst [vmem:[#allocation66_spill] sm:$0xff] %v8115_v24 }
 0x206   : > { %5374 = vmatpush1.bf16.msra.mxu1 %v5373_v14  ;;  %5312 = vmatprep.subr.bf16.mxu0 %v5311_v15  ;;  %v1043_v14 = vand.u32 2139095040, %v7668_v58  ;;  %v5321_v15 = vpack.c.bf16 %v7632_v41, %v7630_v40  ;;  %v5393_v40 = vpack.c.bf16 %v7687_v4, %v7685_v3  ;;  %v7747_v41 = vld [vmem:[#allocation8 + $0x3b0] sm:$0xff]  ;;  %v8224_v23 = vld [vmem:[#allocation7 + $0x240] sm:$0xff] }
 0x207   : > { %5376 = vmatprep.subr.bf16.mxu1 %v5375_v19  ;;  %v7713_v19 = vld [vmem:[#allocation8 + $0x370] sm:$0xff]  ;;  %v4786_v53 = vadd.s32 4294967169, %v941_v37  ;;  %9891 = vst [vmem:[#allocation89_spill] sm:$0xff] %v8224_v23 }
 0x208   : > { %v1044_v32 = vshrl.u32 %v1043_v14, 23  ;;  %v7779_v14 = vld [vmem:[#allocation7 + $0x8] sm:$0xff] }
 0x209   : > { %5314 = vmatpush1.bf16.msra.mxu0 %v5313_v28  ;;  %v5389_v28 = vpack.c.bf16 %v7661_v55, %v7656_v52  ;;  %v7763_v52 = vld [vmem:[#allocation8 + $0x3c0] sm:$0xff]  ;;  %v9664_v55 = vmov 920167782  }
 0x20a   : > { %5378 = vmatpush1.bf16.msra.mxu1 %v5377_v33  ;;  %5316 = vmatprep.subr.bf16.mxu0 %v5315_v34  ;;  %v5327_v33 = vpack.c.bf16 %v7665_v57, %v7663_v56  ;;  %v7736_v34 = vld [vmem:[#allocation8 + $0x390] sm:$0xff]  ;;  %v4790_v44 = vadd.s32 4294967169, %v1044_v32  ;;  %v7771_v57 = vld [vmem:[#allocation8 + $0x3e0] sm:$0xff]  ;;  %v947_v32 = vadd.s32 1, %v4786_v53  ;;  %v9670_v56 = vmov 2475754826  }
 0x20b   : > { %5380 = vmatprep.subr.bf16.mxu1 %v5379_v39  ;;  %v5329_v39 = vpack.c.bf16 %v7683_v2, %v7681_v1  ;;  %v9662_v1 = vmov 1326507024  }
 0x20c   : > { %v1050_v62 = vadd.s32 1, %v4790_v44  ;;  %v7795_v44 = vld [vmem:[#allocation7 + $0x38] sm:$0xff]  ;;  %vm948_vm1 = vcmp.gt.s32.totalorder %v947_v32, 0 }
 0x20d   : > { %5318 = vmatpush1.bf16.msra.mxu0 %v5317_v54 }
 0x20e   : > { %5382 = vmatpush1.bf16.msra.mxu1 %v5381_v60  ;;  %5320 = vmatprep.subr.bf16.mxu0 %v5319_v61  ;;  %v7773_v60 = vld [vmem:[#allocation8 + $0x3d0] sm:$0xff]  ;;  %vm1051_vm0 = vcmp.gt.s32.totalorder %v1050_v62, 0 }
 0x20f   : > { %5384 = vmatprep.subr.bf16.mxu1 %v5383_v5  ;;  %v7775_v61 = vld [vmem:[#allocation8 + $0x3f0] sm:$0xff]  ;;  %v1048_v5 = vor.u32 8388608, %v1047_v35  ;;  %v7793_v35 = vld [vmem:[#allocation7 + $0x18] sm:$0xff]  ;;  %v1052_v53 = vsel %vm1051_vm0, %v1050_v62, 0  ;;  %v9672_v62 = vmov 683565275  }
 0x210   : > { %v7801_v36 = vshrl.u32 %v1052_v53, 5  ;;  %v1054_v13 = vand.u32 31, %v1052_v53 }
 0x211   : > { %5322 = vmatpush1.bf16.msra.mxu0 %v5321_v15  ;;  %v7781_v15 = vld [vmem:[#allocation7 + $0x28] sm:$0xff]  ;;  %v7805_v37 = vshll.u32 %v1048_v5, 8 }
 0x212   : > { %5386 = vmatpush1.bf16.msra.mxu1 %v5385_v16  ;;  %5324 = vmatprep.subr.bf16.mxu0 %v5323_v17  ;;  %v949_v16 = vsel %vm948_vm1, %v947_v32, 0  ;;  %v1057_v53 = vshll.u32 %v9672_v62, %v1054_v13  ;;  %v1060_v17 = vshll.u32 %v9670_v56, %v1054_v13  ;;  %v9668_v32 = vmov 2131351028  }
 0x213   : > { %5388 = vmatprep.subr.bf16.mxu1 %v5387_v26  ;;  %v7810_v26 = vand.u32 31, %v949_v16  ;;  %v1069_v0 = vshll.u32 %v9664_v55, %v1054_v13  ;;  %vm1072_vm2 = vcmp.lt.s32.totalorder %v7801_v36, 1  ;;  %v7818_v63 = vshrl.u32 %v949_v16, 5 }
 0x214   : > { %vm1073_vm3 = vcmp.lt.s32.totalorder %v7801_v36, 2  ;;  %vm1075_vm4 = vcmp.lt.s32.totalorder %v7801_v36, 4  ;;  %vm1074_vm5 = vcmp.lt.s32.totalorder %v7801_v36, 3  ;;  %v9829_v36 = vpack.c.bf16 %v7751_v43, %v7749_v42 }
 0x215   : > { %5326 = vmatpush1.bf16.msra.mxu0 %v5325_v27  ;;  %v1055_v27 = vsub.s32 32, %v1054_v13  ;;  %v966_v43 = vshll.u32 %v9664_v55, %v7810_v26  ;;  %vm969_vm6 = vcmp.lt.s32.totalorder %v7818_v63, 1  ;;  %vm970_vm7 = vcmp.lt.s32.totalorder %v7818_v63, 2 }
 0x216   : > { %5390 = vmatpush1.bf16.msra.mxu1 %v5389_v28  ;;  %5328 = vmatprep.subr.bf16.mxu0 %v5327_v33  ;;  %v1063_v28 = vshll.u32 %v9668_v32, %v1054_v13  ;;  %v9666_v33 = vmov 2102212464   ;;  %vm972_vm9 = vcmp.lt.s32.totalorder %v7818_v63, 4  ;;  %vm971_vm10 = vcmp.lt.s32.totalorder %v7818_v63, 3  ;;  %v7967_v63 = vld [vmem:[#allocation7 + $0x68] sm:$0xff] }
 0x217   : > { %5392 = vmatprep.subr.bf16.mxu1 %v5391_v38  ;;  %v1066_v5 = vshll.u32 %v9666_v33, %v1054_v13  ;;  %v1056_v38 = vshrl.u32 %v9672_v62, %v1055_v27  ;;  %v1058_v54 = vshrl.u32 %v9670_v56, %v1055_v27  ;;  %v1061_v49 = vshrl.u32 %v9668_v32, %v1055_v27 }
 0x218   : > { %v1064_v48 = vshrl.u32 %v9666_v33, %v1055_v27  ;;  %v1067_v13 = vshrl.u32 %v9664_v55, %v1055_v27  ;;  %v1070_v2 = vshrl.u32 %v9662_v1, %v1055_v27  ;;  %v9823_v27 = vpack.c.bf16 %v7701_v12, %v7699_v11 }
 0x219   : > { %5330 = vmatpush1.bf16.msra.mxu0 %v5329_v39  ;;  %v9822_v39 = vpack.c.bf16 %v7697_v10, %v7695_v9  ;;  %v1059_v16 = vor.u32 %v1058_v54, %v1057_v53  ;;  %v1062_v3 = vor.u32 %v1061_v49, %v1060_v17  ;;  %v9824_v49 = vpack.c.bf16 %v7713_v19, %v7711_v18 }
 0x21a   : > { %5394 = vmatpush1.bf16.msra.mxu1 %v5393_v40  ;;  %5332 = vmatprep.subr.bf16.mxu0 %v5331_v45  ;;  %v1065_v4 = vor.u32 %v1064_v48, %v1063_v28  ;;  %v952_v40 = vsub.s32 32, %v7810_v26  ;;  %v1068_v6 = vor.u32 %v1067_v13, %v1066_v5  ;;  %v1071_v8 = vor.u32 %v1070_v2, %v1069_v0 }
 0x21b   : > { %5396 = vmatprep.subr.bf16.mxu1 %v9822_v39  ;;  %v954_v45 = vshll.u32 %v9672_v62, %v7810_v26  ;;  %v1076_v9 = vsel %vm1072_vm2, %v1056_v38, %v1059_v16  ;;  %v1080_v48 = vsel %vm1072_vm2, %v1059_v16, %v1062_v3  ;;  %v9825_v11 = vpack.c.bf16 %v7717_v21, %v7715_v20 }
 0x21c   : > { %v1077_v10 = vsel %vm1075_vm4, %v1065_v4, 2102212464  ;;  %v1084_v0 = vsel %vm1072_vm2, %v1062_v3, %v1065_v4  ;;  %v1081_v54 = vsel %vm1075_vm4, %v1068_v6, 920167782  ;;  %v1085_v17 = vsel %vm1075_vm4, %v1071_v8, 1326507024 }
 0x21d   : > { %5334 = vmatpush1.bf16.msra.mxu0 %v9823_v27  ;;  %v1078_v12 = vsel %vm1074_vm5, %v1062_v3, %v1077_v10  ;;  %v957_v53 = vshll.u32 %v9670_v56, %v7810_v26  ;;  %v9826_v28 = vpack.c.bf16 %v7728_v29, %v7719_v22  ;;  %v1082_v18 = vsel %vm1074_vm5, %v1065_v4, %v1081_v54 }
 0x21e   : > { %5398 = vmatpush1.bf16.msra.mxu1 %v9824_v49  ;;  %5336 = vmatprep.subr.bf16.mxu0 %v9825_v11  ;;  %v1086_v19 = vsel %vm1074_vm5, %v1068_v6, %v1085_v17  ;;  %v953_v5 = vshrl.u32 %v9672_v62, %v952_v40  ;;  %v955_v20 = vshrl.u32 %v9670_v56, %v952_v40  ;;  %v9830_v8 = vor.u32 8388608, %v7785_v25  ;;  %v8081_v56 = vld [vmem:[#allocation7 + $0x150] sm:$0xff] }
 0x21f   : > { %5400 = vmatprep.subr.bf16.mxu1 %v9826_v28  ;;  %v1079_v21 = vsel %vm1073_vm3, %v1076_v9, %v1078_v12  ;;  %v1083_v38 = vsel %vm1073_vm3, %v1080_v48, %v1082_v18  ;;  %v1087_v13 = vsel %vm1073_vm3, %v1084_v0, %v1086_v19  ;;  %v958_v2 = vshrl.u32 %v9668_v32, %v952_v40  ;;  %v7948_v18 = vld [vmem:[#allocation7] sm:$0xff] }
 0x220   : > { %v9827_v22 = vpack.c.bf16 %v7732_v31, %v7730_v30  ;;  %v7883_v29 = vmul.u32.u64.low %v7805_v37, %v1087_v13  ;;  %v7884_v39 = vmul.u32.u64.high %v7805_v37, %v1087_v13, %v7883_v29  ;;  %v9828_v4 = vpack.c.bf16 %v7747_v41, %v7736_v34  ;;  %v7950_v19 = vld [vmem:[#allocation7 + $0x20] sm:$0xff]  ;;  %9858 = vst [vmem:[#allocation59_spill] sm:$0xff] %v8081_v56 }
 0x221   : > { %v7887_v16 = vmul.u32.u64.low %v7805_v37, %v1083_v38  ;;  %v7888_v3 = vmul.u32.u64.high %v7805_v37, %v1083_v38, %v7887_v16  ;;  %v956_v6 = vor.u32 %v955_v20, %v954_v45  ;;  %v959_v30 = vor.u32 %v958_v2, %v957_v53  ;;  %v7954_v20 = vld [vmem:[#allocation7 + $0x30] sm:$0xff]  ;;  %v7969_v29 = vld [vmem:[#allocation7 + $0x58] sm:$0xff] }
 0x222   : > { %5338 = vmatpush1.bf16.msra.mxu0 %v9827_v22  ;;  %5402 = vmatpush1.bf16.msra.mxu1 %v9828_v4  ;;  %v960_v31 = vshll.u32 %v9668_v32, %v7810_v26  ;;  %v7901_v27 = vshll.u32 %v9830_v8, 8  ;;  %v9831_v9 = vpack.c.bf16 %v7761_v51, %v7759_v50  ;;  %v961_v34 = vshrl.u32 %v9666_v33, %v952_v40  ;;  %v7965_v22 = vld [vmem:[#allocation7 + $0x48] sm:$0xff]  ;;  %v8079_v32 = vld [vmem:[#allocation7 + $0x160] sm:$0xff] }
 0x223   : > { %5340 = vmatprep.subr.bf16.mxu0 %v9829_v36  ;;  %v963_v41 = vshll.u32 %v9666_v33, %v7810_v26  ;;  %v964_v42 = vshrl.u32 %v9664_v55, %v952_v40  ;;  %v1095_v45 = vmul.u32 %v7805_v37, %v1079_v21  ;;  %v967_v25 = vshrl.u32 %v9662_v1, %v952_v40  ;;  %v7975_v36 = vld [vmem:[#allocation7 + $0x40] sm:$0xff]  ;;  %v7983_v8 = vld [vmem:[#allocation7 + $0x88] sm:$0xff]  ;;  %v8068_v55 = vld [vmem:[#allocation7 + $0x158] sm:$0xff] }
 0x224   : > { %5404 = vmatprep.subr.bf16.mxu1 %v9831_v9  ;;  %v9832_v50 = vpack.c.bf16 %v7771_v57, %v7763_v52  ;;  %vm1097_vm8 = vc.u32 %v7884_v39, %v7887_v16  ;;  %v1098_v51 = vadd.s32 1, %v7888_v3  ;;  %v962_v10 = vor.u32 %v961_v34, %v960_v31  ;;  %v7981_v31 = vld [vmem:[#allocation7 + $0x70] sm:$0xff]  ;;  %v7985_v9 = vld [vmem:[#allocation7 + $0xa8] sm:$0xff]  ;;  %v7987_v34 = vld [vmem:[#allocation7 + $0x98] sm:$0xff]  ;;  %9854 = vst [vmem:[#allocation55_spill] sm:$0xff] %v8068_v55 }
 0x225   : > { %v9833_v37 = vpack.c.bf16 %v7775_v61, %v7773_v60  ;;  %v9834_v26 = vpack.c.bf16 %v7781_v15, %v7779_v14  ;;  %v965_v40 = vor.u32 %v964_v42, %v963_v41  ;;  %v968_v48 = vor.u32 %v967_v25, %v966_v43  ;;  %v7989_v41 = vld [vmem:[#allocation7 + $0xb8] sm:$0xff]  ;;  %v7991_v42 = vld [vmem:[#allocation7 + $0x80] sm:$0xff]  ;;  %v8066_v1 = vld [vmem:[#allocation7 + $0x168] sm:$0xff]  ;;  %9857 = vst [vmem:[#allocation58_spill] sm:$0xff] %v8079_v32 }
 0x226   : > { %5342 = vmatpush1.bf16.msra.mxu0 %v9832_v50  ;;  %v973_v52 = vsel %vm969_vm6, %v953_v5, %v956_v6  ;;  %v1099_v57 = vsel %vm1097_vm8, %v1098_v51, %v7888_v3  ;;  %v9835_v0 = vpack.c.bf16 %v7795_v44, %v7793_v35  ;;  %v974_v49 = vsel %vm972_vm9, %v962_v10, 2102212464  ;;  %v7952_v5 = vld [vmem:[#allocation7 + $0x10] sm:$0xff]  ;;  %v7971_v3 = vld [vmem:[#allocation7 + $0x78] sm:$0xff]  ;;  %9836 = vst [vmem:[#allocation40_spill] sm:$0xff] %v7991_v42  ;;  %v7993_v43 = vld [vmem:[#allocation7 + $0xa0] sm:$0xff] }
 0x227   : > { %5406 = vmatpush1.bf16.msra.mxu1 %v9833_v37  ;;  %5408 = vmatprep.subr.bf16.mxu0 %v9834_v26  ;;  %v977_v60 = vsel %vm969_vm6, %v956_v6, %v959_v30  ;;  %v981_v61 = vsel %vm969_vm6, %v959_v30, %v962_v10  ;;  %v1100_v14 = vadd.s32 %v1099_v57, %v1095_v45  ;;  %v978_v11 = vsel %vm972_vm9, %v965_v40, 920167782  ;;  %v7977_v6 = vld [vmem:[#allocation7 + $0x60] sm:$0xff]  ;;  %v7998_v50 = vld [vmem:[#allocation7 + $0x90] sm:$0xff]  ;;  %v8004_v37 = vld [vmem:[#allocation7 + $0xe8] sm:$0xff] }
 0x228   : > { %5472 = vmatprep.subr.bf16.mxu1 %v9835_v0  ;;  %v975_v15 = vsel %vm971_vm10, %v959_v30, %v974_v49  ;;  %v982_v12 = vsel %vm972_vm9, %v968_v48, 1326507024  ;;  %v979_v54 = vsel %vm971_vm10, %v962_v10, %v978_v11  ;;  %v7979_v30 = vld [vmem:[#allocation7 + $0x50] sm:$0xff]  ;;  %v8002_v10 = vld [vmem:[#allocation7 + $0xc8] sm:$0xff]  ;;  %9838 = vst [vmem:[#allocation42_spill] sm:$0xff] %v8004_v37  ;;  %v8006_v26 = vld [vmem:[#allocation7 + $0xd8] sm:$0xff]  ;;  %vm1132_vm9 = vweird.f32 %v7668_v58 }
 0x229   : > { %v983_v17 = vsel %vm971_vm10, %v965_v40, %v982_v12  ;;  %v1101_v53 = vadd.s32 536870912, %v1100_v14  ;;  %v7942_v28 = vsel %vm970_vm7, %v973_v52, %v975_v15  ;;  %v980_v35 = vsel %vm970_vm7, %v977_v60, %v979_v54  ;;  %v8000_v51 = vld [vmem:[#allocation7 + $0xb0] sm:$0xff]  ;;  %9837 = vst [vmem:[#allocation41_spill] sm:$0xff] %v8002_v10  ;;  %9839 = vst [vmem:[#allocation43_spill] sm:$0xff] %v8006_v26  ;;  %v8008_v40 = vld [vmem:[#allocation7 + $0xf8] sm:$0xff] }
 0x22a   : > { %v984_v44 = vsel %vm970_vm7, %v981_v61, %v983_v17  ;;  %v7961_v13 = vmul.u32.u64.low %v7901_v27, %v980_v35  ;;  %v7962_v2 = vmul.u32.u64.high %v7901_v27, %v980_v35, %v7961_v13  ;;  %v992_v25 = vmul.u32 %v7901_v27, %v7942_v28  ;;  %9840 = vst [vmem:[#allocation44_spill] sm:$0xff] %v8008_v40  ;;  %v8017_v57 = vld [vmem:[#allocation7 + $0xc0] sm:$0xff]  ;;  %v8021_v49 = vld [vmem:[#allocation7 + $0xd0] sm:$0xff]  ;;  %v8025_v61 = vld [vmem:[#allocation7 + $0x108] sm:$0xff] }
 0x22b   : > { %v7957_v21 = vmul.u32.u64.low %v7901_v27, %v984_v44  ;;  %v7958_v38 = vmul.u32.u64.high %v7901_v27, %v984_v44, %v7957_v21  ;;  %v7973_v4 = vshrl.u32 %v1101_v53, 30  ;;  %v8019_v0 = vld [vmem:[#allocation7 + $0xe0] sm:$0xff]  ;;  %9841 = vst [vmem:[#allocation45_spill] sm:$0xff] %v8021_v49  ;;  %v8023_v60 = vld [vmem:[#allocation7 + $0xf0] sm:$0xff]  ;;  %9842 = vst [vmem:[#allocation46_spill] sm:$0xff] %v8025_v61  ;;  %v1096_v40 = vadd.s32 %v7887_v16, %v7884_v39 }
 0x22c   : > { %v995_v48 = vadd.s32 1, %v7962_v2  ;;  %v8027_v15 = vld [vmem:[#allocation7 + $0x128] sm:$0xff]  ;;  %v8036_v17 = vld [vmem:[#allocation7 + $0x118] sm:$0xff]  ;;  %v8040_v28 = vld [vmem:[#allocation7 + $0x100] sm:$0xff]  ;;  %v9847_v44 = vand.u32 2147483647, %v7668_v58 }
 0x22d   : > { %v1103_v45 = vshll.u32 %v7973_v4, 30  ;;  %vm994_vm11 = vc.u32 %v7958_v38, %v7961_v13  ;;  %9843 = vst [vmem:[#allocation47_spill] sm:$0xff] %v8027_v15  ;;  %9844 = vst [vmem:[#allocation48_spill] sm:$0xff] %v8036_v17  ;;  %v8038_v53 = vld [vmem:[#allocation7 + $0x138] sm:$0xff]  ;;  %v8042_v35 = vld [vmem:[#allocation7 + $0x120] sm:$0xff]  ;;  %v1126_v62 = vsub.s32 4, %v7973_v4  ;;  %v8161_v56 = vadd.s32 %v7961_v13, %v7958_v38 }
 0x22e   : > { %9845 = vst [vmem:[#allocation49_spill] sm:$0xff] %v8040_v28  ;;  %9846 = vst [vmem:[#allocation50_spill] sm:$0xff] %v8042_v35  ;;  %vm8046_vm13 = vcmp.le.f32.partialorder %v9847_v44, 0.7853982  ;;  %v8060_v52 = vld [vmem:[#allocation7 + $0x110] sm:$0xff]  ;;  %v8064_v27 = vld [vmem:[#allocation7 + $0x148] sm:$0xff] }
 0x22f   : > { %v8030_v11 = vsub.s32 %v1100_v14, %v1103_v45  ;;  %v996_v14 = vsel %vm994_vm11, %v995_v48, %v7962_v2  ;;  %9850 = vst [vmem:[#allocation51_spill] sm:$0xff] %v8060_v52  ;;  %v8062_v44 = vld [vmem:[#allocation7 + $0x130] sm:$0xff]  ;;  %9852 = vst [vmem:[#allocation53_spill] sm:$0xff] %v8064_v27  ;;  %v8070_v2 = vld [vmem:[#allocation7 + $0x178] sm:$0xff]  ;;  %v1127_v35 = vsel %vm1042_vm12, %v1126_v62, %v7973_v4  ;;  %v9909_v52 = vmov 1326507024  }
 0x230   : > { %9851 = vst [vmem:[#allocation52_spill] sm:$0xff] %v8062_v44  ;;  %9853 = vst [vmem:[#allocation54_spill] sm:$0xff] %v8066_v1  ;;  %v997_v45 = vadd.s32 %v996_v14, %v992_v25  ;;  %v8077_v33 = vld [vmem:[#allocation7 + $0x140] sm:$0xff]  ;;  %v8090_v54 = vld [vmem:[#allocation7 + $0x170] sm:$0xff]  ;;  %v1129_v4 = vsel %vm8046_vm13, 0, %v1127_v35 }
 0x231   : > { %9855 = vst [vmem:[#allocation56_spill] sm:$0xff] %v8070_v2  ;;  %v1106_v48 = vsub.s32 0, %v8030_v11  ;;  %9856 = vst [vmem:[#allocation57_spill] sm:$0xff] %v8077_v33  ;;  %v8092_v12 = vld [vmem:[#allocation7 + $0x188] sm:$0xff]  ;;  %v8103_v10 = vld [vmem:[#allocation7 + $0x198] sm:$0xff] }
 0x232   : > { %9859 = vst [vmem:[#allocation60_spill] sm:$0xff] %v8090_v54  ;;  %9860 = vst [vmem:[#allocation61_spill] sm:$0xff] %v8092_v12  ;;  %v8105_v14 = vld [vmem:[#allocation7 + $0x1b8] sm:$0xff]  ;;  %v8107_v26 = vld [vmem:[#allocation7 + $0x180] sm:$0xff]  ;;  %v998_v37 = vadd.s32 536870912, %v997_v45 }
 0x233   : > { %v4791_v7 = vmin.u32 %v1106_v48, %v8030_v11  ;;  %9862 = vst [vmem:[#allocation63_spill] sm:$0xff] %v8103_v10  ;;  %9863 = vst [vmem:[#allocation64_spill] sm:$0xff] %v8105_v14  ;;  %v8117_v25 = vld [vmem:[#allocation7 + $0x190] sm:$0xff]  ;;  %v8127_v48 = vld [vmem:[#allocation7 + $0x1c8] sm:$0xff]  ;;  %v9884_v35 = vand.u32 2147483647, %v7671_v59 }
 0x234   : > { %9864 = vst [vmem:[#allocation65_spill] sm:$0xff] %v8107_v26  ;;  %9866 = vst [vmem:[#allocation67_spill] sm:$0xff] %v8117_v25  ;;  %v8119_v61 = vld [vmem:[#allocation7 + $0x1b0] sm:$0xff]  ;;  %v8129_v42 = vld [vmem:[#allocation7 + $0x1e8] sm:$0xff] }
 0x235   : > { %9867 = vst [vmem:[#allocation68_spill] sm:$0xff] %v8119_v61  ;;  %v1108_v15 = vclz %v4791_v7  ;;  %9868 = vst [vmem:[#allocation69_spill] sm:$0xff] %v8127_v48  ;;  %v8131_v28 = vld [vmem:[#allocation7 + $0x1d8] sm:$0xff]  ;;  %v8136_v7 = vshrl.u32 %v998_v37, 30  ;;  %v8144_v16 = vld [vmem:[#allocation7 + $0x1c0] sm:$0xff] }
 0x236   : > { %9869 = vst [vmem:[#allocation70_spill] sm:$0xff] %v8129_v42  ;;  %9870 = vst [vmem:[#allocation71_spill] sm:$0xff] %v8131_v28  ;;  %v8142_v27 = vld [vmem:[#allocation7 + $0x1f8] sm:$0xff]  ;;  %v8153_v37 = vld [vmem:[#allocation7 + $0x1e0] sm:$0xff]  ;;  %vm8205_vm0 = vcmp.le.f32.partialorder %v9884_v35, 0.7853982 }
 0x237   : > { %9871 = vst [vmem:[#allocation72_spill] sm:$0xff] %v8142_v27  ;;  %9872 = vst [vmem:[#allocation73_spill] sm:$0xff] %v8144_v16  ;;  %v912_v55 = vld [vmem:[%s7371_s18 + $0x18] sm:$0xff]  ;;  %v4792_v2 = vadd.s32 4294967294, %v1108_v15  ;;  %v8155_v49 = vld [vmem:[#allocation7 + $0x1d0] sm:$0xff]  ;;  %v1000_v15 = vshll.u32 %v8136_v7, 30 }
 0x238   : > { %9873 = vst [vmem:[#allocation74_spill] sm:$0xff] %v8153_v37  ;;  %9874 = vst [vmem:[#allocation75_spill] sm:$0xff] %v8155_v49  ;;  %v8157_v39 = vld [vmem:[#allocation7 + $0x1f0] sm:$0xff]  ;;  %v8168_v10 = vld [vmem:[#allocation7 + $0x208] sm:$0xff]  ;;  %v8182_v62 = vmul.f32 %v7646_v47, %v912_v55 }
 0x239   : > { %9875 = vst [vmem:[#allocation76_spill] sm:$0xff] %v8157_v39  ;;  %9876 = vst [vmem:[#allocation77_spill] sm:$0xff] %v8168_v10  ;;  %vm4793_vm14 = vcmp.lt.s32.totalorder %v4792_v2, 0  ;;  %v8175_v13 = vld [vmem:[#allocation7 + $0x228] sm:$0xff]  ;;  %v8177_v26 = vld [vmem:[#allocation7 + $0x218] sm:$0xff]  ;;  %v8184_v42 = vsub.s32 %v997_v45, %v1000_v15  ;;  %v8201_v15 = vand.u32 3, %v1129_v4 }
 0x23a   : > { %9877 = vst [vmem:[#allocation78_spill] sm:$0xff] %v8175_v13  ;;  %9878 = vst [vmem:[#allocation79_spill] sm:$0xff] %v8177_v26  ;;  %v8179_v1 = vld [vmem:[#allocation7 + $0x238] sm:$0xff]  ;;  %v1111_v48 = vsel %vm4793_vm14, 0, %v4792_v2  ;;  %v8190_v38 = vld [vmem:[#allocation7 + $0x200] sm:$0xff]  ;;  %v1249_v39 = vand.u32 2139095040, %v8182_v62 }
 0x23b   : > { %9879 = vst [vmem:[#allocation80_spill] sm:$0xff] %v8179_v1  ;;  %9880 = vst [vmem:[#allocation81_spill] sm:$0xff] %v8190_v38  ;;  %v8192_v28 = vld [vmem:[#allocation7 + $0x220] sm:$0xff]  ;;  %v8194_v27 = vld [vmem:[#allocation7 + $0x210] sm:$0xff]  ;;  %v1112_v61 = vsub.s32 32, %v1111_v48  ;;  %v1113_v24 = vshll.u32 %v8030_v11, %v1111_v48  ;;  %v1116_v55 = vsub.s32 4294967266, %v1111_v48 }
 0x23c   : > { %9881 = vst [vmem:[#allocation82_spill] sm:$0xff] %v8192_v28  ;;  %9882 = vst [vmem:[#allocation83_spill] sm:$0xff] %v8194_v27  ;;  %v8197_v14 = vld [vmem:[#allocation7 + $0x230] sm:$0xff]  ;;  %v1003_v49 = vsub.s32 0, %v8184_v42  ;;  %v8214_v48 = vld [vmem:[#allocation7 + $0x248] sm:$0xff]  ;;  %v1023_v26 = vsub.s32 4, %v8136_v7 }
 0x23d   : > { %9883 = vst [vmem:[#allocation84_spill] sm:$0xff] %v8197_v14  ;;  %v911_v2 = vld [vmem:[%s7371_s18 + $0x10] sm:$0xff]  ;;  %9887 = vst [vmem:[#allocation85_spill] sm:$0xff] %v8214_v48  ;;  %v8216_v45 = vld [vmem:[#allocation7 + $0x268] sm:$0xff]  ;;  %v1114_v16 = vshrl.u32 %v1096_v40, %v1112_v61  ;;  %v1117_v37 = vadd.s32 127, %v1116_v55  ;;  %v1250_v13 = vshrl.u32 %v1249_v39, 23 }
 0x23e   : > { %9888 = vst [vmem:[#allocation86_spill] sm:$0xff] %v8216_v45  ;;  %v8218_v4 = vld [vmem:[#allocation7 + $0x258] sm:$0xff]  ;;  %v8226_v54 = vld [vmem:[#allocation7 + $0x260] sm:$0xff]  ;;  %v4787_v11 = vmin.u32 %v1003_v49, %v8184_v42  ;;  %v8233_v40 = vld [vmem:[#allocation7 + $0x250] sm:$0xff]  ;;  %v8238_v55 = vmul.f32 %v7643_v46, %v911_v2  ;;  %v9897_v49 = vand.u32 2147483647, %v8182_v62  ;;  %v8269_v2 = vsel %vm939_vm15, %v1023_v26, %v8136_v7 }
 0x23f   : > { %9889 = vst [vmem:[#allocation87_spill] sm:$0xff] %v8218_v4  ;;  %v8222_v12 = vld [vmem:[#allocation7 + $0x278] sm:$0xff]  ;;  %9892 = vst [vmem:[#allocation90_spill] sm:$0xff] %v8226_v54  ;;  %v8235_v61 = vld [vmem:[#allocation7 + $0x270] sm:$0xff]  ;;  %v1115_v35 = vor.u32 %v1114_v16, %v1113_v24  ;;  %v1118_v38 = vshll.u32 %v1117_v37, 23  ;;  %v4798_v27 = vadd.s32 4294967169, %v1250_v13 }
 0x240   : > { %9890 = vst [vmem:[#allocation88_spill] sm:$0xff] %v8222_v12  ;;  %9893 = vst [vmem:[#allocation91_spill] sm:$0xff] %v8233_v40  ;;  %v8240_v28 = vld [vmem:[#allocation7 + $0x288] sm:$0xff]  ;;  %v1253_v33 = vand.u32 8388607, %v9897_v49  ;;  %v1005_v32 = vclz %v4787_v11  ;;  %v8252_v24 = vld [vmem:[#allocation7 + $0x298] sm:$0xff] }
 0x241   : > { %9894 = vst [vmem:[#allocation92_spill] sm:$0xff] %v8235_v61  ;;  %9895 = vst [vmem:[#allocation93_spill] sm:$0xff] %v8240_v28  ;;  %v8242_v10 = vld [vmem:[#allocation7 + $0x2a8] sm:$0xff]  ;;  %v8254_v16 = vld [vmem:[#allocation7 + $0x2b8] sm:$0xff]  ;;  %v1119_v39 = vor.u32 4788187, %v1118_v38  ;;  %v1122_v14 = vcvt.s32.f32 %v1115_v35 }
 0x242   : > { %9896 = vst [vmem:[#allocation94_spill] sm:$0xff] %v8242_v10  ;;  %9898 = vst [vmem:[#allocation95_spill] sm:$0xff] %v8252_v24  ;;  %v8256_v37 = vld [vmem:[#allocation7 + $0x280] sm:$0xff]  ;;  %v8262_v1 = vld [vmem:[#allocation7 + $0x290] sm:$0xff]  ;;  %v4788_v4 = vadd.s32 4294967294, %v1005_v32  ;;  %v1146_v35 = vand.u32 2139095040, %v8238_v55 }
 0x243   : > { %9899 = vst [vmem:[#allocation96_spill] sm:$0xff] %v8254_v16  ;;  %9900 = vst [vmem:[#allocation97_spill] sm:$0xff] %v8256_v37  ;;  %v8260_v49 = vld [vmem:[#allocation7 + $0x2a0] sm:$0xff]  ;;  %v8264_v48 = vld [vmem:[#allocation7 + $0x2b0] sm:$0xff]  ;;  %v1120_v23 = vand.u32 2147483647, %v1119_v39 }
 0x244   : > { %9901 = vst [vmem:[#allocation98_spill] sm:$0xff] %v8260_v49  ;;  %9902 = vst [vmem:[#allocation99_spill] sm:$0xff] %v8262_v1  ;;  %v1254_v40 = vor.u32 8388608, %v1253_v33  ;;  %v1256_v61 = vadd.s32 1, %v4798_v27  ;;  %vm4789_vm1 = vcmp.lt.s32.totalorder %v4788_v4, 0  ;;  %v1147_v26 = vshrl.u32 %v1146_v35, 23 }
 0x245   : > { %9903 = vst [vmem:[#allocation100_spill] sm:$0xff] %v8264_v48  ;;  %v1123_v7 = vmul.f32 %v1122_v14, %v1120_v23  ;;  %v1008_v54 = vsel %vm4789_vm1, 0, %v4788_v4  ;;  %v9904_v1 = vmov 683565275   ;;  %v9906_v32 = vmov 2131351028  }
 0x246   : > { %vm1257_vm2 = vcmp.gt.s32.totalorder %v1256_v61, 0  ;;  %v1009_v39 = vsub.s32 32, %v1008_v54  ;;  %v1010_v11 = vshll.u32 %v8184_v42, %v1008_v54  ;;  %v1013_v33 = vsub.s32 4294967266, %v1008_v54 }
 0x247   : > { %v1258_v27 = vsel %vm1257_vm2, %v1256_v61, 0  ;;  %v1124_v24 = vxor.u32 2147483648, %v1123_v7  ;;  %v8284_v28 = vshll.u32 %v1254_v40, 8  ;;  %v4794_v4 = vadd.s32 4294967169, %v1147_v26 }
 0x248   : > { %v1260_v16 = vand.u32 31, %v1258_v27  ;;  %v1011_v35 = vshrl.u32 %v8161_v56, %v1009_v39  ;;  %v1014_v23 = vadd.s32 127, %v1013_v33  ;;  %v1259_v14 = vshrl.u32 %v1258_v27, 5 }
 0x249   : > { %v1125_v13 = vsel %vm1042_vm12, %v1124_v24, %v1123_v7  ;;  %v9905_v42 = vmov 2475754826   ;;  %v9907_v33 = vmov 2102212464   ;;  %vm1138_vm3 = vcmp.eq.s32.totalorder %v8201_v15, 2 }
 0x24a   : > { %v1261_v38 = vsub.s32 32, %v1260_v16  ;;  %v1263_v48 = vshll.u32 %v9904_v1, %v1260_v16  ;;  %v1266_v54 = vshll.u32 %v9905_v42, %v1260_v16  ;;  %v1128_v40 = vsel %vm8046_vm13, %v7668_v58, %v1125_v13 }
 0x24b   : > { %v1012_v61 = vor.u32 %v1011_v35, %v1010_v11  ;;  %v1015_v37 = vshll.u32 %v1014_v23, 23  ;;  %v1269_v49 = vshll.u32 %v9906_v32, %v1260_v16  ;;  %6280 = vcosq.f32 %v1128_v40 }
 0x24c   : > { %v1262_v56 = vshrl.u32 %v9904_v1, %v1261_v38  ;;  %v1264_v26 = vshrl.u32 %v9905_v42, %v1261_v38  ;;  %v1267_v24 = vshrl.u32 %v9906_v32, %v1261_v38  ;;  %6282 = vsinq.f32 %v1128_v40 }
 0x24d   : > { %v1016_v7 = vor.u32 4788187, %v1015_v37  ;;  %v1019_v39 = vcvt.s32.f32 %v1012_v61  ;;  %v1270_v27 = vshrl.u32 %v9907_v33, %v1261_v38  ;;  %v1272_v11 = vshll.u32 %v9907_v33, %v1260_v16 }
 0x24e   : > { %v1265_v21 = vor.u32 %v1264_v26, %v1263_v48  ;;  %v1268_v13 = vor.u32 %v1267_v24, %v1266_v54  ;;  %v9908_v35 = vmov 920167782   ;;  %vm1135_vm4 = vcmp.eq.s32.totalorder %v8201_v15, 0 }
 0x24f   : > { %v1273_v23 = vshrl.u32 %v9908_v35, %v1261_v38  ;;  %v1017_v10 = vand.u32 2147483647, %v1016_v7  ;;  %v1271_v12 = vor.u32 %v1270_v27, %v1269_v49  ;;  %v1275_v45 = vshll.u32 %v9908_v35, %v1260_v16 }
 0x250   : > { %v1276_v40 = vshrl.u32 %v9909_v52, %v1261_v38  ;;  %vm1134_vm5 = vcmp.lt.s32.totalorder %v8201_v15, 2  ;;  %vm1278_vm6 = vcmp.lt.s32.totalorder %v1259_v14, 1  ;;  %vm1279_vm7 = vcmp.lt.s32.totalorder %v1259_v14, 2 }
 0x251   : > { %v1274_v37 = vor.u32 %v1273_v23, %v1272_v11  ;;  %vm1280_vm8 = vcmp.lt.s32.totalorder %v1259_v14, 3  ;;  %v1020_v48 = vmul.f32 %v1019_v39, %v1017_v10  ;;  %vm1281_vm10 = vcmp.lt.s32.totalorder %v1259_v14, 4  ;;  %v8310_v11 = vld [vmem:[#allocation7 + $0x2c8] sm:$0xff] }
 0x252   : > { %v1277_v54 = vor.u32 %v1276_v40, %v1275_v45  ;;  %v1282_v61 = vsel %vm1278_vm6, %v1262_v56, %v1265_v21  ;;  %v1283_v26 = vsel %vm1281_vm10, %v1271_v12, 2102212464  ;;  %v1286_v24 = vsel %vm1278_vm6, %v1265_v21, %v1268_v13  ;;  %9910 = vst [vmem:[#allocation101_spill] sm:$0xff] %v8310_v11  ;;  %v8312_v23 = vld [vmem:[#allocation7 + $0x2e8] sm:$0xff] }
 0x253   : > { %v1287_v7 = vsel %vm1281_vm10, %v1274_v37, 920167782  ;;  %v1290_v49 = vsel %vm1278_vm6, %v1268_v13, %v1271_v12  ;;  %v1021_v27 = vxor.u32 2147483648, %v1020_v48  ;;  %v1284_v16 = vsel %vm1280_vm8, %v1268_v13, %v1283_v26  ;;  %9911 = vst [vmem:[#allocation102_spill] sm:$0xff] %v8312_v23  ;;  %v8408_v23 = vld [vmem:[#allocation7 + $0x2e0] sm:$0xff] }
 0x254   : > { %v1288_v38 = vsel %vm1280_vm8, %v1271_v12, %v1287_v7  ;;  %v1291_v44 = vsel %vm1281_vm10, %v1277_v54, 1326507024  ;;  %v1285_v17 = vsel %vm1279_vm7, %v1282_v61, %v1284_v16  ;;  %v1153_v56 = vadd.s32 1, %v4794_v4 }
 0x255   : > { %v1289_v10 = vsel %vm1279_vm7, %v1286_v24, %v1288_v38  ;;  %v1292_v45 = vsel %vm1280_vm8, %v1274_v37, %v1291_v44  ;;  %v1022_v39 = vsel %vm939_vm15, %v1021_v27, %v1020_v48  ;;  %v6281_v40 = vpop.eup %6280  ;;  %v9912_v44 = vsel %vm8205_vm0, 0, %v8269_v2  ;;  %v914_v24 = vld [vmem:[%s7371_s18 + $0x28] sm:$0xff] }
 0x256   : > { %v1293_v21 = vsel %vm1279_vm7, %v1290_v49, %v1292_v45  ;;  %v8321_v12 = vmul.u32.u64.low %v8284_v28, %v1289_v10  ;;  %v8322_v13 = vmul.u32.u64.high %v8284_v28, %v1289_v10, %v8321_v12  ;;  %v1025_v54 = vsel %vm8205_vm0, %v7671_v59, %v1022_v39  ;;  %v6283_v48 = vpop.eup %6282 }
 0x257   : > { %v8332_v4 = vand.u32 3, %v9912_v44  ;;  %v8335_v37 = vmul.u32.u64.low %v8284_v28, %v1293_v21  ;;  %v8336_v14 = vmul.u32.u64.high %v8284_v28, %v1293_v21, %v8335_v37  ;;  %v1139_v61 = vxor.u32 2147483648, %v6281_v40 }
 0x258   : > { %6284 = vcosq.f32 %v1025_v54  ;;  %vm1154_vm11 = vcmp.gt.s32.totalorder %v1153_v56, 0  ;;  %v1136_v7 = vxor.u32 2147483648, %v6283_v48  ;;  %v1301_v25 = vmul.u32 %v8284_v28, %v1285_v17 }
 0x259   : > { %6286 = vsinq.f32 %v1025_v54  ;;  %v1155_v49 = vsel %vm1154_vm11, %v1153_v56, 0  ;;  %v1140_v2 = vsel %vm1138_vm3, %v1139_v61, %v6283_v48  ;;  %v1304_v27 = vadd.s32 1, %v8322_v13 }
 0x25a   : > { %v9913_v16 = vand.u32 2147483647, %v8238_v55  ;;  %v1157_v10 = vand.u32 31, %v1155_v49  ;;  %v1137_v45 = vsel %vm1135_vm4, %v6281_v40, %v1136_v7  ;;  %vm1032_vm12 = vcmp.eq.s32.totalorder %v8332_v4, 0 }
 0x25b   : > { %vm1303_vm13 = vc.u32 %v8336_v14, %v8321_v12  ;;  %v8352_v39 = vshrl.u32 %v1155_v49, 5  ;;  %v8355_v17 = vmul.f32 %v7646_v47, %v914_v24  ;;  %v1141_v28 = vsel %vm1134_vm5, %v1137_v45, %v1140_v2 }
 0x25c   : > { %v1150_v38 = vand.u32 8388607, %v9913_v16  ;;  %vm1031_vm14 = vcmp.lt.s32.totalorder %v8332_v4, 2  ;;  %v1305_v56 = vsel %vm1303_vm13, %v1304_v27, %v8322_v13  ;;  %v1158_v21 = vsub.s32 32, %v1157_v10 }
 0x25d   : > { %v1160_v40 = vshll.u32 %v9904_v1, %v1157_v10  ;;  %v8364_v54 = vsel %vm1132_vm9, nan, %v1141_v28  ;;  %vm1029_vm15 = vweird.f32 %v7671_v59  ;;  %v1306_v44 = vadd.s32 %v1305_v56, %v1301_v25  ;;  %v8458_v59 = vld [vmem:[#allocation7 + $0x338] sm:$0xff] }
 0x25e   : > { %9914 = vst [vmem:[#allocation103_spill] sm:$0xff] %v8364_v54  ;;  %v1163_v37 = vshll.u32 %v9905_v42, %v1157_v10  ;;  %v1166_v48 = vshll.u32 %v9906_v32, %v1157_v10  ;;  %2345 = vmatprep.mubr.f32.mxu0 %v8364_v54  ;;  %2434 = vmatprep.mubr.f32.mxu1 %v8364_v54  ;;  %v1151_v15 = vor.u32 8388608, %v1150_v38  ;;  %vm1175_vm0 = vcmp.lt.s32.totalorder %v8352_v39, 1 }
 0x25f   : > { %v1159_v13 = vshrl.u32 %v9904_v1, %v1158_v21  ;;  %v1161_v61 = vshrl.u32 %v9905_v42, %v1158_v21  ;;  %v1164_v58 = vshrl.u32 %v9906_v32, %v1158_v21  ;;  %v1307_v24 = vadd.s32 536870912, %v1306_v44 }
 0x260   : > { %v1167_v7 = vshrl.u32 %v9907_v33, %v1158_v21  ;;  %v1169_v25 = vshll.u32 %v9907_v33, %v1157_v10  ;;  %v1170_v49 = vshrl.u32 %v9908_v35, %v1158_v21  ;;  %v1172_v16 = vshll.u32 %v9908_v35, %v1157_v10 }
 0x261   : > { %v1162_v2 = vor.u32 %v1161_v61, %v1160_v40  ;;  %v1165_v27 = vor.u32 %v1164_v58, %v1163_v37  ;;  %v1173_v45 = vshrl.u32 %v9909_v52, %v1158_v21  ;;  %v8379_v38 = vshrl.u32 %v1307_v24, 30 }
 0x262   : > { %v1168_v28 = vor.u32 %v1167_v7, %v1166_v48  ;;  %v1171_v56 = vor.u32 %v1170_v49, %v1169_v25  ;;  %v6285_v26 = vpop.eup %6284  ;;  %vm1035_vm1 = vcmp.eq.s32.totalorder %v8332_v4, 2  ;;  %vm1176_vm2 = vcmp.lt.s32.totalorder %v8352_v39, 2 }
 0x263   : > { %vm1178_vm3 = vcmp.lt.s32.totalorder %v8352_v39, 4  ;;  %v8385_v54 = vshll.u32 %v1151_v15, 8  ;;  %v6287_v40 = vpop.eup %6286  ;;  %v1036_v37 = vxor.u32 2147483648, %v6285_v26  ;;  %v1309_v10 = vshll.u32 %v8379_v38, 30  ;;  %v8395_v15 = vld [vmem:[#allocation7 + $0x2d8] sm:$0xff] }
 0x264   : > { %vm1177_vm4 = vcmp.lt.s32.totalorder %v8352_v39, 3  ;;  %v1180_v21 = vsel %vm1178_vm3, %v1168_v28, 2102212464  ;;  %v1033_v48 = vxor.u32 2147483648, %v6287_v40  ;;  %v1174_v61 = vor.u32 %v1173_v45, %v1172_v16  ;;  %v8404_v16 = vld [vmem:[#allocation7 + $0x2f8] sm:$0xff]  ;;  %v8406_v45 = vld [vmem:[#allocation7 + $0x2c0] sm:$0xff] }
 0x265   : > { %v1183_v58 = vsel %vm1175_vm0, %v1162_v2, %v1165_v27  ;;  %v1184_v24 = vsel %vm1178_vm3, %v1171_v56, 920167782  ;;  %v1037_v7 = vsel %vm1035_vm1, %v1036_v37, %v6287_v40  ;;  %v8397_v25 = vsub.s32 %v1306_v44, %v1309_v10 }
 0x266   : > { %v1179_v49 = vsel %vm1175_vm0, %v1159_v13, %v1162_v2  ;;  %v1455_v47 = vand.u32 2139095040, %v8355_v17  ;;  %v1034_v11 = vsel %vm1032_vm12, %v6285_v26, %v1033_v48  ;;  %v1332_v40 = vsub.s32 4, %v8379_v38  ;;  %v8417_v2 = vld [vmem:[#allocation7 + $0x2d0] sm:$0xff] }
 0x267   : > { %v1181_v44 = vsel %vm1177_vm4, %v1165_v27, %v1180_v21  ;;  %v1185_v37 = vsel %vm1177_vm4, %v1168_v28, %v1184_v24  ;;  %v1038_v13 = vsel %vm1031_vm14, %v1034_v11, %v1037_v7  ;;  %v8419_v26 = vld [vmem:[#allocation7 + $0x2f0] sm:$0xff]  ;;  %v1312_v10 = vsub.s32 0, %v8397_v25 }
 0x268   : > { %v1186_v48 = vsel %vm1176_vm2, %v1183_v58, %v1185_v37  ;;  %v1187_v52 = vsel %vm1175_vm0, %v1165_v27, %v1168_v28  ;;  %v8428_v21 = vsel %vm1029_vm15, nan, %v1038_v13  ;;  %v1188_v4 = vsel %vm1178_vm3, %v1174_v61, 1326507024  ;;  %v8443_v27 = vld [vmem:[#allocation7 + $0x308] sm:$0xff]  ;;  %v913_v58 = vld [vmem:[%s7371_s18 + $0x20] sm:$0xff] }
 0x269   : > { %9915 = vst [vmem:[#allocation104_spill] sm:$0xff] %v8428_v21  ;;  %v8433_v11 = vmul.u32.u64.low %v8385_v54, %v1186_v48  ;;  %v8434_v24 = vmul.u32.u64.high %v8385_v54, %v1186_v48, %v8433_v11  ;;  %2346 = vmatmul.mubr.f32.vlgmr.msra.gmra.mrb[8].mxu0 %v8428_v21  ;;  %2435 = vmatmul.mubr.f32.vlgmr.msra.gmra.mrb[8].mxu1 %v8428_v21  ;;  %v4799_v28 = vmin.u32 %v1312_v10, %v8397_v25  ;;  %v9916_v61 = vpack.c.bf16 %v7950_v19, %v7948_v18  ;;  %v8454_v13 = vld [vmem:[#allocation7 + $0x328] sm:$0xff]  ;;  %v8456_v48 = vld [vmem:[#allocation7 + $0x318] sm:$0xff] }
 0x26a   : > { %v9917_v7 = vpack.c.bf16 %v7954_v20, %v7952_v5  ;;  %vm1248_vm5 = vcmp.lt.s32.totalorder %v8182_v62, 0  ;;  %v1189_v18 = vsel %vm1177_vm4, %v1171_v56, %v1188_v4  ;;  %v1456_v19 = vshrl.u32 %v1455_v47, 23  ;;  %v8475_v56 = vld [vmem:[#allocation7 + $0x300] sm:$0xff] }
 0x26b   : > { %5410 = vmatpush1.bf16.msra.mxu0 %v9916_v61  ;;  %v9918_v10 = vpack.c.bf16 %v7967_v63, %v7965_v22  ;;  %v9919_v5 = vpack.c.bf16 %v7971_v3, %v7969_v29  ;;  %v1314_v20 = vclz %v4799_v28  ;;  %v1182_v61 = vsel %vm1176_vm2, %v1179_v49, %v1181_v44  ;;  %v8477_v47 = vld [vmem:[#allocation7 + $0x320] sm:$0xff] }
 0x26c   : > { %5474 = vmatpush1.bf16.msra.mxu1 %v9917_v7  ;;  %v1190_v7 = vsel %vm1176_vm2, %v1187_v52, %v1189_v18  ;;  %v9747_v37 = vand.u32 2147483647, %v8355_v17  ;;  %v1333_v22 = vsel %vm1248_vm5, %v1332_v40, %v8379_v38  ;;  %v4806_v3 = vadd.s32 4294967169, %v1456_v19  ;;  %v9955_v21 = vld [vmem:[#allocation53_spill] sm:$0xff] }
 0x26d   : > { %5412 = vmatprep.subr.bf16.mxu0 %v9918_v10  ;;  %5476 = vmatprep.subr.bf16.mxu1 %v9919_v5  ;;  %v8483_v63 = vmul.u32.u64.low %v8385_v54, %v1190_v7  ;;  %v8484_v29 = vmul.u32.u64.high %v8385_v54, %v1190_v7, %v8483_v63  ;;  %v4800_v49 = vadd.s32 4294967294, %v1314_v20  ;;  %v1201_v44 = vadd.s32 1, %v8434_v24  ;;  %v8517_v5 = vld [vmem:[#allocation7 + $0x330] sm:$0xff] }
 0x26e   : > { %v9920_v4 = vpack.c.bf16 %v7977_v6, %v7975_v36  ;;  %v9921_v38 = vpack.c.bf16 %v7981_v31, %v7979_v30  ;;  %v9922_v40 = vand.u32 2147483647, %v8182_v62  ;;  %v1198_v18 = vmul.u32 %v8385_v54, %v1182_v61  ;;  %v8515_v31 = vld [vmem:[#allocation7 + $0x310] sm:$0xff]  ;;  %v8537_v63 = vld [vmem:[#allocation7 + $0x340] sm:$0xff] }
 0x26f   : > { %v1462_v19 = vadd.s32 1, %v4806_v3  ;;  %v8505_v10 = vmul.f32 %v7643_v46, %v913_v58  ;;  %v9926_v36 = vpack.c.bf16 %v7985_v9, %v7983_v8  ;;  %v9927_v6 = vpack.c.bf16 %v7989_v41, %v7987_v34  ;;  %v8523_v8 = vld [vmem:[#allocation7 + $0x348] sm:$0xff]  ;;  %v8529_v41 = vld [vmem:[#allocation7 + $0x358] sm:$0xff]  ;;  %9929 = vst [vmem:[#allocation107_spill] sm:$0xff] %v8537_v63  ;;  %v8539_v3 = vld [vmem:[#allocation7 + $0x360] sm:$0xff] }
 0x270   : > { %5414 = vmatpush1.bf16.msra.mxu0 %v9920_v4  ;;  %5478 = vmatpush1.bf16.msra.mxu1 %v9921_v38  ;;  %vm8499_vm6 = vcmp.le.f32.partialorder %v9922_v40, 0.7853982  ;;  %v1302_v54 = vadd.s32 %v8321_v12, %v8336_v14  ;;  %vm4801_vm7 = vcmp.lt.s32.totalorder %v4800_v49, 0  ;;  %vm1200_vm8 = vc.u32 %v8484_v29, %v8433_v11  ;;  %v8527_v34 = vld [vmem:[#allocation7 + $0x368] sm:$0xff]  ;;  %9928 = vst [vmem:[#allocation106_spill] sm:$0xff] %v8529_v41  ;;  %v9937_v30 = vld [vmem:[#allocation44_spill] sm:$0xff] }
 0x271   : > { %9925 = vst [vmem:[#allocation105_spill] sm:$0xff] %v8505_v10  ;;  %5416 = vmatprep.subr.bf16.mxu0 %v9926_v36  ;;  %5480 = vmatprep.subr.bf16.mxu1 %v9927_v6  ;;  %v1335_v58 = vsel %vm8499_vm6, 0, %v1333_v22  ;;  %v1317_v9 = vsel %vm4801_vm7, 0, %v4800_v49  ;;  %v1459_v20 = vand.u32 8388607, %v9747_v37  ;;  %vm1463_vm9 = vcmp.gt.s32.totalorder %v1462_v19, 0 }
 0x272   : > { %v1318_v61 = vsub.s32 32, %v1317_v9  ;;  %v1319_v12 = vshll.u32 %v8397_v25, %v1317_v9  ;;  %v1322_v14 = vsub.s32 4294967266, %v1317_v9  ;;  %v1202_v7 = vsel %vm1200_vm8, %v1201_v44, %v8434_v24  ;;  %v8535_v22 = vld [vmem:[#allocation7 + $0x378] sm:$0xff]  ;;  %9930 = vst [vmem:[#allocation108_spill] sm:$0xff] %v8539_v3  ;;  %v9934_v44 = vld [vmem:[#allocation42_spill] sm:$0xff]  ;;  %v9938_v37 = vld [vmem:[#allocation43_spill] sm:$0xff] }
 0x273   : > { %v9931_v49 = vld [vmem:[#allocation40_spill] sm:$0xff]  ;;  %v9933_v38 = vpack.c.bf16 %v8000_v51, %v7998_v50  ;;  %v1203_v40 = vadd.s32 %v1202_v7, %v1198_v18  ;;  %v1464_v36 = vsel %vm1463_vm9, %v1462_v19, 0  ;;  %v1352_v24 = vand.u32 2139095040, %v8505_v10  ;;  %v9935_v6 = vld [vmem:[#allocation41_spill] sm:$0xff]  ;;  %v9943_v7 = vld [vmem:[#allocation47_spill] sm:$0xff] }
 0x274   : > { %v9932_v4 = vpack.c.bf16 %v7993_v43, %v9931_v49  ;;  %v9936_v9 = vpack.c.bf16 %v9934_v44, %v9935_v6  ;;  %v9939_v52 = vpack.c.bf16 %v9937_v30, %v9938_v37  ;;  %v1320_v43 = vshrl.u32 %v1302_v54, %v1318_v61  ;;  %v9941_v30 = vld [vmem:[#allocation45_spill] sm:$0xff]  ;;  %v9952_v19 = vld [vmem:[#allocation51_spill] sm:$0xff]  ;;  %v9957_v3 = vld [vmem:[#allocation56_spill] sm:$0xff] }
 0x275   : > { %5482 = vmatpush1.bf16.msra.mxu1 %v9933_v38  ;;  %v1323_v49 = vadd.s32 127, %v1322_v14  ;;  %v1466_v51 = vand.u32 31, %v1464_v36  ;;  %v1204_v18 = vadd.s32 536870912, %v1203_v40  ;;  %v1460_v6 = vor.u32 8388608, %v1459_v20  ;;  %v9946_v20 = vld [vmem:[#allocation48_spill] sm:$0xff]  ;;  %v9954_v14 = vld [vmem:[#allocation54_spill] sm:$0xff] }
 0x276   : > { %5418 = vmatpush1.bf16.msra.mxu0 %v9932_v4  ;;  %5484 = vmatprep.subr.bf16.mxu1 %v9939_v52  ;;  %v8558_v4 = vand.u32 3, %v1335_v58  ;;  %v1321_v38 = vor.u32 %v1320_v43, %v1319_v12  ;;  %v9940_v52 = vpack.c.bf16 %v8019_v0, %v8017_v57  ;;  %v9942_v54 = vpack.c.bf16 %v8023_v60, %v9941_v30  ;;  %v9944_v12 = vld [vmem:[#allocation46_spill] sm:$0xff]  ;;  %v9958_v46 = vld [vmem:[#allocation55_spill] sm:$0xff] }
 0x277   : > { %5420 = vmatprep.subr.bf16.mxu0 %v9936_v9  ;;  %v1324_v44 = vshll.u32 %v1323_v49, 23  ;;  %v1467_v37 = vsub.s32 32, %v1466_v51  ;;  %v8570_v58 = vshrl.u32 %v1204_v18, 30  ;;  %v1469_v61 = vshll.u32 %v9904_v1, %v1466_v51 }
 0x278   : > { %v1353_v9 = vshrl.u32 %v1352_v24, 23  ;;  %v9945_v43 = vpack.c.bf16 %v9943_v7, %v9944_v12  ;;  %v9947_v49 = vpack.c.bf16 %v8038_v53, %v9946_v20  ;;  %v1328_v0 = vcvt.s32.f32 %v1321_v38  ;;  %v9948_v38 = vld [vmem:[#allocation50_spill] sm:$0xff] }
 0x279   : > { %5486 = vmatpush1.bf16.msra.mxu1 %v9942_v54  ;;  %v1325_v57 = vor.u32 4788187, %v1324_v44  ;;  %v1470_v60 = vshrl.u32 %v9905_v42, %v1467_v37  ;;  %v1472_v18 = vshll.u32 %v9905_v42, %v1466_v51  ;;  %v8583_v30 = vshrl.u32 %v1464_v36, 5 }
 0x27a   : > { %5422 = vmatpush1.bf16.msra.mxu0 %v9940_v52  ;;  %5488 = vmatprep.subr.bf16.mxu1 %v9947_v49  ;;  %v1206_v52 = vshll.u32 %v8570_v58, 30  ;;  %v1473_v24 = vshrl.u32 %v9906_v32, %v1467_v37  ;;  %v1478_v54 = vshll.u32 %v9907_v33, %v1466_v51  ;;  %v1475_v12 = vshll.u32 %v9906_v32, %v1466_v51  ;;  %v9951_v49 = vld [vmem:[#allocation52_spill] sm:$0xff] }
 0x27b   : > { %5424 = vmatprep.subr.bf16.mxu0 %v9945_v43  ;;  %v1326_v7 = vand.u32 2147483647, %v1325_v57  ;;  %v1476_v53 = vshrl.u32 %v9907_v33, %v1467_v37  ;;  %v1479_v44 = vshrl.u32 %v9908_v35, %v1467_v37  ;;  %v9949_v43 = vld [vmem:[#allocation49_spill] sm:$0xff]  ;;  %v9953_v50 = vpack.c.bf16 %v9951_v49, %v9952_v19 }
 0x27c   : > { %v9950_v20 = vpack.c.bf16 %v9948_v38, %v9949_v43  ;;  %v8596_v36 = vsub.s32 %v1203_v40, %v1206_v52  ;;  %v1468_v25 = vshrl.u32 %v9904_v1, %v1467_v37  ;;  %v1471_v39 = vor.u32 %v1470_v60, %v1469_v61 }
 0x27d   : > { %5490 = vmatpush1.bf16.msra.mxu1 %v9953_v50  ;;  %v8599_v57 = vshll.u32 %v1460_v6, 8  ;;  %v9956_v63 = vpack.c.bf16 %v9954_v14, %v9955_v21  ;;  %v9959_v41 = vpack.c.bf16 %v9957_v3, %v9958_v46  ;;  %v1329_v38 = vmul.f32 %v1328_v0, %v1326_v7  ;;  %v9962_v3 = vld [vmem:[#allocation58_spill] sm:$0xff]  ;;  %v9965_v0 = vld [vmem:[#allocation60_spill] sm:$0xff]  ;;  %v9969_v7 = vld [vmem:[#allocation61_spill] sm:$0xff] }
 0x27e   : > { %5426 = vmatpush1.bf16.msra.mxu0 %v9950_v20  ;;  %v1474_v43 = vor.u32 %v1473_v24, %v1472_v18  ;;  %v1481_v19 = vshll.u32 %v9908_v35, %v1466_v51  ;;  %v9960_v40 = vand.u32 2147483647, %v8505_v10  ;;  %vm1145_vm10 = vcmp.lt.s32.totalorder %v8238_v55, 0  ;;  %v9963_v51 = vld [vmem:[#allocation57_spill] sm:$0xff]  ;;  %v9966_v18 = vld [vmem:[#allocation59_spill] sm:$0xff] }
 0x27f   : > { %5428 = vmatprep.subr.bf16.mxu0 %v9956_v63  ;;  %5492 = vmatprep.subr.bf16.mxu1 %v9959_v41  ;;  %v1209_v6 = vsub.s32 0, %v8596_v36  ;;  %v1480_v61 = vor.u32 %v1479_v44, %v1478_v54  ;;  %v9961_v60 = vmov 1326507024   ;;  %vm1484_vm11 = vcmp.lt.s32.totalorder %v8583_v30, 1  ;;  %v10024_v10 = vld [vmem:[#allocation95_spill] sm:$0xff] }
 0x280   : > { %v8610_v50 = vand.u32 8388607, %v9960_v40  ;;  %v1482_v21 = vshrl.u32 %v9961_v60, %v1467_v37  ;;  %v1330_v63 = vxor.u32 2147483648, %v1329_v38  ;;  %v1477_v46 = vor.u32 %v1476_v53, %v1475_v12  ;;  %v9968_v37 = vld [vmem:[#allocation62_spill] sm:$0xff]  ;;  %v9972_v53 = vld [vmem:[#allocation63_spill] sm:$0xff] }
 0x281   : > { %vm1487_vm12 = vcmp.lt.s32.totalorder %v8583_v30, 4  ;;  %v4802_v41 = vadd.s32 4294967169, %v1353_v9  ;;  %v9964_v14 = vpack.c.bf16 %v9962_v3, %v9963_v51  ;;  %v9967_v52 = vpack.c.bf16 %v9965_v0, %v9966_v18  ;;  %v9971_v9 = vld [vmem:[#allocation64_spill] sm:$0xff]  ;;  %v9977_v18 = vld [vmem:[#allocation66_spill] sm:$0xff] }
 0x282   : > { %v4795_v24 = vmin.u32 %v1209_v6, %v8596_v36  ;;  %v1229_v54 = vsub.s32 4, %v8570_v58  ;;  %vm1485_vm13 = vcmp.lt.s32.totalorder %v8583_v30, 2  ;;  %vm1486_vm14 = vcmp.lt.s32.totalorder %v8583_v30, 3  ;;  %v9992_v30 = vld [vmem:[#allocation76_spill] sm:$0xff] }
 0x283   : > { %5430 = vmatpush1.bf16.msra.mxu0 %v9964_v14  ;;  %5494 = vmatpush1.bf16.msra.mxu1 %v9967_v52  ;;  %v9970_v12 = vpack.c.bf16 %v9968_v37, %v9969_v7  ;;  %v9973_v44 = vpack.c.bf16 %v9971_v9, %v9972_v53  ;;  %v1331_v20 = vsel %vm1248_vm5, %v1330_v63, %v1329_v38  ;;  %v1489_v40 = vsel %vm1487_vm12, %v1477_v46, 2102212464  ;;  %v9978_v52 = vld [vmem:[#allocation65_spill] sm:$0xff]  ;;  %v9981_v7 = vld [vmem:[#allocation67_spill] sm:$0xff]  ;;  %v9983_v53 = vld [vmem:[#allocation70_spill] sm:$0xff] }
 0x284   : > { %v1483_v49 = vor.u32 %v1482_v21, %v1481_v19  ;;  %v1492_v6 = vsel %vm1484_vm11, %v1471_v39, %v1474_v43  ;;  %v1334_v3 = vsel %vm8499_vm6, %v8182_v62, %v1331_v20  ;;  %v9974_v51 = vand.u32 2147483647, %v8238_v55 }
 0x285   : > { %5432 = vmatprep.subr.bf16.mxu0 %v9970_v12  ;;  %5496 = vmatprep.subr.bf16.mxu1 %v9973_v44  ;;  %v1211_v0 = vclz %v4795_v24  ;;  %v1488_v38 = vsel %vm1484_vm11, %v1468_v25, %v1471_v39  ;;  %v1493_v19 = vsel %vm1487_vm12, %v1480_v61, 920167782  ;;  %6288 = vcosq.f32 %v1334_v3  ;;  %v9980_v24 = vld [vmem:[#allocation68_spill] sm:$0xff]  ;;  %v9984_v44 = vld [vmem:[#allocation69_spill] sm:$0xff] }
 0x286   : > { %vm8644_vm15 = vcmp.le.f32.partialorder %v9974_v51, 0.7853982  ;;  %v1490_v21 = vsel %vm1486_vm14, %v1474_v43, %v1489_v40  ;;  %v1494_v28 = vsel %vm1486_vm14, %v1477_v46, %v1493_v19  ;;  %v1496_v63 = vsel %vm1484_vm11, %v1474_v43, %v1477_v46  ;;  %v9986_v43 = vld [vmem:[#allocation72_spill] sm:$0xff]  ;;  %v9987_v46 = vld [vmem:[#allocation71_spill] sm:$0xff] }
 0x287   : > { %v9979_v37 = vpack.c.bf16 %v9977_v18, %v9978_v52  ;;  %v9982_v39 = vpack.c.bf16 %v9980_v24, %v9981_v7  ;;  %6290 = vsinq.f32 %v1334_v3  ;;  %v4796_v25 = vadd.s32 4294967294, %v1211_v0  ;;  %v9989_v24 = vld [vmem:[#allocation74_spill] sm:$0xff]  ;;  %v9990_v7 = vld [vmem:[#allocation73_spill] sm:$0xff] }
 0x288   : > { %v1495_v12 = vsel %vm1485_vm13, %v1492_v6, %v1494_v28  ;;  %v1497_v9 = vsel %vm1487_vm12, %v1483_v49, 1326507024  ;;  %v9985_v20 = vpack.c.bf16 %v9983_v53, %v9984_v44  ;;  %v9988_v40 = vpack.c.bf16 %v9986_v43, %v9987_v46  ;;  %v9999_v53 = vld [vmem:[#allocation79_spill] sm:$0xff] }
 0x289   : > { %5434 = vmatpush1.bf16.msra.mxu0 %v9979_v37  ;;  %5498 = vmatpush1.bf16.msra.mxu1 %v9982_v39  ;;  %v1199_v51 = vadd.s32 %v8433_v11, %v8484_v29  ;;  %v1498_v3 = vsel %vm1486_vm14, %v1480_v61, %v1497_v9  ;;  %v8679_v0 = vmul.u32.u64.low %v8599_v57, %v1495_v12  ;;  %v8680_v6 = vmul.u32.u64.high %v8599_v57, %v1495_v12, %v8679_v0  ;;  %v8690_v29 = vld [vmem:[#allocation7 + $0x350] sm:$0xff]  ;;  %v9995_v39 = vld [vmem:[#allocation78_spill] sm:$0xff] }
 0x28a   : > { %5436 = vmatprep.subr.bf16.mxu0 %v9985_v20  ;;  %5500 = vmatprep.subr.bf16.mxu1 %v9988_v40  ;;  %vm4797_vm0 = vcmp.lt.s32.totalorder %v4796_v25, 0  ;;  %v1491_v49 = vsel %vm1485_vm13, %v1488_v38, %v1490_v21  ;;  %v1499_v19 = vsel %vm1485_vm13, %v1496_v63, %v1498_v3  ;;  %v1359_v28 = vadd.s32 1, %v4802_v41  ;;  %v8692_v61 = vld [vmem:[#allocation7 + $0x370] sm:$0xff] }
 0x28b   : > { %v1214_v18 = vsel %vm4797_vm0, 0, %v4796_v25  ;;  %v1230_v11 = vsel %vm1145_vm10, %v1229_v54, %v8570_v58  ;;  %v8695_v52 = vmul.u32.u64.low %v8599_v57, %v1499_v19  ;;  %v8696_v37 = vmul.u32.u64.high %v8599_v57, %v1499_v19, %v8695_v52  ;;  %v9993_v21 = vld [vmem:[#allocation75_spill] sm:$0xff]  ;;  %v9996_v25 = vld [vmem:[#allocation77_spill] sm:$0xff]  ;;  %v9998_v9 = vld [vmem:[#allocation80_spill] sm:$0xff] }
 0x28c   : > { %v9991_v38 = vpack.c.bf16 %v9989_v24, %v9990_v7  ;;  %v9994_v41 = vpack.c.bf16 %v9992_v30, %v9993_v21  ;;  %vm1338_vm1 = vweird.f32 %v8182_v62  ;;  %v1215_v63 = vsub.s32 32, %v1214_v18  ;;  %v8717_v52 = vld [vmem:[#allocation7 + $0x388] sm:$0xff] }
 0x28d   : > { %v1216_v58 = vshll.u32 %v8596_v36, %v1214_v18  ;;  %v1219_v54 = vsub.s32 4294967266, %v1214_v18  ;;  %vm1360_vm2 = vcmp.gt.s32.totalorder %v1359_v28, 0  ;;  %v9997_v12 = vpack.c.bf16 %v9995_v39, %v9996_v25  ;;  %10001 = vst [vmem:[#allocation40_spill] sm:$0xff] %v8717_v52  ;;  %v8719_v24 = vld [vmem:[#allocation7 + $0x3a8] sm:$0xff]  ;;  %v10009_v25 = vld [vmem:[#allocation85_spill] sm:$0xff]  ;;  %v10023_v36 = vld [vmem:[#allocation96_spill] sm:$0xff] }
 0x28e   : > { %5438 = vmatpush1.bf16.msra.mxu0 %v9991_v38  ;;  %5502 = vmatpush1.bf16.msra.mxu1 %v9994_v41  ;;  %v10000_v44 = vpack.c.bf16 %v9998_v9, %v9999_v53  ;;  %v1507_v20 = vmul.u32 %v8599_v57, %v1491_v49  ;;  %v1510_v43 = vadd.s32 1, %v8680_v6  ;;  %v1357_v46 = vor.u32 8388608, %v8610_v50  ;;  %v10002_v50 = vld [vmem:[#allocation82_spill] sm:$0xff]  ;;  %v10006_v7 = vld [vmem:[#allocation83_spill] sm:$0xff] }
 0x28f   : > { %5440 = vmatprep.subr.bf16.mxu0 %v9997_v12  ;;  %v1361_v40 = vsel %vm1360_vm2, %v1359_v28, 0  ;;  %v1217_v3 = vshrl.u32 %v1199_v51, %v1215_v63  ;;  %v1220_v19 = vadd.s32 127, %v1219_v54  ;;  %vm1340_vm3 = vcmp.lt.s32.totalorder %v8558_v4, 2  ;;  %v10003_v51 = vld [vmem:[#allocation81_spill] sm:$0xff]  ;;  %v10005_v28 = vld [vmem:[#allocation84_spill] sm:$0xff]  ;;  %v6289_v54 = vpop.eup %6288  ;;  %v10008_v39 = vld [vmem:[#allocation86_spill] sm:$0xff] }
 0x290   : > { %5504 = vmatprep.subr.bf16.mxu1 %v10000_v44  ;;  %v1363_v18 = vand.u32 31, %v1361_v40  ;;  %vm1341_vm4 = vcmp.eq.s32.totalorder %v8558_v4, 0  ;;  %v1232_v57 = vsel %vm8644_vm15, 0, %v1230_v11  ;;  %vm1509_vm5 = vc.u32 %v8696_v37, %v8679_v0  ;;  %v10011_v12 = vld [vmem:[#allocation88_spill] sm:$0xff]  ;;  %v10012_v9 = vld [vmem:[#allocation87_spill] sm:$0xff] }
 0x291   : > { %v10004_v49 = vpack.c.bf16 %v10002_v50, %v10003_v51  ;;  %v10007_v38 = vpack.c.bf16 %v10005_v28, %v10006_v7  ;;  %v1218_v30 = vor.u32 %v1217_v3, %v1216_v58  ;;  %v1221_v21 = vshll.u32 %v1220_v19, 23  ;;  %v6291_v3 = vpop.eup %6290 }
 0x292   : > { %v1511_v41 = vsel %vm1509_vm5, %v1510_v43, %v8680_v6  ;;  %v1364_v63 = vsub.s32 32, %v1363_v18  ;;  %v10010_v11 = vpack.c.bf16 %v10008_v39, %v10009_v25  ;;  %v10013_v53 = vpack.c.bf16 %v10011_v12, %v10012_v9  ;;  %v10014_v39 = vld [vmem:[#allocation90_spill] sm:$0xff]  ;;  %v10015_v25 = vld [vmem:[#allocation89_spill] sm:$0xff] }
 0x293   : > { %5442 = vmatpush1.bf16.msra.mxu0 %v10004_v49  ;;  %5506 = vmatpush1.bf16.msra.mxu1 %v10007_v38  ;;  %vm1344_vm6 = vcmp.eq.s32.totalorder %v8558_v4, 2  ;;  %v1512_v44 = vadd.s32 %v1511_v41, %v1507_v20  ;;  %v8741_v50 = vshll.u32 %v1357_v46, 8  ;;  %v1345_v6 = vxor.u32 2147483648, %v6289_v54  ;;  %v10017_v46 = vld [vmem:[#allocation92_spill] sm:$0xff]  ;;  %v10018_v41 = vld [vmem:[#allocation91_spill] sm:$0xff] }
 0x294   : > { %5444 = vmatprep.subr.bf16.mxu0 %v10010_v11  ;;  %5508 = vmatprep.subr.bf16.mxu1 %v10013_v53  ;;  %v1222_v43 = vor.u32 4788187, %v1221_v21  ;;  %v1225_v19 = vcvt.s32.f32 %v1218_v30  ;;  %v8745_v51 = vand.u32 3, %v1232_v57  ;;  %v1342_v49 = vxor.u32 2147483648, %v6291_v3  ;;  %v10020_v21 = vld [vmem:[#allocation94_spill] sm:$0xff]  ;;  %v10021_v53 = vld [vmem:[#allocation93_spill] sm:$0xff] }
 0x295   : > { %v1513_v28 = vadd.s32 536870912, %v1512_v44  ;;  %v1366_v7 = vshll.u32 %v9904_v1, %v1363_v18  ;;  %v1367_v38 = vshrl.u32 %v9905_v42, %v1364_v63  ;;  %v10016_v20 = vpack.c.bf16 %v10014_v39, %v10015_v25  ;;  %v10029_v4 = vld [vmem:[#allocation100_spill] sm:$0xff] }
 0x296   : > { %v10019_v11 = vpack.c.bf16 %v10017_v46, %v10018_v41  ;;  %v1346_v12 = vsel %vm1344_vm6, %v1345_v6, %v6291_v3  ;;  %v1223_v9 = vand.u32 2147483647, %v1222_v43  ;;  %v1369_v30 = vshll.u32 %v9905_v42, %v1363_v18  ;;  %v10030_v41 = vld [vmem:[#allocation99_spill] sm:$0xff] }
 0x297   : > { %5446 = vmatpush1.bf16.msra.mxu0 %v10016_v20  ;;  %v1370_v57 = vshrl.u32 %v9906_v32, %v1364_v63  ;;  %v10022_v58 = vpack.c.bf16 %v10020_v21, %v10021_v53  ;;  %v10025_v52 = vpack.c.bf16 %v10023_v36, %v10024_v10  ;;  %v1343_v39 = vsel %vm1341_vm4, %v6289_v54, %v1342_v49  ;;  %v10026_v54 = vld [vmem:[#allocation98_spill] sm:$0xff]  ;;  %v10027_v49 = vld [vmem:[#allocation97_spill] sm:$0xff] }
 0x298   : > { %5510 = vmatpush1.bf16.msra.mxu1 %v10019_v11  ;;  %v8765_v25 = vshrl.u32 %v1513_v28, 30  ;;  %v8767_v20 = vshrl.u32 %v1361_v40, 5  ;;  %v1372_v3 = vshll.u32 %v9906_v32, %v1363_v18  ;;  %v1347_v6 = vsel %vm1340_vm3, %v1343_v39, %v1346_v12  ;;  %v10032_v21 = vld [vmem:[#allocation102_spill] sm:$0xff]  ;;  %v10033_v53 = vld [vmem:[#allocation101_spill] sm:$0xff] }
 0x299   : > { %5448 = vmatprep.subr.bf16.mxu0 %v10022_v58  ;;  %5512 = vmatprep.subr.bf16.mxu1 %v10025_v52  ;;  %v1226_v43 = vmul.f32 %v1225_v19, %v1223_v9  ;;  %v1373_v46 = vshrl.u32 %v9907_v33, %v1364_v63  ;;  %v1375_v58 = vshll.u32 %v9907_v33, %v1363_v18  ;;  %v8776_v10 = vsel %vm1338_vm1, nan, %v1347_v6 }
 0x29a   : > { %v1515_v36 = vshll.u32 %v8765_v25, 30  ;;  %v1368_v52 = vor.u32 %v1367_v38, %v1366_v7  ;;  %v1376_v40 = vshrl.u32 %v9908_v35, %v1364_v63  ;;  %v10028_v28 = vpack.c.bf16 %v10026_v54, %v10027_v49  ;;  %2351 = vmatprep.mubr.f32.mxu0 %v8776_v10  ;;  %2440 = vmatprep.mubr.f32.mxu1 %v8776_v10  ;;  %v8829_v49 = vld [vmem:[#allocation7 + $0x3a0] sm:$0xff] }
 0x29b   : > { %v10031_v19 = vpack.c.bf16 %v10029_v4, %v10030_v41  ;;  %v1227_v11 = vxor.u32 2147483648, %v1226_v43  ;;  %v1371_v12 = vor.u32 %v1370_v57, %v1369_v30  ;;  %v1378_v9 = vshll.u32 %v9908_v35, %v1363_v18 }
 0x29c   : > { %5450 = vmatpush1.bf16.msra.mxu0 %v10028_v28  ;;  %v1379_v62 = vshrl.u32 %v9961_v60, %v1364_v63  ;;  %v10034_v7 = vpack.c.bf16 %v10032_v21, %v10033_v53  ;;  %v10035_v38 = vpack.c.bf16 %v8404_v16, %v8395_v15  ;;  %v8794_v39 = vsub.s32 %v1512_v44, %v1515_v36  ;;  %v8804_v15 = vld [vmem:[#allocation7 + $0x398] sm:$0xff]  ;;  %v10040_v28 = vld [vmem:[#allocation39_spill] sm:$0xff] }
 0x29d   : > { %5514 = vmatpush1.bf16.msra.mxu1 %v10031_v19  ;;  %v1365_v6 = vshrl.u32 %v9904_v1, %v1364_v63  ;;  %v1377_v54 = vor.u32 %v1376_v40, %v1375_v58  ;;  %vm1381_vm7 = vcmp.lt.s32.totalorder %v8767_v20, 1  ;;  %v1228_v18 = vsel %vm1145_vm10, %v1227_v11, %v1226_v43  ;;  %v8806_v16 = vld [vmem:[#allocation7 + $0x3b8] sm:$0xff]  ;;  %v8827_v40 = vld [vmem:[#allocation7 + $0x380] sm:$0xff]  ;;  %v2139_v21 = vld [vmem:[#allocation7 + $0x390] sm:$0xff] }
 0x29e   : > { %5452 = vmatprep.subr.bf16.mxu0 %v10034_v7  ;;  %5516 = vmatprep.subr.bf16.mxu1 %v10035_v38  ;;  %v1374_v30 = vor.u32 %v1373_v46, %v1372_v3  ;;  %vm1382_vm8 = vcmp.lt.s32.totalorder %v8767_v20, 2  ;;  %vm1384_vm9 = vcmp.lt.s32.totalorder %v8767_v20, 4  ;;  %v916_v63 = vld [vmem:[%s7371_s18 + $0x38] sm:$0xff]  ;;  %v1231_v44 = vsel %vm8644_vm15, %v8238_v55, %v1228_v18  ;;  %v2143_v53 = vld [vmem:[#allocation7 + $0x3b0] sm:$0xff] }
 0x29f   : > { %vm1454_vm11 = vcmp.lt.s32.totalorder %v8355_v17, 0  ;;  %v1518_v57 = vsub.s32 0, %v8794_v39  ;;  %v1380_v58 = vor.u32 %v1379_v62, %v1378_v9  ;;  %vm1383_vm10 = vcmp.lt.s32.totalorder %v8767_v20, 3  ;;  %v915_v7 = vld [vmem:[%s7371_s18 + $0x30] sm:$0xff]  ;;  %s4783_s18 = sshll.u32 %s9803_s9, 2  ;;  %s6837_s9 = smov [#allocation23]  }
 0x2a0   : > { %v10036_v3 = vpack.c.bf16 %v8408_v23, %v8406_v45  ;;  %v10037_v43 = vpack.c.bf16 %v8419_v26, %v8417_v2  ;;  %6292 = vcosq.f32 %v1231_v44  ;;  %v1386_v14 = vsel %vm1384_vm9, %v1374_v30, 2102212464  ;;  %v10051_v20 = vld [vmem:[#allocation107_spill] sm:$0xff]  ;;  %p889_p4 = scmp.lt.s32.totalorder %s4783_s18, 7  ;;  %s6719_s11 = sshll.u32 %s6837_s9, 4  ;;  %s6720_s11 = int_to_ptr.vmem [resolvable:$false] %s6719_s11 }
 0x2a1   : > { %v1389_v46 = vsel %vm1381_vm7, %v1368_v52, %v1371_v12  ;;  %v1390_v36 = vsel %vm1384_vm9, %v1377_v54, 920167782  ;;  %v10038_v23 = vpack.c.bf16 %v8454_v13, %v8443_v27  ;;  %v10039_v45 = vpack.c.bf16 %v8458_v59, %v8456_v48  ;;  %p6722_p13 = scmp.lt.s32.totalorder %s9568_s7, %s6720_s11 }
 0x2a2   : > { %5454 = vmatpush1.bf16.msra.mxu0 %v10036_v3  ;;  %5518 = vmatpush1.bf16.msra.mxu1 %v10037_v43  ;;  %6294 = vsinq.f32 %v1231_v44  ;;  %v4807_v2 = vmin.u32 %v1518_v57, %v8794_v39  ;;  %v5527_v26 = vpack.c.bf16 %v8806_v16, %v8804_v15  ;;  %v8841_v4 = vmul.f32 %v10040_v28, %v916_v63  ;;  %v10054_v28 = vld [vmem:[#allocation40_spill] sm:$0xff]  ;;  %s10085_s18 = smov (!%p889_p4, %s4783_s18), 7 }
 0x2a3   : > { %5456 = vmatprep.subr.bf16.mxu0 %v10038_v23  ;;  %5520 = vmatprep.subr.bf16.mxu1 %v10039_v45  ;;  %v1385_v41 = vsel %vm1381_vm7, %v1365_v6, %v1368_v52  ;;  %v1387_v27 = vsel %vm1383_vm10, %v1371_v12, %v1386_v14  ;;  %v1391_v59 = vsel %vm1383_vm10, %v1374_v30, %v1390_v36  ;;  %v10041_v48 = vand.u32 2147483647, %v8355_v17  ;;  %v10050_v14 = vld [vmem:[#allocation108_spill] sm:$0xff]  ;;  %s4841_s13 = sshll.u32 %s10085_s18, 4  ;;  %s10067_s18 = sld [smem:[#allocation113_spill]] }
 0x2a4   : > { %v1393_v13 = vsel %vm1381_vm7, %v1371_v12, %v1374_v30  ;;  %v1520_v11 = vclz %v4807_v2  ;;  %v1392_v9 = vsel %vm1382_vm8, %v1389_v46, %v1391_v59  ;;  %v1394_v52 = vsel %vm1384_vm9, %v1380_v58, 1326507024  ;;  %s9113_s12 = scalar_lea.vmem %s10062_s21, %s4841_s13  ;;  %s10073_s13 = sld [smem:[#allocation125_spill]] }
 0x2a5   : > { %vm8853_vm12 = vcmp.le.f32.partialorder %v10041_v48, 0.7853982  ;;  %v5465_v62 = vpack.c.bf16 %v8829_v49, %v8827_v40  ;;  %v10044_v12 = vpack.c.bf16 %v8477_v47, %v8475_v56  ;;  %v10045_v38 = vpack.c.bf16 %v8517_v5, %v8515_v31  ;;  %v10047_v47 = vld [vmem:[#allocation106_spill] sm:$0xff]  ;;  %s6721_s21 = scalar_lea.vmem %s6720_s11, 1024 }
 0x2a6   : > { %vm1237_vm13 = vcmp.lt.s32.totalorder %v8745_v51, 2  ;;  %v1538_v6 = vsub.s32 4, %v8765_v25  ;;  %v1395_v18 = vsel %vm1383_vm10, %v1377_v54, %v1394_v52  ;;  %vm1235_vm14 = vweird.f32 %v8238_v55 }
 0x2a7   : > { %5458 = vmatpush1.bf16.msra.mxu0 %v10044_v12  ;;  %5522 = vmatpush1.bf16.msra.mxu1 %v10045_v38  ;;  %v8875_v30 = vmul.u32.u64.low %v8741_v50, %v1392_v9  ;;  %v8876_v15 = vmul.u32.u64.high %v8741_v50, %v1392_v9, %v8875_v30  ;;  %v10046_v56 = vpack.c.bf16 %v8527_v34, %v8523_v8  ;;  %v10048_v31 = vpack.c.bf16 %v8535_v22, %v10047_v47  ;;  %v10049_v8 = vld [vmem:[#allocation38_spill] sm:$0xff] }
 0x2a8   : > { %v4808_v5 = vadd.s32 4294967294, %v1520_v11  ;;  %v1388_v16 = vsel %vm1382_vm8, %v1385_v41, %v1387_v27  ;;  %v1396_v54 = vsel %vm1382_vm8, %v1393_v13, %v1395_v18  ;;  %v1661_v63 = vand.u32 2139095040, %v8841_v4 }
 0x2a9   : > { %5460 = vmatprep.subr.bf16.mxu0 %v10046_v56  ;;  %5524 = vmatprep.subr.bf16.mxu1 %v10048_v31  ;;  %v8892_v44 = vmul.u32.u64.low %v8741_v50, %v1396_v54  ;;  %v8893_v57 = vmul.u32.u64.high %v8741_v50, %v1396_v54, %v8892_v44  ;;  %v5529_v58 = vpack.c.bf16 %v2143_v53, %v2139_v21  ;;  %v8896_v34 = vmul.f32 %v10049_v8, %v915_v7 }
 0x2aa   : > { %v1508_v22 = vadd.s32 %v8679_v0, %v8696_v37  ;;  %vm4809_vm15 = vcmp.lt.s32.totalorder %v4808_v5, 0  ;;  %v1658_v3 = vand.u32 2147483647, %v8841_v4  ;;  %v1662_v43 = vshrl.u32 %v1661_v63, 23 }
 0x2ab   : > { %v10052_v46 = vpack.c.bf16 %v10050_v14, %v10051_v20  ;;  %v10053_v36 = vpack.c.bf16 %v8692_v61, %v8690_v29  ;;  %v1523_v40 = vsel %vm4809_vm15, 0, %v4808_v5  ;;  %v1539_v49 = vsel %vm1454_vm11, %v1538_v6, %v8765_v25  ;;  %v6293_v61 = vpop.eup %6292 }
 0x2ac   : > { %v1404_v23 = vmul.u32 %v8741_v50, %v1388_v16  ;;  %v1407_v0 = vadd.s32 1, %v8876_v15  ;;  %v1524_v37 = vsub.s32 32, %v1523_v40  ;;  %v1525_v45 = vshll.u32 %v8794_v39, %v1523_v40  ;;  %v6295_v25 = vpop.eup %6294 }
 0x2ad   : > { %5462 = vmatpush1.bf16.msra.mxu0 %v10052_v46  ;;  %5526 = vmatpush1.bf16.msra.mxu1 %v10053_v36  ;;  %v1528_v2 = vsub.s32 4294967266, %v1523_v40  ;;  %v10055_v41 = vpack.c.bf16 %v8719_v24, %v10054_v28  ;;  %v4814_v29 = vadd.s32 4294967169, %v1662_v43  ;;  %vm1238_vm0 = vcmp.eq.s32.totalorder %v8745_v51, 0 }
 0x2ae   : > { %5528 = vmatprep.subr.bf16.mxu1 %v5527_v26  ;;  %vm1241_vm1 = vcmp.eq.s32.totalorder %v8745_v51, 2  ;;  %vm1406_vm2 = vc.u32 %v8893_v57, %v8875_v30  ;;  %v1558_v50 = vand.u32 2139095040, %v8896_v34  ;;  %v1242_v27 = vxor.u32 2147483648, %v6293_v61 }
 0x2af   : > { %5464 = vmatprep.subr.bf16.mxu0 %v10055_v41  ;;  %v1526_v39 = vshrl.u32 %v1508_v22, %v1524_v37  ;;  %v1529_v59 = vadd.s32 127, %v1528_v2  ;;  %v1408_v13 = vsel %vm1406_vm2, %v1407_v0, %v8876_v15  ;;  %v1239_v24 = vxor.u32 2147483648, %v6295_v25 }
 0x2b0   : > { %v1541_v26 = vsel %vm8853_vm12, 0, %v1539_v49  ;;  %v1409_v48 = vadd.s32 %v1408_v13, %v1404_v23  ;;  %v1668_v11 = vadd.s32 1, %v4814_v29  ;;  %v1243_v9 = vsel %vm1241_vm1, %v1242_v27, %v6295_v25 }
 0x2b1   : > { %5466 = vmatpush1.bf16.msra.mxu0 %v5465_v62  ;;  %5530 = vmatpush1.bf16.msra.mxu1 %v5529_v58  ;;  %v1527_v52 = vor.u32 %v1526_v39, %v1525_v45  ;;  %v1530_v21 = vshll.u32 %v1529_v59, 23  ;;  %v1665_v53 = vand.u32 8388607, %v1658_v3  ;;  %v1240_v7 = vsel %vm1238_vm0, %v6293_v61, %v1239_v24 }
 0x2b2   : > { %v1410_v12 = vadd.s32 536870912, %v1409_v48  ;;  %vm1669_vm3 = vcmp.gt.s32.totalorder %v1668_v11, 0  ;;  %v1559_v38 = vshrl.u32 %v1558_v50, 23  ;;  %v1244_v6 = vsel %vm1237_vm13, %v1240_v7, %v1243_v9 }
 0x2b3   : > { %v1531_v18 = vor.u32 4788187, %v1530_v21  ;;  %v1534_v15 = vcvt.s32.f32 %v1527_v52  ;;  %v1670_v62 = vsel %vm1669_vm3, %v1668_v11, 0  ;;  %v8932_v56 = vsel %vm1235_vm14, nan, %v1244_v6 }
 0x2b4   : > { %v8934_v47 = vshrl.u32 %v1410_v12, 30  ;;  %v1672_v31 = vand.u32 31, %v1670_v62  ;;  %2352 = vmatmul.mubr.f32.gmra.mrb[10].mxu0 %v8932_v56  ;;  %2441 = vmatmul.mubr.f32.gmra.mrb[10].mxu1 %v8932_v56  ;;  %v8938_v16 = vand.u32 3, %v1541_v26  ;;  %v1666_v54 = vor.u32 8388608, %v1665_v53  ;;  %v10056_v12 = vld [vmem:[#allocation105_spill] sm:$0xff] }
 0x2b5   : > { %v1532_v5 = vand.u32 2147483647, %v1531_v18  ;;  %v1555_v44 = vand.u32 2147483647, %v8896_v34  ;;  %v8944_v55 = vadd.s32 %v8875_v30, %v8893_v57  ;;  %v4810_v22 = vadd.s32 4294967169, %v1559_v38 }
 0x2b6   : > { %v1412_v51 = vshll.u32 %v8934_v47, 30  ;;  %v1673_v63 = vsub.s32 32, %v1672_v31  ;;  %v1675_v8 = vshll.u32 %v9904_v1, %v1672_v31  ;;  %v1678_v20 = vshll.u32 %v9905_v42, %v1672_v31 }
 0x2b7   : > { %v1535_v58 = vmul.f32 %v1534_v15, %v1532_v5  ;;  %v1681_v46 = vshll.u32 %v9906_v32, %v1672_v31  ;;  %v1684_v23 = vshll.u32 %v9907_v33, %v1672_v31  ;;  %v1671_v57 = vshrl.u32 %v1670_v62, 5 }
 0x2b8   : > { %v8947_v43 = vsub.s32 %v1409_v48, %v1412_v51  ;;  %v1676_v14 = vshrl.u32 %v9905_v42, %v1673_v63  ;;  %v1679_v40 = vshrl.u32 %v9906_v32, %v1673_v63  ;;  %v1682_v49 = vshrl.u32 %v9907_v33, %v1673_v63  ;;  %v2146_v51 = vld [vmem:[#allocation7 + $0x3c8] sm:$0xff] }
 0x2b9   : > { %v1536_v36 = vxor.u32 2147483648, %v1535_v58  ;;  %v1685_v0 = vshrl.u32 %v9908_v35, %v1673_v63  ;;  %v8957_v37 = vshll.u32 %v1666_v54, 8  ;;  %v1674_v2 = vshrl.u32 %v9904_v1, %v1673_v63  ;;  %v2150_v54 = vld [vmem:[#allocation7 + $0x3e8] sm:$0xff] }
 0x2ba   : > { %v1415_v30 = vsub.s32 0, %v8947_v43  ;;  %v1687_v28 = vshll.u32 %v9908_v35, %v1672_v31  ;;  %v1565_v41 = vadd.s32 1, %v4810_v22  ;;  %v1677_v50 = vor.u32 %v1676_v14, %v1675_v8  ;;  %v2148_v14 = vld [vmem:[#allocation7 + $0x3d8] sm:$0xff] }
 0x2bb   : > { %v1537_v45 = vsel %vm1454_vm11, %v1536_v36, %v1535_v58  ;;  %v1680_v25 = vor.u32 %v1679_v40, %v1678_v20  ;;  %v1683_v27 = vor.u32 %v1682_v49, %v1681_v46  ;;  %v1686_v39 = vor.u32 %v1685_v0, %v1684_v23  ;;  %v2152_v20 = vld [vmem:[#allocation7 + $0x3f8] sm:$0xff] }
 0x2bc   : > { %v1540_v29 = vsel %vm8853_vm12, %v8355_v17, %v1537_v45  ;;  %v4803_v61 = vmin.u32 %v1415_v30, %v8947_v43  ;;  %v1688_v59 = vshrl.u32 %v9961_v60, %v1673_v63  ;;  %vm1690_vm4 = vcmp.lt.s32.totalorder %v1671_v57, 1  ;;  %v2145_v30 = vld [vmem:[#allocation7 + $0x3c0] sm:$0xff] }
 0x2bd   : > { %6296 = vcosq.f32 %v1540_v29  ;;  %vm1691_vm5 = vcmp.lt.s32.totalorder %v1671_v57, 2  ;;  %vm1550_vm6 = vcmp.eq.s32.totalorder %v8938_v16, 2  ;;  %vm1692_vm7 = vcmp.lt.s32.totalorder %v1671_v57, 3 }
 0x2be   : > { %6298 = vsinq.f32 %v1540_v29  ;;  %v1417_v13 = vclz %v4803_v61  ;;  %v1689_v24 = vor.u32 %v1688_v59, %v1687_v28  ;;  %vm1693_vm8 = vcmp.lt.s32.totalorder %v1671_v57, 4 }
 0x2bf   : > { %v1694_v19 = vsel %vm1690_vm4, %v1674_v2, %v1677_v50  ;;  %vm1547_vm9 = vcmp.eq.s32.totalorder %v8938_v16, 0  ;;  %v1695_v48 = vsel %vm1693_vm8, %v1683_v27, 2102212464  ;;  %v1698_v11 = vsel %vm1690_vm4, %v1677_v50, %v1680_v25 }
 0x2c0   : > { %v4804_v26 = vadd.s32 4294967294, %v1417_v13  ;;  %v1699_v9 = vsel %vm1693_vm8, %v1686_v39, 920167782  ;;  %v1696_v52 = vsel %vm1692_vm7, %v1680_v25, %v1695_v48  ;;  %v1702_v53 = vsel %vm1690_vm4, %v1680_v25, %v1683_v27 }
 0x2c1   : > { %v1700_v21 = vsel %vm1692_vm7, %v1683_v27, %v1699_v9  ;;  %v1703_v7 = vsel %vm1693_vm8, %v1689_v24, 1326507024  ;;  %vm1544_vm11 = vweird.f32 %v8355_v17  ;;  %vm1351_vm10 = vcmp.lt.s32.totalorder %v10056_v12, 0 }
 0x2c2   : > { %vm4805_vm12 = vcmp.lt.s32.totalorder %v4804_v26, 0  ;;  %v1701_v38 = vsel %vm1691_vm5, %v1698_v11, %v1700_v21  ;;  %v1704_v6 = vsel %vm1692_vm7, %v1686_v39, %v1703_v7  ;;  %v8978_v18 = vand.u32 8388607, %v1555_v44 }
 0x2c3   : > { %v1420_v15 = vsel %vm4805_vm12, 0, %v4804_v26  ;;  %v1705_v62 = vsel %vm1691_vm5, %v1702_v53, %v1704_v6  ;;  %v8982_v31 = vmul.u32.u64.low %v8957_v37, %v1701_v38  ;;  %v8983_v5 = vmul.u32.u64.high %v8957_v37, %v1701_v38, %v8982_v31 }
 0x2c4   : > { %v1421_v63 = vsub.s32 32, %v1420_v15  ;;  %v1422_v58 = vshll.u32 %v8947_v43, %v1420_v15  ;;  %v1425_v8 = vsub.s32 4294967266, %v1420_v15  ;;  %v1697_v22 = vsel %vm1691_vm5, %v1694_v19, %v1696_v52  ;;  %v2149_v43 = vld [vmem:[#allocation7 + $0x3e0] sm:$0xff] }
 0x2c5   : > { %v10057_v46 = vand.u32 2147483647, %v10056_v12  ;;  %v1435_v40 = vsub.s32 4, %v8934_v47  ;;  %v8996_v49 = vmul.u32.u64.low %v8957_v37, %v1705_v62  ;;  %v8997_v23 = vmul.u32.u64.high %v8957_v37, %v1705_v62, %v8996_v49 }
 0x2c6   : > { %vm1566_vm14 = vcmp.gt.s32.totalorder %v1565_v41, 0  ;;  %v1423_v57 = vshrl.u32 %v8944_v55, %v1421_v63  ;;  %v1426_v0 = vadd.s32 127, %v1425_v8  ;;  %v5467_v2 = vpack.c.bf16 %v2150_v54, %v2146_v51 }
 0x2c7   : > { %vm8990_vm13 = vcmp.le.f32.partialorder %v10057_v46, 0.7853982  ;;  %v1567_v45 = vsel %vm1566_vm14, %v1565_v41, 0  ;;  %v6297_v28 = vpop.eup %6296  ;;  %v1713_v29 = vmul.u32 %v8957_v37, %v1697_v22  ;;  %v1716_v61 = vadd.s32 1, %v8983_v5 }
 0x2c8   : > { %v1569_v50 = vand.u32 31, %v1567_v45  ;;  %v5531_v25 = vpack.c.bf16 %v2152_v20, %v2148_v14  ;;  %v6299_v27 = vpop.eup %6298  ;;  %v1551_v39 = vxor.u32 2147483648, %v6297_v28  ;;  %v1424_v59 = vor.u32 %v1423_v57, %v1422_v58  ;;  %5468 = vmatprep.subr.bf16.mxu0 %v5467_v2 }
 0x2c9   : > { %v1427_v13 = vshll.u32 %v1426_v0, 23  ;;  %v5469_v24 = vpack.c.bf16 %v2149_v43, %v2145_v30  ;;  %vm1546_vm15 = vcmp.lt.s32.totalorder %v8938_v16, 2  ;;  %v1548_v19 = vxor.u32 2147483648, %v6299_v27 }
 0x2ca   : > { %vm1715_vm0 = vc.u32 %v8997_v23, %v8982_v31  ;;  %v1570_v55 = vsub.s32 32, %v1569_v50  ;;  %5532 = vmatprep.subr.bf16.mxu1 %v5531_v25  ;;  %v1552_v37 = vsel %vm1550_vm6, %v1551_v39, %v6299_v27  ;;  %v1431_v26 = vcvt.s32.f32 %v1424_v59  ;;  %v2804_v27 = vld [vmem:[#allocation13 + $0x8] sm:$0xff] }
 0x2cb   : > { %v1428_v41 = vor.u32 4788187, %v1427_v13  ;;  %v1717_v48 = vsel %vm1715_vm0, %v1716_v61, %v8983_v5  ;;  %5470 = vmatpush1.bf16.msra.mxu0 %v5469_v24  ;;  %v1549_v11 = vsel %vm1547_vm9, %v6297_v28, %v1548_v19  ;;  %v1436_v9 = vsel %vm1351_vm10, %v1435_v40, %v8934_v47  ;;  %v2147_v28 = vld [vmem:[#allocation7 + $0x3d0] sm:$0xff] }
 0x2cc   : > { %v1718_v52 = vadd.s32 %v1717_v48, %v1713_v29  ;;  %v1563_v21 = vor.u32 8388608, %v8978_v18  ;;  %v1553_v53 = vsel %vm1546_vm15, %v1549_v11, %v1552_v37  ;;  %v1572_v38 = vshll.u32 %v9904_v1, %v1569_v50  ;;  %v2151_v29 = vld [vmem:[#allocation7 + $0x3f0] sm:$0xff] }
 0x2cd   : > { %v1429_v7 = vand.u32 2147483647, %v1428_v41  ;;  %v1573_v6 = vshrl.u32 %v9905_v42, %v1570_v55  ;;  %v9018_v15 = vsel %vm1544_vm11, nan, %v1553_v53  ;;  %v1575_v16 = vshll.u32 %v9905_v42, %v1569_v50  ;;  %v2808_v39 = vld [vmem:[#allocation13 + $0x28] sm:$0xff]  ;;  %v2806_v41 = vld [vmem:[#allocation13 + $0x18] sm:$0xff] }
 0x2ce   : > { %v1719_v62 = vadd.s32 536870912, %v1718_v52  ;;  %v1576_v5 = vshrl.u32 %v9906_v32, %v1570_v55  ;;  %2357 = vmatprep.mubr.f32.mxu0 %v9018_v15  ;;  %2446 = vmatprep.mubr.f32.mxu1 %v9018_v15  ;;  %v1438_v18 = vsel %vm8990_vm13, 0, %v1436_v9  ;;  %v1578_v51 = vshll.u32 %v9906_v32, %v1569_v50 }
 0x2cf   : > { %v1432_v47 = vmul.f32 %v1431_v26, %v1429_v7  ;;  %v1579_v54 = vshrl.u32 %v9907_v33, %v1570_v55  ;;  %v1568_v63 = vshrl.u32 %v1567_v45, 5  ;;  %v1581_v58 = vshll.u32 %v9907_v33, %v1569_v50  ;;  %v2810_v26 = vld [vmem:[#allocation13 + $0x38] sm:$0xff] }
 0x2d0   : > { %v9028_v17 = vshrl.u32 %v1719_v62, 30  ;;  %v1582_v42 = vshrl.u32 %v9908_v35, %v1570_v55  ;;  %v1584_v22 = vshll.u32 %v9908_v35, %v1569_v50  ;;  %v1585_v14 = vshrl.u32 %v9961_v60, %v1570_v55 }
 0x2d1   : > { %v1433_v8 = vxor.u32 2147483648, %v1432_v47  ;;  %v9034_v20 = vshll.u32 %v1563_v21, 8  ;;  %v1571_v32 = vshrl.u32 %v9904_v1, %v1570_v55  ;;  %v1574_v40 = vor.u32 %v1573_v6, %v1572_v38 }
 0x2d2   : > { %v1721_v46 = vshll.u32 %v9028_v17, 30  ;;  %v1577_v49 = vor.u32 %v1576_v5, %v1575_v16  ;;  %v1580_v43 = vor.u32 %v1579_v54, %v1578_v51  ;;  %v1583_v33 = vor.u32 %v1582_v42, %v1581_v58 }
 0x2d3   : > { %v1434_v30 = vsel %vm1351_vm10, %v1433_v8, %v1432_v47  ;;  %v1586_v57 = vor.u32 %v1585_v14, %v1584_v22  ;;  %vm1587_vm1 = vcmp.lt.s32.totalorder %v1568_v63, 1  ;;  %vm1590_vm2 = vcmp.lt.s32.totalorder %v1568_v63, 4 }
 0x2d4   : > { %v1437_v35 = vsel %vm8990_vm13, %v10056_v12, %v1434_v30  ;;  %v9043_v0 = vsub.s32 %v1718_v52, %v1721_v46  ;;  %vm1588_vm3 = vcmp.lt.s32.totalorder %v1568_v63, 2  ;;  %vm1589_vm4 = vcmp.lt.s32.totalorder %v1568_v63, 3 }
 0x2d5   : > { %6300 = vcosq.f32 %v1437_v35  ;;  %v1592_v1 = vsel %vm1590_vm2, %v1580_v43, 2102212464  ;;  %v1591_v45 = vsel %vm1587_vm1, %v1571_v32, %v1574_v40  ;;  %v1595_v61 = vsel %vm1587_vm1, %v1574_v40, %v1577_v49 }
 0x2d6   : > { %6302 = vsinq.f32 %v1437_v35  ;;  %v1724_v60 = vsub.s32 0, %v9043_v0  ;;  %v1593_v2 = vsel %vm1589_vm4, %v1577_v49, %v1592_v1  ;;  %v1596_v50 = vsel %vm1590_vm2, %v1583_v33, 920167782 }
 0x2d7   : > { %v1599_v36 = vsel %vm1587_vm1, %v1577_v49, %v1580_v43  ;;  %v1600_v25 = vsel %vm1590_vm2, %v1586_v57, 1326507024  ;;  %v1442_v59 = vand.u32 3, %v1438_v18  ;;  %v1594_v24 = vsel %vm1588_vm3, %v1591_v45, %v1593_v2  ;;  %v2818_v2 = vld [vmem:[#allocation13 + $0x78] sm:$0xff] }
 0x2d8   : > { %v4815_v13 = vmin.u32 %v1724_v60, %v9043_v0  ;;  %v1597_v19 = vsel %vm1589_vm4, %v1580_v43, %v1596_v50  ;;  %v1601_v55 = vsel %vm1589_vm4, %v1583_v33, %v1600_v25  ;;  %v5533_v37 = vpack.c.bf16 %v2151_v29, %v2147_v28  ;;  %v9084_v50 = vpop.f32.mrb[0].mxu0 }
 0x2d9   : > { %v1598_v11 = vsel %vm1588_vm3, %v1595_v61, %v1597_v19  ;;  %v1602_v9 = vsel %vm1588_vm3, %v1599_v36, %v1601_v55  ;;  %v5535_v52 = vpack.c.bf16 %v2808_v39, %v2804_v27  ;;  %v5599_v62 = vpack.c.bf16 %v2810_v26, %v2806_v41  ;;  %v9086_v36 = vpop.f32.mrb[0].mxu1  ;;  %v9088_v25 = vpop.f32.mrb[1].mxu0 }
 0x2da   : > { %v1726_v48 = vclz %v4815_v13  ;;  %v9054_v21 = vmul.u32.u64.low %v9034_v20, %v1602_v9  ;;  %v9055_v53 = vmul.u32.u64.high %v9034_v20, %v1602_v9, %v9054_v21  ;;  %5534 = vmatpush1.bf16.msra.mxu1 %v5533_v37  ;;  %vm1444_vm5 = vcmp.eq.s32.totalorder %v1442_v59, 0 }
 0x2db   : > { %v9058_v7 = vmul.u32.u64.low %v9034_v20, %v1598_v11  ;;  %v9059_v38 = vmul.u32.u64.high %v9034_v20, %v1598_v11, %v9058_v7  ;;  %5536 = vmatprep.subr.bf16.mxu0 %v5535_v52  ;;  %v1714_v16 = vadd.s32 %v8982_v31, %v8997_v23  ;;  %v1610_v5 = vmul.u32 %v9034_v20, %v1594_v24  ;;  %5600 = vmatprep.subr.bf16.mxu1 %v5599_v62 }
 0x2dc   : > { %v4816_v6 = vadd.s32 4294967294, %v1726_v48  ;;  %vm1447_vm7 = vcmp.eq.s32.totalorder %v1442_v59, 2  ;;  %vm1441_vm9 = vweird.f32 %v10056_v12  ;;  %vm1443_vm11 = vcmp.lt.s32.totalorder %v1442_v59, 2  ;;  %v9090_v59 = vpop.f32.mrb[1].mxu1 }
 0x2dd   : > { %vm1612_vm8 = vc.u32 %v9055_v53, %v9058_v7  ;;  %v1613_v51 = vadd.s32 1, %v9059_v38  ;;  %vm1660_vm10 = vcmp.lt.s32.totalorder %v8841_v4, 0  ;;  %vm9079_vm12 = vcmp.le.f32.partialorder %v1658_v3, 0.7853982 }
 0x2de   : > { %vm4817_vm6 = vcmp.lt.s32.totalorder %v4816_v6, 0  ;;  %v1744_v29 = vsub.s32 4, %v9028_v17  ;;  %v1611_v37 = vadd.s32 %v9058_v7, %v9055_v53  ;;  %vm1750_vm1 = vweird.f32 %v8841_v4 }
 0x2df   : > { %v6301_v47 = vpop.eup %6300  ;;  %v1729_v18 = vsel %vm4817_vm6, 0, %v4816_v6  ;;  %v1614_v23 = vsel %vm1612_vm8, %v1613_v51, %v9059_v38  ;;  %vm1557_vm2 = vcmp.lt.s32.totalorder %v8896_v34, 0  ;;  %vm1556_vm3 = vcmp.le.f32.partialorder %v1555_v44, 0.7853982 }
 0x2e0   : > { %v6303_v54 = vpop.eup %6302  ;;  %v1448_v63 = vxor.u32 2147483648, %v6301_v47  ;;  %v1730_v58 = vsub.s32 32, %v1729_v18  ;;  %v1731_v42 = vshll.u32 %v9043_v0, %v1729_v18  ;;  %v1734_v8 = vsub.s32 4294967266, %v1729_v18 }
 0x2e1   : > { %v1445_v31 = vxor.u32 2147483648, %v6303_v54  ;;  %v1615_v46 = vadd.s32 %v1614_v23, %v1610_v5  ;;  %v1745_v13 = vsel %vm1660_vm10, %v1744_v29, %v9028_v17  ;;  %vm3587_vm8 = vcmask 261120  }
 0x2e2   : > { %v1449_v22 = vsel %vm1447_vm7, %v1448_v63, %v6303_v54  ;;  %v1732_v14 = vshrl.u32 %v1714_v16, %v1730_v58  ;;  %v1735_v20 = vadd.s32 127, %v1734_v8  ;;  %v1747_v55 = vsel %vm9079_vm12, 0, %v1745_v13  ;;  %v2817_v13 = vld [vmem:[#allocation13 + $0x70] sm:$0xff] }
 0x2e3   : > { %v1446_v32 = vsel %vm1444_vm5, %v6301_v47, %v1445_v31  ;;  %v1616_v43 = vadd.s32 536870912, %v1615_v46  ;;  %v1751_v26 = vand.u32 3, %v1747_v55  ;;  %vm1647_vm7 = vweird.f32 %v8896_v34 }
 0x2e4   : > { %v1450_v40 = vsel %vm1443_vm11, %v1446_v32, %v1449_v22  ;;  %v1733_v49 = vor.u32 %v1732_v14, %v1731_v42  ;;  %v1736_v30 = vshll.u32 %v1735_v20, 23 }
 0x2e5   : > { %v9072_v33 = vsel %vm1441_vm9, nan, %v1450_v40  ;;  %v1617_v35 = vshrl.u32 %v1616_v43, 30  ;;  %vm1756_vm14 = vcmp.eq.s32.totalorder %v1751_v26, 2  ;;  %vm1753_vm15 = vcmp.eq.s32.totalorder %v1751_v26, 0  ;;  %v2803_v43 = vld [vmem:[#allocation13] sm:$0xff] }
 0x2e6   : > { %2358 = vmatmul.mubr.f32.gmra.mrb[12].mxu0 %v9072_v33  ;;  %2447 = vmatmul.mubr.f32.gmra.mrb[12].mxu1 %v9072_v33  ;;  %v1737_v12 = vor.u32 4788187, %v1736_v30  ;;  %v1740_v57 = vcvt.s32.f32 %v1733_v49  ;;  %vm1752_vm0 = vcmp.lt.s32.totalorder %v1751_v26, 2  ;;  %v9117_v30 = vld [vmem:[%s9113_s12 + $0x8] sm:$0xff]  ;;  %v2822_v26 = vld [vmem:[#allocation13 + $0x98] sm:$0xff] }
 0x2e7   : > { %v1618_v1 = vshll.u32 %v1617_v35, 30  ;;  %v1641_v8 = vsub.s32 4, %v1617_v35 }
 0x2e8   : > { %v1738_v0 = vand.u32 2147483647, %v1737_v12 }
 0x2e9   : > { %v1619_v45 = vsub.s32 %v1615_v46, %v1618_v1  ;;  %v1642_v23 = vsel %vm1557_vm2, %v1641_v8, %v1617_v35  ;;  %v2805_v35 = vld [vmem:[#allocation13 + $0x10] sm:$0xff] }
 0x2ea   : > { %v1741_v60 = vmul.f32 %v1740_v57, %v1738_v0  ;;  %v1644_v22 = vsel %vm1556_vm3, 0, %v1642_v23  ;;  %v2807_v57 = vld [vmem:[#allocation13 + $0x20] sm:$0xff]  ;;  %v2809_v0 = vld [vmem:[#allocation13 + $0x30] sm:$0xff]  ;;  %v2830_v23 = vld [vmem:[#allocation13 + $0xd8] sm:$0xff] }
 0x2eb   : > { %v1621_v61 = vsub.s32 0, %v1619_v45  ;;  %v1648_v14 = vand.u32 3, %v1644_v22  ;;  %v5537_v29 = vpack.c.bf16 %v2807_v57, %v2803_v43  ;;  %v2834_v22 = vld [vmem:[#allocation13 + $0xf8] sm:$0xff]  ;;  %v2829_v57 = vld [vmem:[#allocation13 + $0xd0] sm:$0xff] }
 0x2ec   : > { %v1742_v28 = vxor.u32 2147483648, %v1741_v60 }
 0x2ed   : > { %v4811_v39 = vmin.u32 %v1621_v61, %v1619_v45  ;;  %vm1653_vm4 = vcmp.eq.s32.totalorder %v1648_v14, 2  ;;  %vm1650_vm5 = vcmp.eq.s32.totalorder %v1648_v14, 0  ;;  %vm1649_vm6 = vcmp.lt.s32.totalorder %v1648_v14, 2 }
 0x2ee   : > { %v1743_v27 = vsel %vm1660_vm10, %v1742_v28, %v1741_v60  ;;  %v2812_v60 = vld [vmem:[#allocation13 + $0x48] sm:$0xff]  ;;  %v901_v28 = vld [vmem:[%s9113_s12] sm:$0xff]  ;;  %v5601_v61 = vpack.c.bf16 %v2809_v0, %v2805_v35  ;;  %v2833_v35 = vld [vmem:[#allocation13 + $0xf0] sm:$0xff] }
 0x2ef   : > { %v1746_v3 = vsel %vm9079_vm12, %v8841_v4, %v1743_v27  ;;  %v1623_v24 = vclz %v4811_v39  ;;  %v2811_v27 = vld [vmem:[#allocation13 + $0x40] sm:$0xff]  ;;  %v2836_v0 = vld [vmem:[#allocation13 + $0x108] sm:$0xff] }
 0x2f0   : > { %6304 = vcosq.f32 %v1746_v3  ;;  %v2815_v39 = vld [vmem:[#allocation13 + $0x60] sm:$0xff] }
 0x2f1   : > { %6306 = vsinq.f32 %v1746_v3  ;;  %v4812_v19 = vadd.s32 4294967294, %v1623_v24  ;;  %v2813_v3 = vld [vmem:[#allocation13 + $0x50] sm:$0xff] }
 0x2f2   : > { %v904_v24 = vld [vmem:[%s9113_s12 + $0x18] sm:$0xff] }
 0x2f3   : > { %vm4813_vm13 = vcmp.lt.s32.totalorder %v4812_v19, 0 }
 0x2f4   : > { %v1626_v41 = vsel %vm4813_vm13, 0, %v4812_v19 }
 0x2f5   : > { %v1627_v48 = vsub.s32 32, %v1626_v41  ;;  %v1628_v11 = vshll.u32 %v1619_v45, %v1626_v41  ;;  %v1631_v9 = vsub.s32 4294967266, %v1626_v41  ;;  %v2816_v45 = vld [vmem:[#allocation13 + $0x68] sm:$0xff] }
 0x2f6   : > { %v5539_v19 = vpack.c.bf16 %v2816_v45, %v2812_v60  ;;  %v2824_v41 = vld [vmem:[#allocation13 + $0xa8] sm:$0xff]  ;;  %v5611_v45 = vpack.c.bf16 %v2834_v22, %v2830_v23 }
 0x2f7   : > { %v1629_v52 = vshrl.u32 %v1611_v37, %v1627_v48  ;;  %v1632_v21 = vadd.s32 127, %v1631_v9  ;;  %v2820_v37 = vld [vmem:[#allocation13 + $0x88] sm:$0xff]  ;;  %v2826_v48 = vld [vmem:[#allocation13 + $0xb8] sm:$0xff]  ;;  %v9129_v9 = vpop.f32.mrb[2].mxu1 }
 0x2f9   : > { %v1630_v17 = vor.u32 %v1629_v52, %v1628_v11  ;;  %v1633_v6 = vshll.u32 %v1632_v21, 23  ;;  %v9127_v11 = vpop.f32.mrb[2].mxu0  ;;  %v903_v52 = vld [vmem:[%s9113_s12 + $0x10] sm:$0xff]  ;;  %v5541_v21 = vpack.c.bf16 %v2815_v39, %v2811_v27  ;;  %v5613_v27 = vpack.c.bf16 %v2833_v35, %v2829_v57  ;;  %v2835_v39 = vld [vmem:[#allocation13 + $0x100] sm:$0xff] }
 0x2fa   : > { %v6305_v38 = vpop.eup %6304  ;;  %v2857_v57 = vld [vmem:[#allocation13 + $0x1b0] sm:$0xff]  ;;  %v2860_v35 = vld [vmem:[#allocation13 + $0x1c8] sm:$0xff] }
 0x2fb   : > { %v6307_v62 = vpop.eup %6306  ;;  %v1757_v16 = vxor.u32 2147483648, %v6305_v38  ;;  %v1634_v47 = vor.u32 4788187, %v1633_v6  ;;  %v1637_v53 = vcvt.s32.f32 %v1630_v17  ;;  %v2819_v17 = vld [vmem:[#allocation13 + $0x80] sm:$0xff]  ;;  %v9132_v6 = vpop.f32.mrb[3].mxu0 }
 0x2fc   : > { %v1754_v5 = vxor.u32 2147483648, %v6307_v62 }
 0x2fd   : > { %v1758_v7 = vsel %vm1756_vm14, %v1757_v16, %v6307_v62  ;;  %v1635_v51 = vand.u32 2147483647, %v1634_v47  ;;  %v9134_v62 = vpop.f32.mrb[3].mxu1  ;;  %v2823_v16 = vld [vmem:[#allocation13 + $0xa0] sm:$0xff]  ;;  %v2825_v47 = vld [vmem:[#allocation13 + $0xb0] sm:$0xff] }
 0x2fe   : > { %v1755_v18 = vsel %vm1753_vm15, %v6305_v38, %v1754_v5  ;;  %v5605_v38 = vpack.c.bf16 %v2817_v13, %v2813_v3  ;;  %v2821_v5 = vld [vmem:[#allocation13 + $0x90] sm:$0xff]  ;;  %v2839_v3 = vld [vmem:[#allocation13 + $0x120] sm:$0xff] }
 0x2ff   : > { %v1759_v54 = vsel %vm1752_vm0, %v1755_v18, %v1758_v7  ;;  %v1638_v58 = vmul.f32 %v1637_v53, %v1635_v51  ;;  %v9136_v53 = vpop.f32.mrb[4].mxu0  ;;  %v9138_v7 = vpop.f32.mrb[4].mxu1  ;;  %v906_v18 = vld [vmem:[%s9113_s12 + $0x28] sm:$0xff]  ;;  %v905_v51 = vld [vmem:[%s9113_s12 + $0x20] sm:$0xff] }
 0x300   : > { %v9101_v63 = vsel %vm1750_vm1, nan, %v1759_v54  ;;  %v5543_v54 = vpack.c.bf16 %v2824_v41, %v2820_v37  ;;  %v9142_v8 = vpop.f32.mrb[5].mxu0  ;;  %v2844_v37 = vld [vmem:[#allocation13 + $0x148] sm:$0xff] }
 0x301   : > { %2363 = vmatprep.mubr.f32.mxu0 %v9101_v63  ;;  %2452 = vmatprep.mubr.f32.mxu1 %v9101_v63  ;;  %v1639_v42 = vxor.u32 2147483648, %v1638_v58  ;;  %v9146_v14 = vpop.f32.mrb[6].mxu0  ;;  %v2848_v41 = vld [vmem:[#allocation13 + $0x168] sm:$0xff] }
 0x302   : > { %v9151_v43 = vpop.f32.mrb[7].mxu0 }
 0x303   : > { %v1640_v4 = vsel %vm1557_vm2, %v1639_v42, %v1638_v58  ;;  %v5607_v58 = vpack.c.bf16 %v2826_v48, %v2822_v26  ;;  %v2828_v42 = vld [vmem:[#allocation13 + $0xc8] sm:$0xff]  ;;  %v2846_v26 = vld [vmem:[#allocation13 + $0x158] sm:$0xff] }
 0x304   : > { %v1643_v31 = vsel %vm1556_vm3, %v8896_v34, %v1640_v4  ;;  %v2814_v34 = vld [vmem:[#allocation13 + $0x58] sm:$0xff]  ;;  %v9144_v4 = vpop.f32.mrb[5].mxu1 }
 0x305   : > { %6308 = vcosq.f32 %v1643_v31  ;;  %v5603_v55 = vpack.c.bf16 %v2818_v2, %v2814_v34  ;;  %v2840_v34 = vld [vmem:[#allocation13 + $0x128] sm:$0xff]  ;;  %v2838_v2 = vld [vmem:[#allocation13 + $0x118] sm:$0xff] }
 0x306   : > { %6310 = vsinq.f32 %v1643_v31  ;;  %v2832_v31 = vld [vmem:[#allocation13 + $0xe8] sm:$0xff]  ;;  %v5551_v13 = vpack.c.bf16 %v2840_v34, %v2836_v0  ;;  %v2850_v48 = vld [vmem:[#allocation13 + $0x178] sm:$0xff] }
 0x307   : > { %v5547_v60 = vpack.c.bf16 %v2832_v31, %v2828_v42  ;;  %v2858_v42 = vld [vmem:[#allocation13 + $0x1b8] sm:$0xff]  ;;  %v10063_v31 = vld [vmem:[#allocation103_spill] sm:$0xff] }
 0x308   : > { %v2864_v0 = vld [vmem:[#allocation13 + $0x1e8] sm:$0xff] }
 0x30f   : > { %v6309_v20 = vpop.eup %6308 }
 0x310   : > { %v6311_v46 = vpop.eup %6310  ;;  %v1654_v32 = vxor.u32 2147483648, %v6309_v20 }
 0x311   : > { %v1651_v44 = vxor.u32 2147483648, %v6311_v46 }
 0x312   : > { %v1655_v40 = vsel %vm1653_vm4, %v1654_v32, %v6311_v46  ;;  %v5545_v46 = vpack.c.bf16 %v2823_v16, %v2819_v17  ;;  %v5609_v32 = vpack.c.bf16 %v2825_v47, %v2821_v5  ;;  %v2847_v17 = vld [vmem:[#allocation13 + $0x160] sm:$0xff]  ;;  %v5555_v16 = vpack.c.bf16 %v2848_v41, %v2844_v37  ;;  %v2845_v47 = vld [vmem:[#allocation13 + $0x150] sm:$0xff] }
 0x313   : > { %v1652_v49 = vsel %vm1650_vm5, %v6309_v20, %v1651_v44  ;;  %v9148_v20 = vpop.f32.mrb[6].mxu1  ;;  %v908_v44 = vld [vmem:[%s9113_s12 + $0x38] sm:$0xff]  ;;  %v5619_v5 = vpack.c.bf16 %v2850_v48, %v2846_v26  ;;  %v2867_v26 = vld [vmem:[#allocation13 + $0x200] sm:$0xff] }
 0x314   : > { %v1656_v12 = vsel %vm1649_vm6, %v1652_v49, %v1655_v40  ;;  %v2827_v40 = vld [vmem:[#allocation13 + $0xc0] sm:$0xff] }
 0x315   : > { %v9119_v1 = vsel %vm1647_vm7, nan, %v1656_v12  ;;  %v2831_v49 = vld [vmem:[#allocation13 + $0xe0] sm:$0xff]  ;;  %v9153_v12 = vpop.f32.mrb[7].mxu1 }
 0x316   : > { %2364 = vmatmul.mubr.f32.gmra.mrb[14].mxu0 %v9119_v1  ;;  %2453 = vmatmul.mubr.f32.gmra.mrb[14].mxu1 %v9119_v1  ;;  %v2871_v48 = vld [vmem:[#allocation13 + $0x220] sm:$0xff] }
 0x317   : > { %2523 = vmatprep.mubr.f32.mxu0 %v9117_v30  ;;  %2612 = vmatprep.mubr.f32.mxu1 %v9117_v30 }
 0x31a   : > { %2524 = vmatmul.mubr.f32.vlgmr.msra.gmra.mrb[8].mxu0 %v901_v28  ;;  %2613 = vmatmul.mubr.f32.vlgmr.msra.gmra.mrb[8].mxu1 %v901_v28  ;;  %v2842_v28 = vld [vmem:[#allocation13 + $0x138] sm:$0xff] }
 0x31b   : > { %5538 = vmatpush1.bf16.msra.mxu0 %v5537_v29  ;;  %5602 = vmatpush1.bf16.msra.mxu1 %v5601_v61  ;;  %v907_v29 = vld [vmem:[%s9113_s12 + $0x30] sm:$0xff]  ;;  %v5549_v61 = vpack.c.bf16 %v2831_v49, %v2827_v40 }
 0x31c   : > { %2529 = vmatprep.mubr.f32.mxu0 %v904_v24  ;;  %2618 = vmatprep.mubr.f32.mxu1 %v904_v24  ;;  %v5615_v24 = vpack.c.bf16 %v2842_v28, %v2838_v2  ;;  %v2853_v49 = vld [vmem:[#allocation13 + $0x190] sm:$0xff]  ;;  %v2859_v28 = vld [vmem:[#allocation13 + $0x1c0] sm:$0xff] }
 0x31d   : > { %5540 = vmatprep.subr.bf16.mxu0 %v5539_v19  ;;  %5604 = vmatprep.subr.bf16.mxu1 %v5603_v55  ;;  %v2837_v19 = vld [vmem:[#allocation13 + $0x110] sm:$0xff]  ;;  %v5625_v2 = vpack.c.bf16 %v2857_v57, %v2853_v49  ;;  %v2890_v49 = vld [vmem:[#allocation13 + $0x2b8] sm:$0xff] }
 0x31e   : > { %2530 = vmatmul.mubr.f32.gmra.mrb[10].mxu0 %v903_v52  ;;  %2619 = vmatmul.mubr.f32.gmra.mrb[10].mxu1 %v903_v52  ;;  %v2841_v55 = vld [vmem:[#allocation13 + $0x130] sm:$0xff]  ;;  %v5553_v52 = vpack.c.bf16 %v2839_v3, %v2835_v39 }
 0x31f   : > { %5542 = vmatpush1.bf16.msra.mxu0 %v5541_v21  ;;  %5606 = vmatpush1.bf16.msra.mxu1 %v5605_v38  ;;  %v5617_v21 = vpack.c.bf16 %v2841_v55, %v2837_v19  ;;  %v2843_v38 = vld [vmem:[#allocation13 + $0x140] sm:$0xff]  ;;  %v2861_v39 = vld [vmem:[#allocation13 + $0x1d0] sm:$0xff]  ;;  %v2870_v19 = vld [vmem:[#allocation13 + $0x218] sm:$0xff] }
 0x320   : > { %2535 = vmatprep.mubr.f32.mxu0 %v906_v18  ;;  %2624 = vmatprep.mubr.f32.mxu1 %v906_v18  ;;  %v2849_v18 = vld [vmem:[#allocation13 + $0x170] sm:$0xff]  ;;  %v5557_v23 = vpack.c.bf16 %v2847_v17, %v2843_v38  ;;  %v2874_v55 = vld [vmem:[#allocation13 + $0x238] sm:$0xff] }
 0x321   : > { %5544 = vmatprep.subr.bf16.mxu0 %v5543_v54  ;;  %5608 = vmatprep.subr.bf16.mxu1 %v5607_v58  ;;  %v2856_v54 = vld [vmem:[#allocation13 + $0x1a8] sm:$0xff]  ;;  %v2854_v58 = vld [vmem:[#allocation13 + $0x198] sm:$0xff]  ;;  %v5621_v22 = vpack.c.bf16 %v2849_v18, %v2845_v47  ;;  %v2865_v3 = vld [vmem:[#allocation13 + $0x1f0] sm:$0xff] }
 0x322   : > { %2536 = vmatmul.mubr.f32.gmra.mrb[12].mxu0 %v905_v51  ;;  %2625 = vmatmul.mubr.f32.gmra.mrb[12].mxu1 %v905_v51  ;;  %v2852_v51 = vld [vmem:[#allocation13 + $0x188] sm:$0xff]  ;;  %v5623_v40 = vpack.c.bf16 %v2858_v42, %v2854_v58  ;;  %v5629_v41 = vpack.c.bf16 %v2865_v3, %v2861_v39  ;;  %v2869_v38 = vld [vmem:[#allocation13 + $0x210] sm:$0xff]  ;;  %v2878_v47 = vld [vmem:[#allocation13 + $0x258] sm:$0xff] }
 0x323   : > { %5546 = vmatpush1.bf16.msra.mxu0 %v5545_v46  ;;  %5610 = vmatpush1.bf16.msra.mxu1 %v5609_v32  ;;  %v2851_v46 = vld [vmem:[#allocation13 + $0x180] sm:$0xff]  ;;  %v2873_v17 = vld [vmem:[#allocation13 + $0x230] sm:$0xff]  ;;  %v2882_v18 = vld [vmem:[#allocation13 + $0x278] sm:$0xff] }
 0x324   : > { %2541 = vmatprep.mubr.f32.mxu0 %v908_v44  ;;  %2630 = vmatprep.mubr.f32.mxu1 %v908_v44  ;;  %v2855_v32 = vld [vmem:[#allocation13 + $0x1a0] sm:$0xff]  ;;  %v5559_v44 = vpack.c.bf16 %v2856_v54, %v2852_v51  ;;  %v5569_v51 = vpack.c.bf16 %v2871_v48, %v2867_v26  ;;  %v5633_v54 = vpack.c.bf16 %v2873_v17, %v2869_v38  ;;  %v2898_v39 = vld [vmem:[#allocation13 + $0x2f8] sm:$0xff]  ;;  %v2897_v26 = vld [vmem:[#allocation13 + $0x2f0] sm:$0xff] }
 0x325   : > { %5548 = vmatprep.subr.bf16.mxu0 %v5547_v60  ;;  %5612 = vmatprep.subr.bf16.mxu1 %v5611_v45  ;;  %v2862_v60 = vld [vmem:[#allocation13 + $0x1d8] sm:$0xff]  ;;  %v5561_v34 = vpack.c.bf16 %v2855_v32, %v2851_v46  ;;  %v2875_v58 = vld [vmem:[#allocation13 + $0x240] sm:$0xff]  ;;  %v2881_v46 = vld [vmem:[#allocation13 + $0x270] sm:$0xff] }
 0x326   : > { %2542 = vmatmul.mubr.f32.gmra.mrb[14].mxu0 %v907_v29  ;;  %2631 = vmatmul.mubr.f32.gmra.mrb[14].mxu1 %v907_v29  ;;  %v2866_v45 = vld [vmem:[#allocation13 + $0x1f8] sm:$0xff]  ;;  %v2863_v29 = vld [vmem:[#allocation13 + $0x1e0] sm:$0xff]  ;;  %v2884_v32 = vld [vmem:[#allocation13 + $0x288] sm:$0xff] }
 0x327   : > { %5550 = vmatpush1.bf16.msra.mxu0 %v5549_v61  ;;  %5614 = vmatpush1.bf16.msra.mxu1 %v5613_v27  ;;  %v5563_v61 = vpack.c.bf16 %v2864_v0, %v2860_v35  ;;  %v5627_v27 = vpack.c.bf16 %v2866_v45, %v2862_v60  ;;  %v5565_v37 = vpack.c.bf16 %v2863_v29, %v2859_v28  ;;  %v2879_v42 = vld [vmem:[#allocation13 + $0x260] sm:$0xff]  ;;  %v2889_v28 = vld [vmem:[#allocation13 + $0x2b0] sm:$0xff]  ;;  %v2892_v29 = vld [vmem:[#allocation13 + $0x2c8] sm:$0xff] }
 0x328   : > { %5552 = vmatprep.subr.bf16.mxu0 %v5551_v13  ;;  %5616 = vmatprep.subr.bf16.mxu1 %v5615_v24  ;;  %v2868_v13 = vld [vmem:[#allocation13 + $0x208] sm:$0xff]  ;;  %v5573_v57 = vpack.c.bf16 %v2879_v42, %v2875_v58  ;;  %v2883_v0 = vld [vmem:[#allocation13 + $0x280] sm:$0xff]  ;;  %v2906_v38 = vld [vmem:[#allocation13 + $0x338] sm:$0xff] }
 0x329   : > { %2995 = vmatprep.mubr.f32.mxu0 %v10063_v31  ;;  %3084 = vmatprep.mubr.f32.mxu1 %v10063_v31  ;;  %v2872_v24 = vld [vmem:[#allocation13 + $0x228] sm:$0xff]  ;;  %v2887_v60 = vld [vmem:[#allocation13 + $0x2a0] sm:$0xff]  ;;  %v2905_v58 = vld [vmem:[#allocation13 + $0x330] sm:$0xff] }
 0x32a   : > { %v5577_v3 = vpack.c.bf16 %v2887_v60, %v2883_v0  ;;  %v2900_v48 = vld [vmem:[#allocation13 + $0x308] sm:$0xff]  ;;  %v2913_v0 = vld [vmem:[#allocation13 + $0x370] sm:$0xff] }
 0x32b   : > { %5554 = vmatpush1.bf16.msra.mxu0 %v5553_v52  ;;  %5618 = vmatpush1.bf16.msra.mxu1 %v5617_v21  ;;  %v5567_v52 = vpack.c.bf16 %v2872_v24, %v2868_v13  ;;  %v5631_v21 = vpack.c.bf16 %v2874_v55, %v2870_v19  ;;  %v2891_v24 = vld [vmem:[#allocation13 + $0x2c0] sm:$0xff]  ;;  %v2908_v42 = vld [vmem:[#allocation13 + $0x348] sm:$0xff] }
 0x32c   : > { %5556 = vmatprep.subr.bf16.mxu0 %v5555_v16  ;;  %5620 = vmatprep.subr.bf16.mxu1 %v5619_v5  ;;  %v2876_v16 = vld [vmem:[#allocation13 + $0x248] sm:$0xff]  ;;  %v2895_v19 = vld [vmem:[#allocation13 + $0x2e0] sm:$0xff] }
 0x32d   : > { %v2880_v5 = vld [vmem:[#allocation13 + $0x268] sm:$0xff]  ;;  %v5581_v17 = vpack.c.bf16 %v2895_v19, %v2891_v24  ;;  %v2921_v24 = vld [vmem:[#allocation13 + $0x3b0] sm:$0xff] }
 0x32e   : > { %v5571_v31 = vpack.c.bf16 %v2880_v5, %v2876_v16  ;;  %v2899_v5 = vld [vmem:[#allocation13 + $0x300] sm:$0xff]  ;;  %v2916_v60 = vld [vmem:[#allocation13 + $0x388] sm:$0xff] }
 0x32f   : > { %5558 = vmatpush1.bf16.msra.mxu0 %v5557_v23  ;;  %5622 = vmatpush1.bf16.msra.mxu1 %v5621_v22  ;;  %v5635_v23 = vpack.c.bf16 %v2882_v18, %v2878_v47  ;;  %v2877_v22 = vld [vmem:[#allocation13 + $0x250] sm:$0xff]  ;;  %v2903_v47 = vld [vmem:[#allocation13 + $0x320] sm:$0xff]  ;;  %v2924_v19 = vld [vmem:[#allocation13 + $0x3c8] sm:$0xff] }
 0x330   : > { %5560 = vmatprep.subr.bf16.mxu0 %v5559_v44  ;;  %5624 = vmatprep.subr.bf16.mxu1 %v5623_v40  ;;  %v2888_v44 = vld [vmem:[#allocation13 + $0x2a8] sm:$0xff]  ;;  %v2886_v40 = vld [vmem:[#allocation13 + $0x298] sm:$0xff]  ;;  %v5637_v35 = vpack.c.bf16 %v2881_v46, %v2877_v22  ;;  %v5585_v46 = vpack.c.bf16 %v2903_v47, %v2899_v5  ;;  %v2929_v5 = vld [vmem:[#allocation13 + $0x3f0] sm:$0xff] }
 0x331   : > { %v5575_v45 = vpack.c.bf16 %v2888_v44, %v2884_v32  ;;  %v2914_v22 = vld [vmem:[#allocation13 + $0x378] sm:$0xff]  ;;  %v2907_v44 = vld [vmem:[#allocation13 + $0x340] sm:$0xff]  ;;  %v2676_v47 = vld [vmem:[#allocation11 + $0x8] sm:$0xff] }
 0x333   : > { %5562 = vmatpush1.bf16.msra.mxu0 %v5561_v34  ;;  %5626 = vmatpush1.bf16.msra.mxu1 %v5625_v2  ;;  %v5639_v34 = vpack.c.bf16 %v2890_v49, %v2886_v40  ;;  %v2885_v2 = vld [vmem:[#allocation13 + $0x290] sm:$0xff]  ;;  %v2911_v40 = vld [vmem:[#allocation13 + $0x360] sm:$0xff] }
 0x334   : > { %5564 = vmatprep.subr.bf16.mxu0 %v5563_v61  ;;  %5628 = vmatprep.subr.bf16.mxu1 %v5627_v27  ;;  %v2896_v61 = vld [vmem:[#allocation13 + $0x2e8] sm:$0xff]  ;;  %v2894_v27 = vld [vmem:[#allocation13 + $0x2d8] sm:$0xff]  ;;  %v5641_v13 = vpack.c.bf16 %v2889_v28, %v2885_v2  ;;  %v5589_v28 = vpack.c.bf16 %v2911_v40, %v2907_v44  ;;  %v2681_v44 = vld [vmem:[#allocation11 + $0x30] sm:$0xff] }
 0x335   : > { %v5579_v55 = vpack.c.bf16 %v2896_v61, %v2892_v29  ;;  %v2922_v2 = vld [vmem:[#allocation13 + $0x3b8] sm:$0xff]  ;;  %v2915_v61 = vld [vmem:[#allocation13 + $0x380] sm:$0xff]  ;;  %v2684_v40 = vld [vmem:[#allocation11 + $0x48] sm:$0xff] }
 0x337   : > { %5566 = vmatpush1.bf16.msra.mxu0 %v5565_v37  ;;  %5630 = vmatpush1.bf16.msra.mxu1 %v5629_v41  ;;  %v5643_v37 = vpack.c.bf16 %v2898_v39, %v2894_v27  ;;  %v2893_v41 = vld [vmem:[#allocation13 + $0x2d0] sm:$0xff]  ;;  %v2919_v27 = vld [vmem:[#allocation13 + $0x3a0] sm:$0xff] }
 0x338   : > { %5568 = vmatprep.subr.bf16.mxu0 %v5567_v52  ;;  %5632 = vmatprep.subr.bf16.mxu1 %v5631_v21  ;;  %v2904_v52 = vld [vmem:[#allocation13 + $0x328] sm:$0xff]  ;;  %v2902_v21 = vld [vmem:[#allocation13 + $0x318] sm:$0xff]  ;;  %v5645_v16 = vpack.c.bf16 %v2897_v26, %v2893_v41  ;;  %v5593_v26 = vpack.c.bf16 %v2919_v27, %v2915_v61  ;;  %v2689_v61 = vld [vmem:[#allocation11 + $0x70] sm:$0xff] }
 0x339   : > { %v5583_v18 = vpack.c.bf16 %v2904_v52, %v2900_v48  ;;  %v2930_v41 = vld [vmem:[#allocation13 + $0x3f8] sm:$0xff]  ;;  %v2923_v52 = vld [vmem:[#allocation13 + $0x3c0] sm:$0xff]  ;;  %v2692_v27 = vld [vmem:[#allocation11 + $0x88] sm:$0xff] }
 0x33b   : > { %5570 = vmatpush1.bf16.msra.mxu0 %v5569_v51  ;;  %5634 = vmatpush1.bf16.msra.mxu1 %v5633_v54  ;;  %v5647_v51 = vpack.c.bf16 %v2906_v38, %v2902_v21  ;;  %v2901_v54 = vld [vmem:[#allocation13 + $0x310] sm:$0xff]  ;;  %v2927_v21 = vld [vmem:[#allocation13 + $0x3e0] sm:$0xff] }
 0x33c   : > { %5572 = vmatprep.subr.bf16.mxu0 %v5571_v31  ;;  %5636 = vmatprep.subr.bf16.mxu1 %v5635_v23  ;;  %v2912_v31 = vld [vmem:[#allocation13 + $0x368] sm:$0xff]  ;;  %v2910_v23 = vld [vmem:[#allocation13 + $0x358] sm:$0xff]  ;;  %v5649_v32 = vpack.c.bf16 %v2905_v58, %v2901_v54  ;;  %v5597_v58 = vpack.c.bf16 %v2927_v21, %v2923_v52  ;;  %v2693_v52 = vld [vmem:[#allocation11 + $0x90] sm:$0xff] }
 0x33d   : > { %v5587_v49 = vpack.c.bf16 %v2912_v31, %v2908_v42  ;;  %v2682_v54 = vld [vmem:[#allocation11 + $0x38] sm:$0xff]  ;;  %v2675_v31 = vld [vmem:[#allocation11] sm:$0xff]  ;;  %v2697_v21 = vld [vmem:[#allocation11 + $0xb0] sm:$0xff] }
 0x33f   : > { %5574 = vmatpush1.bf16.msra.mxu0 %v5573_v57  ;;  %5638 = vmatpush1.bf16.msra.mxu1 %v5637_v35  ;;  %v5651_v57 = vpack.c.bf16 %v2914_v22, %v2910_v23  ;;  %v2909_v35 = vld [vmem:[#allocation13 + $0x350] sm:$0xff]  ;;  %v2679_v23 = vld [vmem:[#allocation11 + $0x20] sm:$0xff] }
 0x340   : > { %5576 = vmatprep.subr.bf16.mxu0 %v5575_v45  ;;  %5640 = vmatprep.subr.bf16.mxu1 %v5639_v34  ;;  %v2920_v45 = vld [vmem:[#allocation13 + $0x3a8] sm:$0xff]  ;;  %v2918_v34 = vld [vmem:[#allocation13 + $0x398] sm:$0xff]  ;;  %v5653_v29 = vpack.c.bf16 %v2913_v0, %v2909_v35  ;;  %v5665_v0 = vpack.c.bf16 %v2679_v23, %v2675_v31  ;;  %v2701_v31 = vld [vmem:[#allocation11 + $0xd0] sm:$0xff] }
 0x341   : > { %v5591_v39 = vpack.c.bf16 %v2920_v45, %v2916_v60  ;;  %v2690_v35 = vld [vmem:[#allocation11 + $0x78] sm:$0xff]  ;;  %v2683_v45 = vld [vmem:[#allocation11 + $0x40] sm:$0xff]  ;;  %v2705_v23 = vld [vmem:[#allocation11 + $0xf0] sm:$0xff] }
 0x343   : > { %5578 = vmatpush1.bf16.msra.mxu0 %v5577_v3  ;;  %5642 = vmatpush1.bf16.msra.mxu1 %v5641_v13  ;;  %v5655_v3 = vpack.c.bf16 %v2922_v2, %v2918_v34  ;;  %v2917_v13 = vld [vmem:[#allocation13 + $0x390] sm:$0xff]  ;;  %v2687_v34 = vld [vmem:[#allocation11 + $0x60] sm:$0xff] }
 0x344   : > { %5580 = vmatprep.subr.bf16.mxu0 %v5579_v55  ;;  %5644 = vmatprep.subr.bf16.mxu1 %v5643_v37  ;;  %v2928_v55 = vld [vmem:[#allocation13 + $0x3e8] sm:$0xff]  ;;  %v2926_v37 = vld [vmem:[#allocation13 + $0x3d8] sm:$0xff]  ;;  %v5657_v48 = vpack.c.bf16 %v2921_v24, %v2917_v13 }
 0x345   : > { %v5595_v38 = vpack.c.bf16 %v2928_v55, %v2924_v19  ;;  %v2698_v13 = vld [vmem:[#allocation11 + $0xb8] sm:$0xff]  ;;  %v10064_v24 = vld [vmem:[#allocation104_spill] sm:$0xff]  ;;  %v5669_v19 = vpack.c.bf16 %v2687_v34, %v2683_v45 }
 0x346   : > { %v2716_v45 = vld [vmem:[#allocation11 + $0x148] sm:$0xff] }
 0x347   : > { %5582 = vmatpush1.bf16.msra.mxu0 %v5581_v17  ;;  %5646 = vmatpush1.bf16.msra.mxu1 %v5645_v16  ;;  %v5659_v17 = vpack.c.bf16 %v2930_v41, %v2926_v37  ;;  %v2925_v16 = vld [vmem:[#allocation13 + $0x3d0] sm:$0xff]  ;;  %v2691_v37 = vld [vmem:[#allocation11 + $0x80] sm:$0xff]  ;;  %v2720_v34 = vld [vmem:[#allocation11 + $0x168] sm:$0xff] }
 0x348   : > { %5584 = vmatprep.subr.bf16.mxu0 %v5583_v18  ;;  %5648 = vmatprep.subr.bf16.mxu1 %v5647_v51  ;;  %v2680_v18 = vld [vmem:[#allocation11 + $0x28] sm:$0xff]  ;;  %v2678_v51 = vld [vmem:[#allocation11 + $0x18] sm:$0xff]  ;;  %v5661_v42 = vpack.c.bf16 %v2929_v5, %v2925_v16  ;;  %v2695_v41 = vld [vmem:[#allocation11 + $0xa0] sm:$0xff] }
 0x349   : > { %v5663_v22 = vpack.c.bf16 %v2680_v18, %v2676_v47  ;;  %v2702_v16 = vld [vmem:[#allocation11 + $0xd8] sm:$0xff]  ;;  %v5673_v47 = vpack.c.bf16 %v2695_v41, %v2691_v37  ;;  %v5737_v18 = vpack.c.bf16 %v2697_v21, %v2693_v52  ;;  %v2723_v41 = vld [vmem:[#allocation11 + $0x180] sm:$0xff]  ;;  %v2725_v21 = vld [vmem:[#allocation11 + $0x190] sm:$0xff] }
 0x34a   : > { %v2706_v5 = vld [vmem:[#allocation11 + $0xf8] sm:$0xff] }
 0x34b   : > { %5586 = vmatpush1.bf16.msra.mxu0 %v5585_v46  ;;  %5650 = vmatpush1.bf16.msra.mxu1 %v5649_v32  ;;  %v5727_v46 = vpack.c.bf16 %v2682_v54, %v2678_v51  ;;  %v2677_v32 = vld [vmem:[#allocation11 + $0x10] sm:$0xff]  ;;  %v2699_v51 = vld [vmem:[#allocation11 + $0xc0] sm:$0xff] }
 0x34c   : > { %5588 = vmatprep.subr.bf16.mxu0 %v5587_v49  ;;  %5652 = vmatprep.subr.bf16.mxu1 %v5651_v57  ;;  %v2688_v49 = vld [vmem:[#allocation11 + $0x68] sm:$0xff]  ;;  %v2686_v57 = vld [vmem:[#allocation11 + $0x58] sm:$0xff]  ;;  %v5729_v60 = vpack.c.bf16 %v2681_v44, %v2677_v32  ;;  %v2703_v54 = vld [vmem:[#allocation11 + $0xe0] sm:$0xff]  ;;  %v5741_v44 = vpack.c.bf16 %v2705_v23, %v2701_v31 }
 0x34d   : > { %v5667_v2 = vpack.c.bf16 %v2688_v49, %v2684_v40  ;;  %v2710_v32 = vld [vmem:[#allocation11 + $0x118] sm:$0xff]  ;;  %v2707_v40 = vld [vmem:[#allocation11 + $0x100] sm:$0xff]  ;;  %v2733_v31 = vld [vmem:[#allocation11 + $0x1d0] sm:$0xff] }
 0x34e   : > { %v2711_v49 = vld [vmem:[#allocation11 + $0x120] sm:$0xff]  ;;  %v2737_v23 = vld [vmem:[#allocation11 + $0x1f0] sm:$0xff] }
 0x34f   : > { %5590 = vmatpush1.bf16.msra.mxu0 %v5589_v28  ;;  %5654 = vmatpush1.bf16.msra.mxu1 %v5653_v29  ;;  %v5731_v28 = vpack.c.bf16 %v2690_v35, %v2686_v57  ;;  %v2685_v29 = vld [vmem:[#allocation11 + $0x50] sm:$0xff] }
 0x350   : > { %5592 = vmatprep.subr.bf16.mxu0 %v5591_v39  ;;  %5656 = vmatprep.subr.bf16.mxu1 %v5655_v3  ;;  %v2696_v39 = vld [vmem:[#allocation11 + $0xa8] sm:$0xff]  ;;  %v2694_v3 = vld [vmem:[#allocation11 + $0x98] sm:$0xff]  ;;  %v5733_v55 = vpack.c.bf16 %v2689_v61, %v2685_v29  ;;  %v2715_v29 = vld [vmem:[#allocation11 + $0x140] sm:$0xff] }
 0x351   : > { %v2719_v61 = vld [vmem:[#allocation11 + $0x160] sm:$0xff] }
 0x353   : > { %5594 = vmatpush1.bf16.msra.mxu0 %v5593_v26  ;;  %5658 = vmatpush1.bf16.msra.mxu1 %v5657_v48  ;;  %v5671_v26 = vpack.c.bf16 %v2696_v39, %v2692_v27  ;;  %v5735_v48 = vpack.c.bf16 %v2698_v13, %v2694_v3  ;;  %v5683_v27 = vpack.c.bf16 %v2720_v34, %v2716_v45  ;;  %v2717_v3 = vld [vmem:[#allocation11 + $0x150] sm:$0xff]  ;;  %v2748_v45 = vld [vmem:[#allocation11 + $0x248] sm:$0xff] }
 0x354   : > { %5596 = vmatprep.subr.bf16.mxu0 %v5595_v38  ;;  %5660 = vmatprep.subr.bf16.mxu1 %v5659_v17  ;;  %v2700_v38 = vld [vmem:[#allocation11 + $0xc8] sm:$0xff]  ;;  %v2721_v13 = vld [vmem:[#allocation11 + $0x170] sm:$0xff] }
 0x355   : > { %v2704_v17 = vld [vmem:[#allocation11 + $0xe8] sm:$0xff]  ;;  %v5749_v37 = vpack.c.bf16 %v2721_v13, %v2717_v3  ;;  %v2749_v3 = vld [vmem:[#allocation11 + $0x250] sm:$0xff] }
 0x356   : > { %v2752_v34 = vld [vmem:[#allocation11 + $0x268] sm:$0xff]  ;;  %v2753_v13 = vld [vmem:[#allocation11 + $0x270] sm:$0xff] }
 0x357   : > { %5598 = vmatpush1.bf16.msra.mxu0 %v5597_v58  ;;  %5662 = vmatpush1.bf16.msra.mxu1 %v5661_v42  ;;  %v5675_v58 = vpack.c.bf16 %v2704_v17, %v2700_v38  ;;  %v5739_v42 = vpack.c.bf16 %v2706_v5, %v2702_v16  ;;  %v2729_v38 = vld [vmem:[#allocation11 + $0x1b0] sm:$0xff]  ;;  %v2732_v17 = vld [vmem:[#allocation11 + $0x1c8] sm:$0xff]  ;;  %v2734_v5 = vld [vmem:[#allocation11 + $0x1d8] sm:$0xff] }
 0x358   : > { %5664 = vmatprep.subr.bf16.mxu0 %v5663_v22  ;;  %5728 = vmatprep.subr.bf16.mxu1 %v5727_v46  ;;  %v2708_v22 = vld [vmem:[#allocation11 + $0x108] sm:$0xff] }
 0x359   : > { %v2712_v46 = vld [vmem:[#allocation11 + $0x128] sm:$0xff] }
 0x35a   : > { %2996 = vmatmul.mubr.f32.vlgmr.msra.gmra.mrb[16].mxu0 %v10064_v24  ;;  %3085 = vmatmul.mubr.f32.vlgmr.msra.gmra.mrb[16].mxu1 %v10064_v24  ;;  %v5679_v57 = vpack.c.bf16 %v2712_v46, %v2708_v22  ;;  %v2724_v24 = vld [vmem:[#allocation11 + $0x188] sm:$0xff] }
 0x35b   : > { %5666 = vmatpush1.bf16.msra.mxu0 %v5665_v0  ;;  %5730 = vmatpush1.bf16.msra.mxu1 %v5729_v60  ;;  %v2709_v0 = vld [vmem:[#allocation11 + $0x110] sm:$0xff]  ;;  %v2736_v16 = vld [vmem:[#allocation11 + $0x1e8] sm:$0xff] }
 0x35c   : > { %5668 = vmatprep.subr.bf16.mxu0 %v5667_v2  ;;  %5732 = vmatprep.subr.bf16.mxu1 %v5731_v28  ;;  %v2713_v60 = vld [vmem:[#allocation11 + $0x130] sm:$0xff]  ;;  %v2718_v2 = vld [vmem:[#allocation11 + $0x158] sm:$0xff]  ;;  %v2740_v22 = vld [vmem:[#allocation11 + $0x208] sm:$0xff] }
 0x35d   : > { %3001 = vmatprep.mubr.f32.mxu0 %v8776_v10  ;;  %3090 = vmatprep.mubr.f32.mxu1 %v8776_v10  ;;  %v2714_v10 = vld [vmem:[#allocation11 + $0x138] sm:$0xff]  ;;  %v5745_v28 = vpack.c.bf16 %v2713_v60, %v2709_v0  ;;  %v2744_v46 = vld [vmem:[#allocation11 + $0x228] sm:$0xff]  ;;  %v2741_v0 = vld [vmem:[#allocation11 + $0x210] sm:$0xff] }
 0x35e   : > { %3002 = vmatmul.mubr.f32.gmra.mrb[18].mxu0 %v8932_v56  ;;  %3091 = vmatmul.mubr.f32.gmra.mrb[18].mxu1 %v8932_v56  ;;  %v5677_v56 = vpack.c.bf16 %v2703_v54, %v2699_v51  ;;  %v5743_v35 = vpack.c.bf16 %v2714_v10, %v2710_v32  ;;  %v2731_v51 = vld [vmem:[#allocation11 + $0x1c0] sm:$0xff]  ;;  %v2742_v32 = vld [vmem:[#allocation11 + $0x218] sm:$0xff]  ;;  %v2745_v60 = vld [vmem:[#allocation11 + $0x230] sm:$0xff] }
 0x35f   : > { %5670 = vmatpush1.bf16.msra.mxu0 %v5669_v19  ;;  %5734 = vmatpush1.bf16.msra.mxu1 %v5733_v55  ;;  %v2728_v19 = vld [vmem:[#allocation11 + $0x1a8] sm:$0xff]  ;;  %v2726_v55 = vld [vmem:[#allocation11 + $0x198] sm:$0xff]  ;;  %v2735_v54 = vld [vmem:[#allocation11 + $0x1e0] sm:$0xff] }
 0x360   : > { %5672 = vmatprep.subr.bf16.mxu0 %v5671_v26  ;;  %5736 = vmatprep.subr.bf16.mxu1 %v5735_v48  ;;  %v2727_v26 = vld [vmem:[#allocation11 + $0x1a0] sm:$0xff]  ;;  %v5687_v48 = vpack.c.bf16 %v2728_v19, %v2724_v24  ;;  %v2746_v10 = vld [vmem:[#allocation11 + $0x238] sm:$0xff]  ;;  %v2756_v24 = vld [vmem:[#allocation11 + $0x288] sm:$0xff] }
 0x361   : > { %3007 = vmatprep.mubr.f32.mxu0 %v9018_v15  ;;  %3096 = vmatprep.mubr.f32.mxu1 %v9018_v15  ;;  %v2722_v15 = vld [vmem:[#allocation11 + $0x178] sm:$0xff]  ;;  %v2760_v19 = vld [vmem:[#allocation11 + $0x2a8] sm:$0xff] }
 0x362   : > { %3008 = vmatmul.mubr.f32.gmra.mrb[20].mxu0 %v9072_v33  ;;  %3097 = vmatmul.mubr.f32.gmra.mrb[20].mxu1 %v9072_v33  ;;  %v5681_v33 = vpack.c.bf16 %v2711_v49, %v2707_v40  ;;  %v5747_v39 = vpack.c.bf16 %v2722_v15, %v2718_v2  ;;  %v2739_v40 = vld [vmem:[#allocation11 + $0x200] sm:$0xff]  ;;  %v2750_v2 = vld [vmem:[#allocation11 + $0x258] sm:$0xff] }
 0x363   : > { %5674 = vmatpush1.bf16.msra.mxu0 %v5673_v47  ;;  %5738 = vmatpush1.bf16.msra.mxu1 %v5737_v18  ;;  %v2738_v47 = vld [vmem:[#allocation11 + $0x1f8] sm:$0xff]  ;;  %v5689_v18 = vpack.c.bf16 %v2727_v26, %v2723_v41  ;;  %v2743_v49 = vld [vmem:[#allocation11 + $0x220] sm:$0xff] }
 0x364   : > { %5676 = vmatprep.subr.bf16.mxu0 %v5675_v58  ;;  %5740 = vmatprep.subr.bf16.mxu1 %v5739_v42  ;;  %v5691_v58 = vpack.c.bf16 %v2736_v16, %v2732_v17  ;;  %v5755_v42 = vpack.c.bf16 %v2738_v47, %v2734_v5  ;;  %v2754_v15 = vld [vmem:[#allocation11 + $0x278] sm:$0xff]  ;;  %v2755_v41 = vld [vmem:[#allocation11 + $0x280] sm:$0xff]  ;;  %v2764_v17 = vld [vmem:[#allocation11 + $0x2c8] sm:$0xff] }
 0x365   : > { %3013 = vmatprep.mubr.f32.mxu0 %v9101_v63  ;;  %3102 = vmatprep.mubr.f32.mxu1 %v9101_v63  ;;  %v2730_v63 = vld [vmem:[#allocation11 + $0x1b8] sm:$0xff]  ;;  %v2759_v26 = vld [vmem:[#allocation11 + $0x2a0] sm:$0xff]  ;;  %v2768_v16 = vld [vmem:[#allocation11 + $0x2e8] sm:$0xff] }
 0x366   : > { %3014 = vmatmul.mubr.f32.gmra.mrb[22].mxu0 %v9119_v1  ;;  %3103 = vmatmul.mubr.f32.gmra.mrb[22].mxu1 %v9119_v1  ;;  %v5685_v1 = vpack.c.bf16 %v2719_v61, %v2715_v29  ;;  %v5751_v52 = vpack.c.bf16 %v2730_v63, %v2726_v55  ;;  %v2747_v29 = vld [vmem:[#allocation11 + $0x240] sm:$0xff]  ;;  %v2758_v55 = vld [vmem:[#allocation11 + $0x298] sm:$0xff] }
 0x367   : > { %5678 = vmatpush1.bf16.msra.mxu0 %v5677_v56  ;;  %5742 = vmatpush1.bf16.msra.mxu1 %v5741_v44  ;;  %v5693_v56 = vpack.c.bf16 %v2735_v54, %v2731_v51  ;;  %v5757_v44 = vpack.c.bf16 %v2737_v23, %v2733_v31  ;;  %v2751_v61 = vld [vmem:[#allocation11 + $0x260] sm:$0xff]  ;;  %v2762_v63 = vld [vmem:[#allocation11 + $0x2b8] sm:$0xff]  ;;  %v2765_v31 = vld [vmem:[#allocation11 + $0x2d0] sm:$0xff] }
 0x368   : > { %5680 = vmatprep.subr.bf16.mxu0 %v5679_v57  ;;  %5744 = vmatprep.subr.bf16.mxu1 %v5743_v35  ;;  %v5695_v57 = vpack.c.bf16 %v2744_v46, %v2740_v22  ;;  %v5759_v35 = vpack.c.bf16 %v2746_v10, %v2742_v32  ;;  %v2766_v5 = vld [vmem:[#allocation11 + $0x2d8] sm:$0xff]  ;;  %v2763_v51 = vld [vmem:[#allocation11 + $0x2c0] sm:$0xff]  ;;  %v2769_v23 = vld [vmem:[#allocation11 + $0x2f0] sm:$0xff] }
 0x369   : > { %3173 = vmatprep.mubr.f32.mxu0 %v9117_v30  ;;  %3262 = vmatprep.mubr.f32.mxu1 %v9117_v30  ;;  %v5753_v30 = vpack.c.bf16 %v2729_v38, %v2725_v21  ;;  %v2757_v21 = vld [vmem:[#allocation11 + $0x290] sm:$0xff]  ;;  %v2770_v47 = vld [vmem:[#allocation11 + $0x2f8] sm:$0xff]  ;;  %v2767_v54 = vld [vmem:[#allocation11 + $0x2e0] sm:$0xff] }
 0x36a   : > { %v2761_v38 = vld [vmem:[#allocation11 + $0x2b0] sm:$0xff]  ;;  %v2772_v22 = vld [vmem:[#allocation11 + $0x308] sm:$0xff]  ;;  %v2774_v32 = vld [vmem:[#allocation11 + $0x318] sm:$0xff] }
 0x36b   : > { %5682 = vmatpush1.bf16.msra.mxu0 %v5681_v33  ;;  %5746 = vmatpush1.bf16.msra.mxu1 %v5745_v28  ;;  %v5697_v33 = vpack.c.bf16 %v2743_v49, %v2739_v40  ;;  %v5761_v28 = vpack.c.bf16 %v2745_v60, %v2741_v0  ;;  %v2776_v46 = vld [vmem:[#allocation11 + $0x328] sm:$0xff]  ;;  %v2778_v10 = vld [vmem:[#allocation11 + $0x338] sm:$0xff]  ;;  %v2771_v40 = vld [vmem:[#allocation11 + $0x300] sm:$0xff] }
 0x36c   : > { %5684 = vmatprep.subr.bf16.mxu0 %v5683_v27  ;;  %5748 = vmatprep.subr.bf16.mxu1 %v5747_v39  ;;  %v5699_v27 = vpack.c.bf16 %v2752_v34, %v2748_v45  ;;  %v5763_v39 = vpack.c.bf16 %v2754_v15, %v2750_v2  ;;  %v2775_v49 = vld [vmem:[#allocation11 + $0x320] sm:$0xff]  ;;  %v2773_v0 = vld [vmem:[#allocation11 + $0x310] sm:$0xff]  ;;  %v2780_v45 = vld [vmem:[#allocation11 + $0x348] sm:$0xff] }
 0x36d   : > { %v2777_v60 = vld [vmem:[#allocation11 + $0x330] sm:$0xff]  ;;  %v2784_v34 = vld [vmem:[#allocation11 + $0x368] sm:$0xff]  ;;  %v2782_v2 = vld [vmem:[#allocation11 + $0x358] sm:$0xff] }
 0x36e   : > { %v2786_v15 = vld [vmem:[#allocation11 + $0x378] sm:$0xff] }
 0x36f   : > { %5686 = vmatpush1.bf16.msra.mxu0 %v5685_v1  ;;  %5750 = vmatpush1.bf16.msra.mxu1 %v5749_v37  ;;  %v5701_v1 = vpack.c.bf16 %v2751_v61, %v2747_v29  ;;  %v5765_v37 = vpack.c.bf16 %v2753_v13, %v2749_v3  ;;  %v2779_v29 = vld [vmem:[#allocation11 + $0x340] sm:$0xff]  ;;  %v2781_v3 = vld [vmem:[#allocation11 + $0x350] sm:$0xff] }
 0x370   : > { %5688 = vmatprep.subr.bf16.mxu0 %v5687_v48  ;;  %5752 = vmatprep.subr.bf16.mxu1 %v5751_v52  ;;  %v5703_v48 = vpack.c.bf16 %v2760_v19, %v2756_v24  ;;  %v5767_v52 = vpack.c.bf16 %v2762_v63, %v2758_v55  ;;  %v2783_v61 = vld [vmem:[#allocation11 + $0x360] sm:$0xff]  ;;  %v2785_v13 = vld [vmem:[#allocation11 + $0x370] sm:$0xff]  ;;  %v2788_v24 = vld [vmem:[#allocation11 + $0x388] sm:$0xff] }
 0x371   : > { %v2792_v19 = vld [vmem:[#allocation11 + $0x3a8] sm:$0xff]  ;;  %v2790_v55 = vld [vmem:[#allocation11 + $0x398] sm:$0xff] }
 0x372   : > { %v2794_v63 = vld [vmem:[#allocation11 + $0x3b8] sm:$0xff] }
 0x373   : > { %5690 = vmatpush1.bf16.msra.mxu0 %v5689_v18  ;;  %5754 = vmatpush1.bf16.msra.mxu1 %v5753_v30  ;;  %v5705_v18 = vpack.c.bf16 %v2759_v26, %v2755_v41  ;;  %v5769_v30 = vpack.c.bf16 %v2761_v38, %v2757_v21  ;;  %v2787_v41 = vld [vmem:[#allocation11 + $0x380] sm:$0xff]  ;;  %v2789_v21 = vld [vmem:[#allocation11 + $0x390] sm:$0xff] }
 0x374   : > { %5692 = vmatprep.subr.bf16.mxu0 %v5691_v58  ;;  %5756 = vmatprep.subr.bf16.mxu1 %v5755_v42  ;;  %v5707_v58 = vpack.c.bf16 %v2768_v16, %v2764_v17  ;;  %v5771_v42 = vpack.c.bf16 %v2770_v47, %v2766_v5  ;;  %v2791_v26 = vld [vmem:[#allocation11 + $0x3a0] sm:$0xff]  ;;  %v2793_v38 = vld [vmem:[#allocation11 + $0x3b0] sm:$0xff]  ;;  %v2796_v17 = vld [vmem:[#allocation11 + $0x3c8] sm:$0xff] }
 0x375   : > { %v2800_v16 = vld [vmem:[#allocation11 + $0x3e8] sm:$0xff]  ;;  %v2798_v5 = vld [vmem:[#allocation11 + $0x3d8] sm:$0xff] }
 0x376   : > { %v2802_v47 = vld [vmem:[#allocation11 + $0x3f8] sm:$0xff] }
 0x377   : > { %5694 = vmatpush1.bf16.msra.mxu0 %v5693_v56  ;;  %5758 = vmatpush1.bf16.msra.mxu1 %v5757_v44  ;;  %v5709_v56 = vpack.c.bf16 %v2767_v54, %v2763_v51  ;;  %v5773_v44 = vpack.c.bf16 %v2769_v23, %v2765_v31  ;;  %v2795_v51 = vld [vmem:[#allocation11 + $0x3c0] sm:$0xff]  ;;  %v2797_v31 = vld [vmem:[#allocation11 + $0x3d0] sm:$0xff] }
 0x378   : > { %5696 = vmatprep.subr.bf16.mxu0 %v5695_v57  ;;  %5760 = vmatprep.subr.bf16.mxu1 %v5759_v35  ;;  %v5711_v57 = vpack.c.bf16 %v2776_v46, %v2772_v22  ;;  %v5775_v35 = vpack.c.bf16 %v2778_v10, %v2774_v32  ;;  %v2799_v54 = vld [vmem:[#allocation11 + $0x3e0] sm:$0xff]  ;;  %v2801_v23 = vld [vmem:[#allocation11 + $0x3f0] sm:$0xff] }
 0x379   : > { %v3357_v22 = vld [vmem:[%s10065_s8 + $0x80] sm:$0xff]  ;;  %v3358_v46 = vld [vmem:[%s10065_s8 + $0x88] sm:$0xff] }
 0x37a   : > { %v3389_v32 = vld [vmem:[%s10065_s8 + $0x180] sm:$0xff]  ;;  %v3390_v10 = vld [vmem:[%s10065_s8 + $0x188] sm:$0xff] }
 0x37b   : > { %5698 = vmatpush1.bf16.msra.mxu0 %v5697_v33  ;;  %5762 = vmatpush1.bf16.msra.mxu1 %v5761_v28  ;;  %v5713_v33 = vpack.c.bf16 %v2775_v49, %v2771_v40  ;;  %v5777_v28 = vpack.c.bf16 %v2777_v60, %v2773_v0  ;;  %v5791_v40 = vpack.c.bf16 %v3358_v46, %v3357_v22  ;;  %v3373_v0 = vld [vmem:[%s10065_s8 + $0x100] sm:$0xff]  ;;  %v3374_v60 = vld [vmem:[%s10065_s8 + $0x108] sm:$0xff] }
 0x37c   : > { %5700 = vmatprep.subr.bf16.mxu0 %v5699_v27  ;;  %5764 = vmatprep.subr.bf16.mxu1 %v5763_v39  ;;  %v5715_v27 = vpack.c.bf16 %v2784_v34, %v2780_v45  ;;  %v5779_v39 = vpack.c.bf16 %v2786_v15, %v2782_v2  ;;  %v5823_v49 = vpack.c.bf16 %v3390_v10, %v3389_v32  ;;  %v3359_v45 = vld [vmem:[%s10065_s8 + $0x90] sm:$0xff]  ;;  %v3360_v34 = vld [vmem:[%s10065_s8 + $0x98] sm:$0xff] }
 0x37d   : > { %v3391_v2 = vld [vmem:[%s10065_s8 + $0x190] sm:$0xff]  ;;  %v3392_v15 = vld [vmem:[%s10065_s8 + $0x198] sm:$0xff] }
 0x37e   : > { %v3379_v32 = vld [vmem:[%s10065_s8 + $0x130] sm:$0xff]  ;;  %v3380_v10 = vld [vmem:[%s10065_s8 + $0x138] sm:$0xff] }
 0x37f   : > { %5702 = vmatpush1.bf16.msra.mxu0 %v5701_v1  ;;  %5766 = vmatpush1.bf16.msra.mxu1 %v5765_v37  ;;  %v5717_v1 = vpack.c.bf16 %v2783_v61, %v2779_v29  ;;  %v5781_v37 = vpack.c.bf16 %v2785_v13, %v2781_v3  ;;  %v3343_v29 = vld [vmem:[%s10065_s8 + $0x10] sm:$0xff]  ;;  %v3344_v61 = vld [vmem:[%s10065_s8 + $0x18] sm:$0xff] }
 0x380   : > { %5704 = vmatprep.subr.bf16.mxu0 %v5703_v48  ;;  %5768 = vmatprep.subr.bf16.mxu1 %v5767_v52  ;;  %v5719_v48 = vpack.c.bf16 %v2792_v19, %v2788_v24  ;;  %v5783_v52 = vpack.c.bf16 %v2794_v63, %v2790_v55  ;;  %v3375_v3 = vld [vmem:[%s10065_s8 + $0x110] sm:$0xff]  ;;  %v3376_v13 = vld [vmem:[%s10065_s8 + $0x118] sm:$0xff]  ;;  %v3361_v24 = vld [vmem:[%s10065_s8 + $0xa0] sm:$0xff] }
 0x381   : > { %v6336_v19 = vld [vmem:[%s9113_s12] sm:$0xff]  ;;  %v3362_v55 = vld [vmem:[%s10065_s8 + $0xa8] sm:$0xff] }
 0x382   : > { %v3393_v63 = vld [vmem:[%s10065_s8 + $0x1a0] sm:$0xff] }
 0x383   : > { %5706 = vmatpush1.bf16.msra.mxu0 %v5705_v18  ;;  %5770 = vmatpush1.bf16.msra.mxu1 %v5769_v30  ;;  %v5721_v18 = vpack.c.bf16 %v2791_v26, %v2787_v41  ;;  %v5785_v30 = vpack.c.bf16 %v2793_v38, %v2789_v21  ;;  %v5797_v41 = vpack.c.bf16 %v3344_v61, %v3343_v29  ;;  %v3367_v29 = vld [vmem:[%s10065_s8 + $0xd0] sm:$0xff] }
 0x384   : > { %5708 = vmatprep.subr.bf16.mxu0 %v5707_v58  ;;  %5772 = vmatprep.subr.bf16.mxu1 %v5771_v42  ;;  %v5723_v58 = vpack.c.bf16 %v2800_v16, %v2796_v17  ;;  %v5787_v42 = vpack.c.bf16 %v2802_v47, %v2798_v5  ;;  %v5829_v26 = vpack.c.bf16 %v3376_v13, %v3375_v3  ;;  %v3377_v17 = vld [vmem:[%s10065_s8 + $0x120] sm:$0xff]  ;;  %v3378_v16 = vld [vmem:[%s10065_s8 + $0x128] sm:$0xff]  ;;  %v3363_v5 = vld [vmem:[%s10065_s8 + $0xb0] sm:$0xff] }
 0x385   : > { %v5799_v21 = vpack.c.bf16 %v3362_v55, %v3361_v24  ;;  %v6338_v47 = vld [vmem:[%s9113_s12 + $0x10] sm:$0xff]  ;;  %v3400_v3 = vld [vmem:[%s10065_s8 + $0x1d8] sm:$0xff] }
 0x386   : > { %v6342_v61 = vld [vmem:[%s9113_s12 + $0x30] sm:$0xff]  ;;  %v3352_v55 = vld [vmem:[%s10065_s8 + $0x58] sm:$0xff] }
 0x387   : > { %5710 = vmatpush1.bf16.msra.mxu0 %v5709_v56  ;;  %5774 = vmatpush1.bf16.msra.mxu1 %v5773_v44  ;;  %v5725_v56 = vpack.c.bf16 %v2799_v54, %v2795_v51  ;;  %v5789_v44 = vpack.c.bf16 %v2801_v23, %v2797_v31  ;;  %v3396_v51 = vld [vmem:[%s10065_s8 + $0x1b8] sm:$0xff]  ;;  %v6339_v54 = vld [vmem:[%s9113_s12 + $0x28] sm:$0xff]  ;;  %v3347_v31 = vld [vmem:[%s10065_s8 + $0x30] sm:$0xff] }
 0x388   : > { %5712 = vmatprep.subr.bf16.mxu0 %v5711_v57  ;;  %5776 = vmatprep.subr.bf16.mxu1 %v5775_v35  ;;  %v3341_v57 = vld [vmem:[%s10065_s8] sm:$0xff]  ;;  %v3342_v35 = vld [vmem:[%s10065_s8 + $0x8] sm:$0xff]  ;;  %v3348_v23 = vld [vmem:[%s10065_s8 + $0x38] sm:$0xff] }
 0x38b   : > { %5714 = vmatpush1.bf16.msra.mxu0 %v5713_v33  ;;  %5778 = vmatpush1.bf16.msra.mxu1 %v5777_v28  ;;  %v5793_v33 = vpack.c.bf16 %v3342_v35, %v3341_v57  ;;  %v5825_v28 = vpack.c.bf16 %v3374_v60, %v3373_v0  ;;  %v3398_v57 = vld [vmem:[%s10065_s8 + $0x1c8] sm:$0xff]  ;;  %v6341_v35 = vld [vmem:[%s9113_s12 + $0x38] sm:$0xff]  ;;  %v5805_v0 = vpack.c.bf16 %v3348_v23, %v3347_v31 }
 0x38c   : > { %5716 = vmatprep.subr.bf16.mxu0 %v5715_v27  ;;  %5780 = vmatprep.subr.bf16.mxu1 %v5779_v39  ;;  %v5795_v27 = vpack.c.bf16 %v3360_v34, %v3359_v45  ;;  %v5827_v39 = vpack.c.bf16 %v3392_v15, %v3391_v2  ;;  %v5837_v60 = vpack.c.bf16 %v3380_v10, %v3379_v32  ;;  %v3349_v45 = vld [vmem:[%s10065_s8 + $0x40] sm:$0xff]  ;;  %v3350_v34 = vld [vmem:[%s10065_s8 + $0x48] sm:$0xff]  ;;  %v3404_v31 = vld [vmem:[%s10065_s8 + $0x1f8] sm:$0xff] }
 0x38d   : > { %v5809_v13 = vpack.c.bf16 %v3350_v34, %v3349_v45  ;;  %v2637_v34 = vld [vmem:[#allocation10] sm:$0xf] }
 0x38f   : > { %5718 = vmatpush1.bf16.msra.mxu0 %v5717_v1  ;;  %5782 = vmatpush1.bf16.msra.mxu1 %v5781_v37  ;;  %v3394_v1 = vld [vmem:[%s10065_s8 + $0x1a8] sm:$0xff]  ;;  %v6337_v37 = vld [vmem:[%s9113_s12 + $0x18] sm:$0xff] }
 0x390   : > { %5720 = vmatprep.subr.bf16.mxu0 %v5719_v48  ;;  %5784 = vmatprep.subr.bf16.mxu1 %v5783_v52  ;;  %v3345_v48 = vld [vmem:[%s10065_s8 + $0x20] sm:$0xff]  ;;  %v3346_v52 = vld [vmem:[%s10065_s8 + $0x28] sm:$0xff]  ;;  %v5831_v38 = vpack.c.bf16 %v3394_v1, %v3393_v63 }
 0x393   : > { %5722 = vmatpush1.bf16.msra.mxu0 %v5721_v18  ;;  %5786 = vmatpush1.bf16.msra.mxu1 %v5785_v30  ;;  %v3364_v18 = vld [vmem:[%s10065_s8 + $0xb8] sm:$0xff]  ;;  %v3395_v30 = vld [vmem:[%s10065_s8 + $0x1b0] sm:$0xff] }
 0x394   : > { %5724 = vmatprep.subr.bf16.mxu0 %v5723_v58  ;;  %5788 = vmatprep.subr.bf16.mxu1 %v5787_v42  ;;  %v5801_v58 = vpack.c.bf16 %v3346_v52, %v3345_v48  ;;  %v5833_v42 = vpack.c.bf16 %v3378_v16, %v3377_v17  ;;  %v5803_v22 = vpack.c.bf16 %v3364_v18, %v3363_v5  ;;  %v3370_v48 = vld [vmem:[%s10065_s8 + $0xe8] sm:$0xff]  ;;  %v3401_v52 = vld [vmem:[%s10065_s8 + $0x1e0] sm:$0xff] }
 0x395   : > { %v5835_v46 = vpack.c.bf16 %v3396_v51, %v3395_v30  ;;  %v3353_v16 = vld [vmem:[%s10065_s8 + $0x60] sm:$0xff]  ;;  %v3354_v5 = vld [vmem:[%s10065_s8 + $0x68] sm:$0xff] }
 0x396   : > { %v3385_v30 = vld [vmem:[%s10065_s8 + $0x160] sm:$0xff]  ;;  %v3386_v51 = vld [vmem:[%s10065_s8 + $0x168] sm:$0xff]  ;;  %v5817_v23 = vpack.c.bf16 %v3354_v5, %v3353_v16 }
 0x397   : > { %5726 = vmatpush1.bf16.msra.mxu0 %v5725_v56  ;;  %5790 = vmatpush1.bf16.msra.mxu1 %v5789_v44  ;;  %v3365_v56 = vld [vmem:[%s10065_s8 + $0xc0] sm:$0xff] }
 0x398   : > { %5792 = vmatprep.subr.bf16.mxu0 %v5791_v40  ;;  %5824 = vmatprep.subr.bf16.mxu1 %v5823_v49  ;;  %v6340_v44 = vld [vmem:[%s9113_s12 + $0x20] sm:$0xff]  ;;  %v3366_v40 = vld [vmem:[%s10065_s8 + $0xc8] sm:$0xff]  ;;  %s10072_s12 = sld [smem:[#allocation124_spill]] }
 0x399   : > { %v3397_v49 = vld [vmem:[%s10065_s8 + $0x1c0] sm:$0xff]  ;;  %v5807_v2 = vpack.c.bf16 %v3366_v40, %v3365_v56  ;;  %v3356_v56 = vld [vmem:[%s10065_s8 + $0x78] sm:$0xff] }
 0x39a   : > { %3174 = vmatmul.mubr.f32.vlgmr.msra.gmra.mrb[16].mxu0 %v6336_v19  ;;  %3263 = vmatmul.mubr.f32.vlgmr.msra.gmra.mrb[16].mxu1 %v6336_v19  ;;  %v5839_v15 = vpack.c.bf16 %v3398_v57, %v3397_v49  ;;  %v3351_v19 = vld [vmem:[%s10065_s8 + $0x50] sm:$0xff]  ;;  %v3388_v40 = vld [vmem:[%s10065_s8 + $0x178] sm:$0xff] }
 0x39b   : > { %3179 = vmatprep.mubr.f32.mxu0 %v6337_v37  ;;  %3268 = vmatprep.mubr.f32.mxu1 %v6337_v37  ;;  %v3383_v37 = vld [vmem:[%s10065_s8 + $0x150] sm:$0xff] }
 0x39c   : > { %5794 = vmatpush3.bf16.msra.mxu0 %v5793_v33  ;;  %5826 = vmatpush3.bf16.msra.mxu1 %v5825_v28  ;;  %v3381_v33 = vld [vmem:[%s10065_s8 + $0x140] sm:$0xff]  ;;  %v3382_v28 = vld [vmem:[%s10065_s8 + $0x148] sm:$0xff] }
 0x39d   : > { %5796 = vmatprep.subr.bf16.mxu0 %v5795_v27  ;;  %5828 = vmatprep.subr.bf16.mxu1 %v5827_v39  ;;  %v3368_v27 = vld [vmem:[%s10065_s8 + $0xd8] sm:$0xff]  ;;  %v3399_v39 = vld [vmem:[%s10065_s8 + $0x1d0] sm:$0xff]  ;;  %v5841_v24 = vpack.c.bf16 %v3382_v28, %v3381_v33 }
 0x39e   : > { %3180 = vmatmul.mubr.f32.gmra.mrb[18].mxu0 %v6338_v47  ;;  %3269 = vmatmul.mubr.f32.gmra.mrb[18].mxu1 %v6338_v47  ;;  %v5811_v63 = vpack.c.bf16 %v3368_v27, %v3367_v29  ;;  %v5843_v1 = vpack.c.bf16 %v3400_v3, %v3399_v39 }
 0x39f   : > { %3185 = vmatprep.mubr.f32.mxu0 %v6339_v54  ;;  %3274 = vmatprep.mubr.f32.mxu1 %v6339_v54  ;;  %v3371_v54 = vld [vmem:[%s10065_s8 + $0xf0] sm:$0xff] }
 0x3a0   : > { %5798 = vmatpush3.bf16.msra.mxu0 %v5797_v41  ;;  %5830 = vmatpush3.bf16.msra.mxu1 %v5829_v26  ;;  %v3384_v41 = vld [vmem:[%s10065_s8 + $0x158] sm:$0xff]  ;;  %v3369_v26 = vld [vmem:[%s10065_s8 + $0xe0] sm:$0xff] }
 0x3a1   : > { %5800 = vmatprep.subr.bf16.mxu0 %v5799_v21  ;;  %5832 = vmatprep.subr.bf16.mxu1 %v5831_v38  ;;  %v3402_v21 = vld [vmem:[%s10065_s8 + $0x1e8] sm:$0xff]  ;;  %v5813_v38 = vpack.c.bf16 %v3352_v55, %v3351_v19  ;;  %v5845_v17 = vpack.c.bf16 %v3384_v41, %v3383_v37  ;;  %v5815_v47 = vpack.c.bf16 %v3370_v48, %v3369_v26 }
 0x3a2   : > { %3186 = vmatmul.mubr.f32.gmra.mrb[20].mxu0 %v6340_v44  ;;  %3275 = vmatmul.mubr.f32.gmra.mrb[20].mxu1 %v6340_v44  ;;  %v5847_v18 = vpack.c.bf16 %v3402_v21, %v3401_v52  ;;  %v3387_v44 = vld [vmem:[%s10065_s8 + $0x170] sm:$0xff] }
 0x3a3   : > { %3191 = vmatprep.mubr.f32.mxu0 %v6341_v35  ;;  %3280 = vmatprep.mubr.f32.mxu1 %v6341_v35  ;;  %v5853_v57 = vpack.c.bf16 %v3388_v40, %v3387_v44  ;;  %v10066_v35 = vld [vmem:[#allocation35_spill] sm:$0xff] }
 0x3a4   : > { %5802 = vmatpush3.bf16.msra.mxu0 %v5801_v58  ;;  %5834 = vmatpush3.bf16.msra.mxu1 %v5833_v42  ;;  %v3372_v58 = vld [vmem:[%s10065_s8 + $0xf8] sm:$0xff]  ;;  %v3403_v42 = vld [vmem:[%s10065_s8 + $0x1f0] sm:$0xff]  ;;  %v9380_v45 = vsub.s32 3, %v10066_v35 }
 0x3a5   : > { %5804 = vmatprep.subr.bf16.mxu0 %v5803_v22  ;;  %5836 = vmatprep.subr.bf16.mxu1 %v5835_v46  ;;  %v5849_v22 = vpack.c.bf16 %v3386_v51, %v3385_v30  ;;  %v3355_v46 = vld [vmem:[%s10065_s8 + $0x70] sm:$0xff]  ;;  %v5819_v32 = vpack.c.bf16 %v3372_v58, %v3371_v54  ;;  %v5851_v10 = vpack.c.bf16 %v3404_v31, %v3403_v42 }
 0x3a6   : > { %3192 = vmatmul.mubr.f32.gmra.mrb[22].mxu0 %v6342_v61  ;;  %3281 = vmatmul.mubr.f32.gmra.mrb[22].mxu1 %v6342_v61  ;;  %v5821_v49 = vpack.c.bf16 %v3356_v56, %v3355_v46  ;;  %v10069_v61 = vld [vmem:[#allocation37_spill] sm:$0xff] }
 0x3a7   : > { %v9399_v3 = vrot.slane %v2637_v34, %v10069_v61 }
 0x3a8   : > { %5806 = vmatpush3.bf16.msra.mxu0 %v5805_v0  ;;  %5838 = vmatpush3.bf16.msra.mxu1 %v5837_v60  ;;  %v9374_v0 = vsub.s32 2, %v10066_v35  ;;  %v1825_v60 = vld [vmem:[%s10067_s18] sm:$0xf]  ;;  %s4522_s18 = scalar_lea.sflag [#allocation4], %s7357_s0 }
 0x3a9   : > { %5808 = vmatprep.subr.bf16.mxu0 %v5807_v2  ;;  %5840 = vmatprep.subr.bf16.mxu1 %v5839_v15  ;;  %v10068_v2 = vld [vmem:[#allocation36_spill] sm:$0xff]  ;;  %v9393_v27 = vrot.slane %v1825_v60, %v10069_v61  ;;  %v9396_v39 = vrot.slane %v1825_v60, %v9380_v45 }
 0x3aa   : > { %v1830_v15 = vrot.slane %v1825_v60, %v10068_v2  ;;  %v9384_v33 = vrot.slane %v1825_v60, %v9374_v0  ;;  %v9387_v28 = vrot.slane %v2637_v34, %v10068_v2  ;;  %v9390_v29 = vrot.slane %v2637_v34, %v9374_v0 }
 0x3ab   : > { %v1916_v48 = vadd.f32 %v9088_v25, %v9393_v27  ;;  %v2005_v52 = vadd.f32 %v9090_v59, %v9396_v39  ;;  %v1922_v25 = vadd.f32 %v9132_v6, %v9393_v27  ;;  %v2011_v42 = vadd.f32 %v9134_v62, %v9396_v39 }
 0x3ac   : > { %5810 = vmatpush3.bf16.msra.mxu0 %v5809_v13  ;;  %5842 = vmatpush3.bf16.msra.mxu1 %v5841_v24  ;;  %v9402_v13 = vrot.slane %v2637_v34, %v9380_v45  ;;  %v1914_v55 = vadd.f32 %v9084_v50, %v1830_v15  ;;  %v2009_v30 = vadd.f32 %v9129_v9, %v9384_v33 }
 0x3ad   : > { %5812 = vmatprep.subr.bf16.mxu0 %v5811_v63  ;;  %5844 = vmatprep.subr.bf16.mxu1 %v5843_v1  ;;  %v2003_v63 = vadd.f32 %v9086_v36, %v9384_v33  ;;  %v1920_v36 = vadd.f32 %v9127_v11, %v1830_v15  ;;  %v1926_v6 = vadd.f32 %v9136_v53, %v1830_v15 }
 0x3ae   : > { %v2015_v56 = vadd.f32 %v9138_v7, %v9384_v33  ;;  %v1928_v62 = vadd.f32 %v9142_v8, %v9393_v27  ;;  %v2017_v35 = vadd.f32 %v9144_v4, %v9396_v39  ;;  %v1932_v8 = vadd.f32 %v9146_v14, %v1830_v15 }
 0x3af   : > { %v1934_v4 = vadd.f32 %v9151_v43, %v9393_v27 }
 0x3b0   : > { %5814 = vmatpush3.bf16.msra.mxu0 %v5813_v38  ;;  %5846 = vmatpush3.bf16.msra.mxu1 %v5845_v17 }
 0x3b1   : > { %5816 = vmatprep.subr.bf16.mxu0 %v5815_v47  ;;  %5848 = vmatprep.subr.bf16.mxu1 %v5847_v18 }
 0x3b4   : > { %5818 = vmatpush3.bf16.msra.mxu0 %v5817_v23  ;;  %5850 = vmatpush3.bf16.msra.mxu1 %v5849_v22 }
 0x3b5   : > { %5820 = vmatprep.subr.bf16.mxu0 %v5819_v32  ;;  %5852 = vmatprep.subr.bf16.mxu1 %v5851_v10 }
 0x3b8   : > { %5822 = vmatpush3.bf16.msra.mxu0 %v5821_v49  ;;  %5854 = vmatpush3.bf16.msra.mxu1 %v5853_v57 }
 0x3ed   : > { %v2525_v24 = vpop.f32.mrb[8].mxu0  ;;  %v2614_v19 = vpop.f32.mrb[8].mxu1 }
 0x3ee   : > { %v2659_v1 = vadd.f32 %v9387_v28, %v2525_v24  ;;  %v2661_v37 = vadd.f32 %v9390_v29, %v2614_v19  ;;  %v2527_v41 = vpop.f32.mrb[9].mxu0  ;;  %v2616_v26 = vpop.f32.mrb[9].mxu1 }
 0x3ef   : > { %v2660_v21 = vadd.f32 %v9399_v3, %v2527_v41  ;;  %v2662_v38 = vadd.f32 %v9402_v13, %v2616_v26 }
 0x3f0   : > { %v3325_v50 = vmul.f32 %v2659_v1, %v1914_v55  ;;  %v3327_v17 = vmul.f32 %v2661_v37, %v2003_v63  ;;  %v2021_v1 = vadd.f32 %v9148_v20, %v9384_v33 }
 0x3f1   : > { %v3326_v16 = vmul.f32 %v2660_v21, %v1916_v48  ;;  %v3328_v5 = vmul.f32 %v2662_v38, %v2005_v52  ;;  %v2531_v47 = vpop.f32.mrb[10].mxu0  ;;  %v2620_v18 = vpop.f32.mrb[10].mxu1  ;;  %v2023_v52 = vadd.f32 %v9153_v12, %v9396_v39 }
 0x3f2   : > { %v2663_v59 = vadd.f32 %v9387_v28, %v2531_v47  ;;  %v2665_v51 = vadd.f32 %v9390_v29, %v2620_v18  ;;  %v2533_v54 = vpop.f32.mrb[11].mxu0  ;;  %v2622_v58 = vpop.f32.mrb[11].mxu1 }
 0x3f3   : > { %v2664_v11 = vadd.f32 %v9399_v3, %v2533_v54  ;;  %v2666_v31 = vadd.f32 %v9402_v13, %v2622_v58  ;;  %3469 = vmatprep.mubr.f32.mxu0 %v3326_v16  ;;  %3554 = vmatprep.mubr.f32.mxu1 %v3328_v5 }
 0x3f4   : > { %v3329_v23 = vmul.f32 %v2663_v59, %v1920_v36  ;;  %v3331_v9 = vmul.f32 %v2665_v51, %v2009_v30  ;;  %3470 = vmatmul.mubr.f32.vlgmr.msra.gmra.mrb[24].mxu0 %v3325_v50  ;;  %3555 = vmatmul.mubr.f32.vlgmr.msra.gmra.mrb[24].mxu1 %v3327_v17 }
 0x3f5   : > { %v3330_v22 = vmul.f32 %v2664_v11, %v1922_v25  ;;  %v3332_v46 = vmul.f32 %v2666_v31, %v2011_v42  ;;  %v2537_v32 = vpop.f32.mrb[12].mxu0  ;;  %v2626_v10 = vpop.f32.mrb[12].mxu1 }
 0x3f6   : > { %v2667_v44 = vadd.f32 %v9387_v28, %v2537_v32  ;;  %v2669_v40 = vadd.f32 %v9390_v29, %v2626_v10  ;;  %v2539_v49 = vpop.f32.mrb[13].mxu0  ;;  %v2628_v57 = vpop.f32.mrb[13].mxu1 }
 0x3f7   : > { %v2668_v53 = vadd.f32 %v9399_v3, %v2539_v49  ;;  %v2670_v60 = vadd.f32 %v9402_v13, %v2628_v57  ;;  %3474 = vmatprep.mubr.f32.mxu0 %v3330_v22  ;;  %3559 = vmatprep.mubr.f32.mxu1 %v3332_v46 }
 0x3f8   : > { %v3333_v34 = vmul.f32 %v2667_v44, %v1926_v6  ;;  %v3335_v7 = vmul.f32 %v2669_v40, %v2015_v56  ;;  %3475 = vmatmul.mubr.f32.gmra.mrb[26].mxu0 %v3329_v23  ;;  %3560 = vmatmul.mubr.f32.gmra.mrb[26].mxu1 %v3331_v9 }
 0x3f9   : > { %v3334_v24 = vmul.f32 %v2668_v53, %v1928_v62  ;;  %v3336_v19 = vmul.f32 %v2670_v60, %v2017_v35  ;;  %v2543_v55 = vpop.f32.mrb[14].mxu0  ;;  %v2632_v63 = vpop.f32.mrb[14].mxu1 }
 0x3fa   : > { %v2671_v37 = vadd.f32 %v9387_v28, %v2543_v55  ;;  %v2673_v41 = vadd.f32 %v9390_v29, %v2632_v63  ;;  %v2545_v26 = vpop.f32.mrb[15].mxu0  ;;  %v2634_v48 = vpop.f32.mrb[15].mxu1 }
 0x3fb   : > { %v2672_v14 = vadd.f32 %v9399_v3, %v2545_v26  ;;  %v2674_v15 = vadd.f32 %v9402_v13, %v2634_v48  ;;  %3479 = vmatprep.mubr.f32.mxu0 %v3334_v24  ;;  %3564 = vmatprep.mubr.f32.mxu1 %v3336_v19 }
 0x3fc   : > { %v3337_v21 = vmul.f32 %v2671_v37, %v1932_v8  ;;  %v3339_v20 = vmul.f32 %v2673_v41, %v2021_v1  ;;  %3480 = vmatmul.mubr.f32.gmra.mrb[28].mxu0 %v3333_v34  ;;  %3565 = vmatmul.mubr.f32.gmra.mrb[28].mxu1 %v3335_v7 }
 0x3fd   : > { %v3338_v43 = vmul.f32 %v2672_v14, %v1934_v4  ;;  %v3340_v33 = vmul.f32 %v2674_v15, %v2023_v52 }
 0x3ff   : > { %3484 = vmatprep.mubr.f32.mxu0 %v3338_v43  ;;  %3569 = vmatprep.mubr.f32.mxu1 %v3340_v33  ;;  %v3614_v33 = vld [vmem:[%s10070_s23 + $0x10] sm:$0xff] }
 0x400   : > { %3485 = vmatmul.mubr.f32.gmra.mrb[30].mxu0 %v3337_v21  ;;  %3570 = vmatmul.mubr.f32.gmra.mrb[30].mxu1 %v3339_v20  ;;  %v3612_v21 = vld [vmem:[%s10070_s23] sm:$0xff]  ;;  %v3613_v20 = vld [vmem:[%s10070_s23 + $0x8] sm:$0xff] }
 0x401   : > { %v5855_v43 = vpack.c.bf16 %v3613_v20, %v3612_v21  ;;  %v3966_v21 = vld [vmem:[#allocation19 + $0x98] sm:$0xff] }
 0x403   : > { %5856 = vmatprep.subr.bf16.mxu0 %v5855_v43 }
 0x404   : > { %5858 = vmatpush3.bf16.msra.mxu0 %v5855_v43 }
 0x46d   : > { %v9448_v28 = vpop.f32.mrb[16].mxu0  ;;  %v9450_v29 = vpop.f32.mrb[16].mxu1 }
 0x46e   : > { %v9452_v12 = vpop.f32.mrb[17].mxu0  ;;  %v9454_v27 = vpop.f32.mrb[17].mxu1 }
 0x471   : > { %v9456_v39 = vpop.f32.mrb[18].mxu0  ;;  %v9458_v3 = vpop.f32.mrb[18].mxu1 }
 0x472   : > { %v9460_v13 = vpop.f32.mrb[19].mxu0  ;;  %v9462_v38 = vpop.f32.mrb[19].mxu1 }
 0x475   : > { %v9464_v50 = vpop.f32.mrb[20].mxu0  ;;  %v9466_v17 = vpop.f32.mrb[20].mxu1 }
 0x476   : > { %v9468_v36 = vpop.f32.mrb[21].mxu0  ;;  %v9470_v16 = vpop.f32.mrb[21].mxu1 }
 0x479   : > { %v9472_v5 = vpop.f32.mrb[22].mxu0  ;;  %v9474_v47 = vpop.f32.mrb[22].mxu1 }
 0x47a   : > { %v9476_v18 = vpop.f32.mrb[23].mxu0  ;;  %v9478_v30 = vpop.f32.mrb[23].mxu1 }
 0x4c7   : > { %v4875_v25 = vpop.f32.mrb[24].mxu0  ;;  %v4919_v59 = vpop.f32.mrb[24].mxu1 }
 0x4c8   : > { %v4876_v51 = vpop.f32.mrb[25].mxu0  ;;  %v4920_v54 = vpop.f32.mrb[25].mxu1 }
 0x4c9   : > { %v4877_v58 = vadd.f32 %v4876_v51, %v4875_v25  ;;  %v4921_v42 = vadd.f32 %v4920_v54, %v4919_v59  ;;  %v3615_v25 = vld [vmem:[%s10070_s23 + $0x18] sm:$0xff] }
 0x4ca   : > { %v5859_v59 = vpack.c.bf16 %v3615_v25, %v3614_v33  ;;  %v3949_v33 = vld [vmem:[#allocation19 + $0x10] sm:$0xff]  ;;  %v3950_v25 = vld [vmem:[#allocation19 + $0x18] sm:$0xff] }
 0x4cb   : > { %v3557_v11 = vadd.f32 %v4921_v42, %v4877_v58  ;;  %v4878_v31 = vpop.f32.mrb[26].mxu0  ;;  %v4922_v23 = vpop.f32.mrb[26].mxu1 }
 0x4cc   : > { %v4879_v9 = vpop.f32.mrb[27].mxu0  ;;  %v4923_v6 = vpop.f32.mrb[27].mxu1  ;;  %5860 = vmatprep.subr.bf16.mxu0 %v5859_v59 }
 0x4cd   : > { %v4880_v22 = vadd.f32 %v4879_v9, %v4878_v31  ;;  %v4924_v46 = vadd.f32 %v4923_v6, %v4922_v23  ;;  %vm3575_vm9 = vcmp.ge.f32.partialorder %v3557_v11, 0.0  ;;  %v3579_v32 = vmul.f32 0.2, %v3557_v11  ;;  %5862 = vmatpush3.bf16.msra.mxu0 %v5859_v59  ;;  %v3967_v59 = vld [vmem:[#allocation19 + $0xa0] sm:$0xff] }
 0x4cf   : > { %v3562_v10 = vadd.f32 %v4924_v46, %v4880_v22  ;;  %v4881_v56 = vpop.f32.mrb[28].mxu0  ;;  %v4925_v62 = vpop.f32.mrb[28].mxu1  ;;  %v3583_v44 = vsel %vm3575_vm9, %v3557_v11, %v3579_v32 }
 0x4d0   : > { %v4882_v40 = vpop.f32.mrb[29].mxu0  ;;  %v4926_v49 = vpop.f32.mrb[29].mxu1  ;;  %v3588_v57 = vsel %vm3587_vm8, %v3583_v44, -inf }
 0x4d1   : > { %v4883_v35 = vadd.f32 %v4882_v40, %v4881_v56  ;;  %v4927_v53 = vadd.f32 %v4926_v49, %v4925_v62  ;;  %3589 = vmax.xlane.f32.xlu0 %v3588_v57  ;;  %vm3576_vm11 = vcmp.ge.f32.partialorder %v3562_v10, 0.0  ;;  %v3580_v60 = vmul.f32 0.2, %v3562_v10  ;;  %v3726_v49 = vld [vmem:[#allocation17 + $0x8] sm:$0xff] }
 0x4d2   : > { %v10071_v40 = vmov 0.0   ;;  %v3730_v57 = vld [vmem:[#allocation17 + $0x28] sm:$0xff] }
 0x4d3   : > { %v3567_v34 = vadd.f32 %v4927_v53, %v4883_v35  ;;  %v4884_v7 = vpop.f32.mrb[30].mxu0  ;;  %v4928_v8 = vpop.f32.mrb[30].mxu1  ;;  %v3584_v24 = vsel %vm3576_vm11, %v3562_v10, %v3580_v60  ;;  %v5863_v35 = vpack.c.bf16 %v3730_v57, %v3726_v49  ;;  %v3725_v53 = vld [vmem:[#allocation17] sm:$0xff]  ;;  %v3972_v49 = vld [vmem:[#allocation19 + $0xc8] sm:$0xff] }
 0x4d4   : > { %v4885_v19 = vpop.f32.mrb[31].mxu0  ;;  %v4929_v55 = vpop.f32.mrb[31].mxu1  ;;  %v3591_v63 = vsel %vm3587_vm8, %v3584_v24, -inf  ;;  %v3729_v60 = vld [vmem:[#allocation17 + $0x20] sm:$0xff] }
 0x4d5   : > { %v4886_v1 = vadd.f32 %v4885_v19, %v4884_v7  ;;  %v4930_v4 = vadd.f32 %v4929_v55, %v4928_v8  ;;  %3592 = vmax.xlane.f32.xlu0 %v3591_v63  ;;  %vm3577_vm10 = vcmp.ge.f32.partialorder %v3567_v34, 0.0  ;;  %v3581_v37 = vmul.f32 0.2, %v3567_v34  ;;  %5864 = vmatprep.subr.bf16.mxu0 %v5863_v35  ;;  %v3734_v7 = vld [vmem:[#allocation17 + $0x48] sm:$0xff]  ;;  %v3733_v19 = vld [vmem:[#allocation17 + $0x40] sm:$0xff] }
 0x4d6   : > { %v3738_v8 = vld [vmem:[#allocation17 + $0x68] sm:$0xff]  ;;  %v3737_v55 = vld [vmem:[#allocation17 + $0x60] sm:$0xff] }
 0x4d7   : > { %v3572_v41 = vadd.f32 %v4930_v4, %v4886_v1  ;;  %v3585_v26 = vsel %vm3577_vm10, %v3567_v34, %v3581_v37  ;;  %v5865_v34 = vpack.c.bf16 %v3729_v60, %v3725_v53  ;;  %v5869_v63 = vpack.c.bf16 %v3737_v55, %v3733_v19  ;;  %v3728_v1 = vld [vmem:[#allocation17 + $0x18] sm:$0xff]  ;;  %v3955_v53 = vld [vmem:[#allocation19 + $0x40] sm:$0xff]  ;;  %v3956_v60 = vld [vmem:[#allocation19 + $0x48] sm:$0xff] }
 0x4d8   : > { %v3594_v48 = vsel %vm3587_vm8, %v3585_v26, -inf  ;;  %v3732_v4 = vld [vmem:[#allocation17 + $0x38] sm:$0xff]  ;;  %v3957_v19 = vld [vmem:[#allocation19 + $0x50] sm:$0xff] }
 0x4d9   : > { %3595 = vmax.xlane.f32.xlu1 %v3594_v48  ;;  %vm3578_vm12 = vcmp.ge.f32.partialorder %v3572_v41, 0.0  ;;  %v3582_v52 = vmul.f32 0.2, %v3572_v41  ;;  %v5871_v37 = vpack.c.bf16 %v3732_v4, %v3728_v1  ;;  %v3947_v48 = vld [vmem:[#allocation19] sm:$0xff]  ;;  %v3958_v55 = vld [vmem:[#allocation19 + $0x58] sm:$0xff]  ;;  %v3976_v1 = vld [vmem:[#allocation19 + $0xe8] sm:$0xff] }
 0x4da   : > { %v5901_v4 = vpack.c.bf16 %v3958_v55, %v3957_v19 }
 0x4db   : > { %v3586_v14 = vsel %vm3578_vm12, %v3572_v41, %v3582_v52  ;;  %v3963_v41 = vld [vmem:[#allocation19 + $0x80] sm:$0xff] }
 0x4dc   : > { %v3597_v15 = vsel %vm3587_vm8, %v3586_v14, -inf }
 0x4dd   : > { %3598 = vmax.xlane.f32.xlu1 %v3597_v15  ;;  %v3965_v15 = vld [vmem:[#allocation19 + $0x90] sm:$0xff] }
 0x4de   : > { %v5883_v43 = vpack.c.bf16 %v3966_v21, %v3965_v15 }
 0x55e   : > { %v3590_v51 = vpop.xlane.xlu0 %3589 }
 0x55f   : > { %v3600_v54 = vsub.f32 %v3583_v44, %v3590_v51  ;;  %v3968_v51 = vld [vmem:[#allocation19 + $0xa8] sm:$0xff] }
 0x561   : > { %v3604_v58 = vmul.f32 1.442695, %v3600_v54  ;;  %v5885_v54 = vpack.c.bf16 %v3950_v25, %v3949_v33 }
 0x562   : > { %v3593_v42 = vpop.xlane.xlu0 %3592 }
 0x563   : > { %6312 = vpow2.f32 %v3604_v58  ;;  %v3601_v11 = vsub.f32 %v3584_v24, %v3593_v42  ;;  %v5867_v24 = vpack.c.bf16 %v3738_v8, %v3734_v7  ;;  %v5887_v58 = vpack.c.bf16 %v3968_v51, %v3967_v59  ;;  %v3951_v42 = vld [vmem:[#allocation19 + $0x20] sm:$0xff]  ;;  %v3974_v7 = vld [vmem:[#allocation19 + $0xd8] sm:$0xff]  ;;  %v3727_v59 = vld [vmem:[#allocation17 + $0x10] sm:$0xff] }
 0x564   : > { %v5897_v8 = vpack.c.bf16 %v3956_v60, %v3955_v53  ;;  %v3731_v51 = vld [vmem:[#allocation17 + $0x30] sm:$0xff] }
 0x565   : > { %v3606_v31 = vmul.f32 1.442695, %v3601_v11  ;;  %v3952_v11 = vld [vmem:[#allocation19 + $0x28] sm:$0xff] }
 0x566   : > { %v3596_v23 = vpop.xlane.xlu1 %3595 }
 0x567   : > { %6314 = vpow2.f32 %v3606_v31  ;;  %v3602_v9 = vsub.f32 %v3585_v26, %v3596_v23  ;;  %v3964_v26 = vld [vmem:[#allocation19 + $0x88] sm:$0xff]  ;;  %v3969_v31 = vld [vmem:[#allocation19 + $0xb0] sm:$0xff]  ;;  %v3970_v23 = vld [vmem:[#allocation19 + $0xb8] sm:$0xff] }
 0x568   : > { %v5879_v52 = vpack.c.bf16 %v3964_v26, %v3963_v41  ;;  %v3959_v41 = vld [vmem:[#allocation19 + $0x60] sm:$0xff]  ;;  %v3960_v26 = vld [vmem:[#allocation19 + $0x68] sm:$0xff] }
 0x569   : > { %v3608_v6 = vmul.f32 1.442695, %v3602_v9  ;;  %v5889_v9 = vpack.c.bf16 %v3952_v11, %v3951_v42  ;;  %v5873_v11 = vpack.c.bf16 %v3731_v51, %v3727_v59  ;;  %v3985_v51 = vld [vmem:[#allocation19 + $0x130] sm:$0xff] }
 0x56a   : > { %v3599_v22 = vpop.xlane.xlu1 %3598  ;;  %5880 = vmatprep.subr.bf16.mxu1 %v5879_v52 }
 0x56b   : > { %6316 = vpow2.f32 %v3608_v6  ;;  %v3603_v46 = vsub.f32 %v3586_v14, %v3599_v22  ;;  %v3948_v14 = vld [vmem:[#allocation19 + $0x8] sm:$0xff]  ;;  %v5891_v6 = vpack.c.bf16 %v3970_v23, %v3969_v31  ;;  %v3953_v22 = vld [vmem:[#allocation19 + $0x30] sm:$0xff] }
 0x56c   : > { %v5881_v20 = vpack.c.bf16 %v3948_v14, %v3947_v48  ;;  %v5905_v48 = vpack.c.bf16 %v3960_v26, %v3959_v41  ;;  %v3983_v41 = vld [vmem:[#allocation19 + $0x120] sm:$0xff]  ;;  %v3984_v26 = vld [vmem:[#allocation19 + $0x128] sm:$0xff] }
 0x56d   : > { %v9496_v32 = vpop.eup %6312  ;;  %v3610_v10 = vmul.f32 1.442695, %v3603_v46  ;;  %v3954_v46 = vld [vmem:[#allocation19 + $0x38] sm:$0xff] }
 0x56e   : > { %5095 = vmatprep.mubr.msk.f32.mxu0 %vm3587_vm8, %v9496_v32  ;;  %5882 = vmatpush3.bf16.msra.mxu1 %v5881_v20  ;;  %v5893_v57 = vpack.c.bf16 %v3954_v46, %v3953_v22  ;;  %v3995_v46 = vld [vmem:[#allocation19 + $0x180] sm:$0xff] }
 0x56f   : > { %6318 = vpow2.f32 %v3610_v10  ;;  %5884 = vmatprep.subr.bf16.mxu1 %v5883_v43  ;;  %v3971_v10 = vld [vmem:[#allocation19 + $0xc0] sm:$0xff] }
 0x570   : > { %v5895_v35 = vpack.c.bf16 %v3972_v49, %v3971_v10  ;;  %v3996_v10 = vld [vmem:[#allocation19 + $0x188] sm:$0xff] }
 0x571   : > { %v9500_v56 = vpop.eup %6314 }
 0x572   : > { %5096 = vmatmul.mubr.msk.f32.vlgmr.msra.gmra.mrb[32].mxu0 %vm3587_vm8, %v9500_v56  ;;  %5886 = vmatpush3.bf16.msra.mxu1 %v5885_v54  ;;  %v3736_v54 = vld [vmem:[#allocation17 + $0x58] sm:$0xff] }
 0x573   : > { %5866 = vmatpush1.bf16.msra.mxu0 %v5865_v34  ;;  %5888 = vmatprep.subr.bf16.mxu1 %v5887_v58  ;;  %v3973_v34 = vld [vmem:[#allocation19 + $0xd0] sm:$0xff]  ;;  %v3740_v58 = vld [vmem:[#allocation17 + $0x78] sm:$0xff] }
 0x574   : > { %5868 = vmatprep.subr.bf16.mxu0 %v5867_v24  ;;  %v5899_v24 = vpack.c.bf16 %v3974_v7, %v3973_v34  ;;  %v5875_v23 = vpack.c.bf16 %v3740_v58, %v3736_v54  ;;  %v3979_v7 = vld [vmem:[#allocation19 + $0x100] sm:$0xff]  ;;  %v3986_v54 = vld [vmem:[#allocation19 + $0x138] sm:$0xff] }
 0x575   : > { %v9504_v62 = vpop.eup %6316  ;;  %v5925_v58 = vpack.c.bf16 %v3986_v54, %v3985_v51 }
 0x576   : > { %5098 = vmatprep.mubr.msk.f32.mxu0 %vm3587_vm8, %v9504_v62  ;;  %5890 = vmatpush3.bf16.msra.mxu1 %v5889_v9  ;;  %v3735_v9 = vld [vmem:[#allocation17 + $0x50] sm:$0xff] }
 0x577   : > { %5870 = vmatpush1.bf16.msra.mxu0 %v5869_v63  ;;  %5892 = vmatprep.subr.bf16.mxu1 %v5891_v6  ;;  %v3975_v63 = vld [vmem:[#allocation19 + $0xe0] sm:$0xff]  ;;  %v3739_v6 = vld [vmem:[#allocation17 + $0x70] sm:$0xff] }
 0x578   : > { %5872 = vmatprep.subr.bf16.mxu0 %v5871_v37  ;;  %v5903_v37 = vpack.c.bf16 %v3976_v1, %v3975_v63  ;;  %v5877_v49 = vpack.c.bf16 %v3739_v6, %v3735_v9  ;;  %v3981_v63 = vld [vmem:[#allocation19 + $0x110] sm:$0xff]  ;;  %v3999_v1 = vld [vmem:[#allocation19 + $0x1a0] sm:$0xff] }
 0x579   : > { %v9508_v44 = vpop.eup %6318  ;;  %v4005_v6 = vld [vmem:[#allocation19 + $0x1d0] sm:$0xff] }
 0x57a   : > { %5099 = vmatmul.mubr.msk.f32.gmra.mrb[34].mxu0 %vm3587_vm8, %v9508_v44  ;;  %5894 = vmatpush3.bf16.msra.mxu1 %v5893_v57 }
 0x57b   : > { %3817 = vmatprep.mubr.f32.mxu0 %v10071_v40  ;;  %5896 = vmatprep.subr.bf16.mxu1 %v5895_v35  ;;  %v5911_v35 = vpack.c.bf16 %v3996_v10, %v3995_v46  ;;  %v3989_v10 = vld [vmem:[#allocation19 + $0x150] sm:$0xff] }
 0x57e   : > { %5898 = vmatpush3.bf16.msra.mxu1 %v5897_v8  ;;  %v3997_v8 = vld [vmem:[#allocation19 + $0x190] sm:$0xff] }
 0x57f   : > { %5900 = vmatprep.subr.bf16.mxu1 %v5899_v24  ;;  %v3998_v24 = vld [vmem:[#allocation19 + $0x198] sm:$0xff] }
 0x580   : > { %v5915_v55 = vpack.c.bf16 %v3998_v24, %v3997_v8  ;;  %v4010_v8 = vld [vmem:[#allocation19 + $0x1f8] sm:$0xff] }
 0x582   : > { %5902 = vmatpush3.bf16.msra.mxu1 %v5901_v4  ;;  %v4000_v4 = vld [vmem:[#allocation19 + $0x1a8] sm:$0xff] }
 0x583   : > { %5904 = vmatprep.subr.bf16.mxu1 %v5903_v37  ;;  %v5919_v37 = vpack.c.bf16 %v4000_v4, %v3999_v1  ;;  %v4182_v1 = vld [vmem:[#allocation20 + $0x8] sm:$0xff] }
 0x586   : > { %5906 = vmatpush3.bf16.msra.mxu1 %v5905_v48  ;;  %v5921_v48 = vpack.c.bf16 %v3984_v26, %v3983_v41 }
 0x645   : > { %v5097_v52 = vpop.f32.mrb[32].mxu0 }
 0x646   : > { %v3694_v14 = vpop.f32.mrb[33].mxu0  ;;  %v3714_v15 = vmax.f32 %v5097_v52, 1e-30  ;;  %v3977_v52 = vld [vmem:[#allocation19 + $0xf0] sm:$0xff] }
 0x647   : > { %v3713_v21 = vmax.f32 %v3694_v14, 1e-30  ;;  %v3978_v14 = vld [vmem:[#allocation19 + $0xf8] sm:$0xff] }
 0x649   : > { %6320 = vrcp.f32 %v3713_v21  ;;  %v5907_v21 = vpack.c.bf16 %v3978_v14, %v3977_v52  ;;  %v4183_v14 = vld [vmem:[#allocation20 + $0x10] sm:$0xff] }
 0x64a   : > { %6322 = vrcp.f32 %v3714_v15  ;;  %v4001_v15 = vld [vmem:[#allocation19 + $0x1b0] sm:$0xff] }
 0x64b   : > { %5908 = vmatprep.subr.bf16.mxu1 %v5907_v21 }
 0x64d   : > { %v5100_v20 = vpop.f32.mrb[34].mxu0 }
 0x64e   : > { %v3704_v43 = vpop.f32.mrb[35].mxu0  ;;  %v3716_v33 = vmax.f32 %v5100_v20, 1e-30  ;;  %v4002_v20 = vld [vmem:[#allocation19 + $0x1b8] sm:$0xff] }
 0x64f   : > { %v3715_v25 = vmax.f32 %v3704_v43, 1e-30  ;;  %v3961_v43 = vld [vmem:[#allocation19 + $0x70] sm:$0xff] }
 0x651   : > { %6324 = vrcp.f32 %v3715_v25  ;;  %v5923_v25 = vpack.c.bf16 %v4002_v20, %v4001_v15  ;;  %v4184_v15 = vld [vmem:[#allocation20 + $0x18] sm:$0xff] }
 0x652   : > { %6326 = vrcp.f32 %v3716_v33  ;;  %v3962_v33 = vld [vmem:[#allocation19 + $0x78] sm:$0xff] }
 0x653   : > { %v6321_v42 = vpop.eup %6320  ;;  %v5909_v59 = vpack.c.bf16 %v3962_v33, %v3961_v43 }
 0x654   : > { %v3718_v31 = vmul.f32 %v6321_v42, %v9496_v32  ;;  %v6323_v22 = vpop.eup %6322  ;;  %v4003_v42 = vld [vmem:[#allocation19 + $0x1c0] sm:$0xff] }
 0x655   : > { %v3720_v57 = vmul.f32 %v6323_v22, %v9500_v56  ;;  %v3980_v56 = vld [vmem:[#allocation19 + $0x108] sm:$0xff]  ;;  %5910 = vmatpush3.bf16.msra.mxu1 %v5909_v59  ;;  %v4006_v22 = vld [vmem:[#allocation19 + $0x1d8] sm:$0xff] }
 0x656   : > { %4822 = vmatmul.mubr.msk.f32.vlgmr.msra.gmra.mrb[36].mxu0 %vm3587_vm8, %v3718_v31  ;;  %v5913_v19 = vpack.c.bf16 %v3980_v56, %v3979_v7  ;;  %v5931_v46 = vpack.c.bf16 %v4006_v22, %v4005_v6  ;;  %v4009_v56 = vld [vmem:[#allocation19 + $0x1f0] sm:$0xff] }
 0x657   : > { %5874 = vmatpush1.bf16.msra.mxu0 %v5873_v11  ;;  %3823 = vmatprep.mubr.f32.mxu0 %v10071_v40  ;;  %v5939_v24 = vpack.c.bf16 %v4010_v8, %v4009_v56 }
 0x658   : > { %5876 = vmatprep.subr.bf16.mxu0 %v5875_v23  ;;  %v3988_v23 = vld [vmem:[#allocation19 + $0x148] sm:$0xff] }
 0x65a   : > { %4823 = vmatmul.mubr.msk.f32.gmra.mrb[38].mxu0 %vm3587_vm8, %v3720_v57 }
 0x65b   : > { %v6325_v53 = vpop.eup %6324  ;;  %3829 = vmatprep.mubr.f32.mxu0 %v10071_v40  ;;  %5878 = vmatpush1.bf16.msra.mxu0 %v5877_v49  ;;  %v3990_v49 = vld [vmem:[#allocation19 + $0x158] sm:$0xff] }
 0x65c   : > { %v3722_v32 = vmul.f32 %v6325_v53, %v9504_v62  ;;  %5912 = vmatprep.subr.bf16.mxu0 %v5911_v35  ;;  %v6327_v60 = vpop.eup %6326  ;;  %v3982_v62 = vld [vmem:[#allocation19 + $0x118] sm:$0xff]  ;;  %v4007_v35 = vld [vmem:[#allocation19 + $0x1e0] sm:$0xff]  ;;  %v4008_v53 = vld [vmem:[#allocation19 + $0x1e8] sm:$0xff] }
 0x65d   : > { %v3724_v34 = vmul.f32 %v6327_v60, %v9508_v44  ;;  %v5917_v44 = vpack.c.bf16 %v3982_v62, %v3981_v63  ;;  %v3991_v60 = vld [vmem:[#allocation19 + $0x160] sm:$0xff] }
 0x65e   : > { %4824 = vmatmul.mubr.msk.f32.gmra.mrb[40].mxu0 %vm3587_vm8, %v3722_v32  ;;  %v4181_v62 = vld [vmem:[#allocation20] sm:$0xff] }
 0x65f   : > { %3835 = vmatprep.mubr.f32.mxu0 %v10071_v40  ;;  %v5943_v4 = vpack.c.bf16 %v4182_v1, %v4181_v62  ;;  %v4187_v62 = vld [vmem:[#allocation20 + $0x30] sm:$0xff]  ;;  %v4188_v1 = vld [vmem:[#allocation20 + $0x38] sm:$0xff] }
 0x661   : > { %5944 = vmatprep.subr.bf16.mxu1 %v5943_v4 }
 0x662   : > { %4825 = vmatmul.mubr.msk.f32.gmra.mrb[42].mxu0 %vm3587_vm8, %v3724_v34 }
 0x663   : > { %3906 = vmatprep.mubr.f32.mxu0 %v10071_v40 }
 0x666   : > { %4826 = vmatmul.mubr.msk.f32.vlgmr.msra.gmra.mrb[44].mxu0 %vm3587_vm8, %v3718_v31  ;;  %v3987_v31 = vld [vmem:[#allocation19 + $0x140] sm:$0xff] }
 0x667   : > { %3912 = vmatprep.mubr.f32.mxu0 %v10071_v40  ;;  %5914 = vmatpush3.bf16.msra.mxu0 %v5913_v19  ;;  %v5929_v9 = vpack.c.bf16 %v3988_v23, %v3987_v31  ;;  %v3993_v19 = vld [vmem:[#allocation19 + $0x170] sm:$0xff] }
 0x668   : > { %5916 = vmatprep.subr.bf16.mxu0 %v5915_v55  ;;  %v3994_v55 = vld [vmem:[#allocation19 + $0x178] sm:$0xff] }
 0x669   : > { %v5941_v63 = vpack.c.bf16 %v3994_v55, %v3993_v19  ;;  %v4186_v55 = vld [vmem:[#allocation20 + $0x28] sm:$0xff] }
 0x66a   : > { %4827 = vmatmul.mubr.msk.f32.gmra.mrb[46].mxu0 %vm3587_vm8, %v3720_v57  ;;  %v5933_v57 = vpack.c.bf16 %v3990_v49, %v3989_v10 }
 0x66b   : > { %3918 = vmatprep.mubr.f32.mxu0 %v10071_v40  ;;  %5918 = vmatpush3.bf16.msra.mxu0 %v5917_v44  ;;  %v3287_v44 = vld [vmem:[#allocation14] sm:$0xf] }
 0x66c   : > { %5920 = vmatprep.subr.bf16.mxu0 %v5919_v37  ;;  %v3292_v37 = vrot.slane %v3287_v44, %v10068_v2  ;;  %v3296_v41 = vrot.slane %v3287_v44, %v10069_v61  ;;  %v3304_v31 = vrot.slane %v3287_v44, %v9380_v45 }
 0x66e   : > { %4828 = vmatmul.mubr.msk.f32.gmra.mrb[48].mxu0 %vm3587_vm8, %v3722_v32  ;;  %v5935_v32 = vpack.c.bf16 %v4008_v53, %v4007_v35  ;;  %v3309_v26 = vadd.f32 %v3292_v37, %v9448_v28  ;;  %v3313_v33 = vadd.f32 %v3292_v37, %v9456_v39  ;;  %v3314_v59 = vadd.f32 %v3296_v41, %v9460_v13 }
 0x66f   : > { %3924 = vmatprep.mubr.f32.mxu0 %v10071_v40  ;;  %5922 = vmatpush3.bf16.msra.mxu0 %v5921_v48  ;;  %v4004_v40 = vld [vmem:[#allocation19 + $0x1c8] sm:$0xff]  ;;  %v3310_v48 = vadd.f32 %v3296_v41, %v9452_v12  ;;  %v3317_v28 = vadd.f32 %v3292_v37, %v9464_v50  ;;  %v3318_v12 = vadd.f32 %v3296_v41, %v9468_v36 }
 0x670   : > { %5924 = vmatprep.subr.bf16.mxu0 %v5923_v25  ;;  %v5927_v11 = vpack.c.bf16 %v4004_v40, %v4003_v42  ;;  %v5947_v25 = vpack.c.bf16 %v4184_v15, %v4183_v14  ;;  %v3300_v13 = vrot.slane %v3287_v44, %v9374_v0  ;;  %v3322_v23 = vadd.f32 %v3296_v41, %v9476_v18  ;;  %v4192_v41 = vld [vmem:[#allocation20 + $0x58] sm:$0xff]  ;;  %v4195_v15 = vld [vmem:[#allocation20 + $0x70] sm:$0xff] }
 0x671   : > { %v3316_v18 = vadd.f32 %v3304_v31, %v9462_v38  ;;  %v3324_v56 = vadd.f32 %v3304_v31, %v9478_v30  ;;  %v4189_v30 = vld [vmem:[#allocation20 + $0x40] sm:$0xff] }
 0x672   : > { %4829 = vmatmul.mubr.msk.f32.gmra.mrb[50].mxu0 %vm3587_vm8, %v3724_v34  ;;  %v3992_v34 = vld [vmem:[#allocation19 + $0x168] sm:$0xff]  ;;  %v3311_v22 = vadd.f32 %v3300_v13, %v9450_v29  ;;  %v3315_v45 = vadd.f32 %v3300_v13, %v9458_v3  ;;  %v3319_v29 = vadd.f32 %v3300_v13, %v9466_v17  ;;  %v3323_v38 = vadd.f32 %v3300_v13, %v9474_v47  ;;  %v6343_v13 = vld [vmem:[%s7363_s20] sm:$0xff] }
 0x673   : > { %5926 = vmatpush3.bf16.msra.mxu0 %v5925_v58  ;;  %v5937_v7 = vpack.c.bf16 %v3992_v34, %v3991_v60  ;;  %v5955_v47 = vpack.c.bf16 %v4188_v1, %v4187_v62 }
 0x674   : > { %5928 = vmatprep.subr.bf16.mxu0 %v5927_v11  ;;  %v3321_v11 = vadd.f32 %v3292_v37, %v9472_v5  ;;  %v4191_v37 = vld [vmem:[#allocation20 + $0x50] sm:$0xff] }
 0x677   : > { %5930 = vmatpush3.bf16.msra.mxu0 %v5929_v9 }
 0x678   : > { %5932 = vmatprep.subr.bf16.mxu0 %v5931_v46  ;;  %v3312_v46 = vadd.f32 %v3304_v31, %v9454_v27  ;;  %v3320_v27 = vadd.f32 %v3304_v31, %v9470_v16  ;;  %v4185_v16 = vld [vmem:[#allocation20 + $0x20] sm:$0xff] }
 0x67b   : > { %5934 = vmatpush3.bf16.msra.mxu0 %v5933_v57 }
 0x67c   : > { %5936 = vmatprep.subr.bf16.mxu0 %v5935_v32 }
 0x67f   : > { %5938 = vmatpush3.bf16.msra.mxu0 %v5937_v7 }
 0x680   : > { %5940 = vmatprep.subr.bf16.mxu0 %v5939_v24 }
 0x683   : > { %5942 = vmatpush3.bf16.msra.mxu0 %v5941_v63  ;;  %v5951_v63 = vpack.c.bf16 %v4186_v55, %v4185_v16 }
 0x684   : > { %5976 = vmatprep.subr.bf16.mxu0 %v5943_v4 }
 0x729   : > { %v3819_v52 = vpop.f32.mrb[36].mxu0 }
 0x72a   : > { %v3931_v21 = vmul.f32 %v3819_v52, %v3309_v26  ;;  %v3821_v20 = vpop.f32.mrb[37].mxu0  ;;  %v5963_v26 = vpack.c.bf16 %v4192_v41, %v4191_v37  ;;  %v4194_v52 = vld [vmem:[#allocation20 + $0x68] sm:$0xff] }
 0x72b   : > { %v3932_v43 = vmul.f32 %v3821_v20, %v3310_v48  ;;  %v4193_v48 = vld [vmem:[#allocation20 + $0x60] sm:$0xff] }
 0x72c   : > { %v5967_v14 = vpack.c.bf16 %v4194_v52, %v4193_v48  ;;  %v4412_v48 = vld [vmem:[#allocation22 + $0x38] sm:$0xff] }
 0x72d   : > { %v3825_v51 = vpop.f32.mrb[38].mxu0  ;;  %4075 = vmatprep.mubr.f32.mxu1 %v3932_v43 }
 0x72e   : > { %v3935_v2 = vmul.f32 %v3825_v51, %v3313_v33  ;;  %v3827_v54 = vpop.f32.mrb[39].mxu0  ;;  %4076 = vmatmul.mubr.f32.vlgmr.msra.gmra.mrb[32].mxu1 %v3931_v21  ;;  %v4196_v21 = vld [vmem:[#allocation20 + $0x78] sm:$0xff] }
 0x72f   : > { %v3936_v61 = vmul.f32 %v3827_v54, %v3314_v59  ;;  %5946 = vmatpush3.bf16.msra.mxu1 %v5943_v4  ;;  %v5971_v20 = vpack.c.bf16 %v4196_v21, %v4195_v15  ;;  %v4414_v15 = vld [vmem:[#allocation22 + $0x48] sm:$0xff] }
 0x730   : > { %5948 = vmatprep.subr.bf16.mxu1 %v5947_v25 }
 0x731   : > { %v3831_v58 = vpop.f32.mrb[40].mxu0  ;;  %4080 = vmatprep.mubr.f32.mxu1 %v3936_v61 }
 0x732   : > { %v3939_v42 = vmul.f32 %v3831_v58, %v3317_v28  ;;  %v3833_v40 = vpop.f32.mrb[41].mxu0  ;;  %4081 = vmatmul.mubr.f32.gmra.mrb[34].mxu1 %v3935_v2 }
 0x733   : > { %v3940_v39 = vmul.f32 %v3833_v40, %v3318_v12  ;;  %5950 = vmatpush3.bf16.msra.mxu1 %v5947_v25 }
 0x734   : > { %5952 = vmatprep.subr.bf16.mxu1 %v5951_v63 }
 0x735   : > { %v3837_v9 = vpop.f32.mrb[42].mxu0  ;;  %4085 = vmatprep.mubr.f32.mxu1 %v3940_v39 }
 0x736   : > { %v3943_v50 = vmul.f32 %v3837_v9, %v3321_v11  ;;  %v3839_v6 = vpop.f32.mrb[43].mxu0  ;;  %4086 = vmatmul.mubr.f32.gmra.mrb[36].mxu1 %v3939_v42 }
 0x737   : > { %v3944_v36 = vmul.f32 %v3839_v6, %v3322_v23  ;;  %5954 = vmatpush3.bf16.msra.mxu1 %v5951_v63  ;;  %v6344_v6 = vld [vmem:[%s7363_s20 + $0x8] sm:$0xff] }
 0x738   : > { %5956 = vmatprep.subr.bf16.mxu1 %v5955_v47 }
 0x739   : > { %v3908_v10 = vpop.f32.mrb[44].mxu0  ;;  %4090 = vmatprep.mubr.f32.mxu1 %v3944_v36 }
 0x73a   : > { %v3933_v49 = vmul.f32 %v3908_v10, %v3311_v22  ;;  %v3910_v0 = vpop.f32.mrb[45].mxu0  ;;  %4091 = vmatmul.mubr.f32.gmra.mrb[38].mxu1 %v3943_v50 }
 0x73b   : > { %v3934_v5 = vmul.f32 %v3910_v0, %v3312_v46  ;;  %5958 = vmatpush3.bf16.msra.mxu1 %v5955_v47  ;;  %v6345_v0 = vld [vmem:[%s7363_s20 + $0x10] sm:$0xff] }
 0x73d   : > { %v3914_v57 = vpop.f32.mrb[46].mxu0  ;;  %4160 = vmatprep.mubr.f32.mxu0 %v3934_v5 }
 0x73e   : > { %v3937_v35 = vmul.f32 %v3914_v57, %v3315_v45  ;;  %v3916_v53 = vpop.f32.mrb[47].mxu0  ;;  %4161 = vmatmul.mubr.f32.vlgmr.msra.gmra.mrb[52].mxu0 %v3933_v49 }
 0x73f   : > { %v3938_v32 = vmul.f32 %v3916_v53, %v3316_v18  ;;  %5978 = vmatpush3.bf16.msra.mxu0 %v5943_v4  ;;  %v4190_v4 = vld [vmem:[#allocation20 + $0x48] sm:$0xff] }
 0x740   : > { %5980 = vmatprep.subr.bf16.mxu0 %v5947_v25  ;;  %v5959_v44 = vpack.c.bf16 %v4190_v4, %v4189_v30  ;;  %v6346_v53 = vld [vmem:[%s7363_s20 + $0x18] sm:$0xff] }
 0x741   : > { %v3920_v60 = vpop.f32.mrb[48].mxu0  ;;  %4165 = vmatprep.mubr.f32.mxu0 %v3938_v32 }
 0x742   : > { %v3941_v34 = vmul.f32 %v3920_v60, %v3319_v29  ;;  %v3922_v7 = vpop.f32.mrb[49].mxu0  ;;  %4166 = vmatmul.mubr.f32.gmra.mrb[54].mxu0 %v3937_v35  ;;  %5960 = vmatprep.subr.bf16.mxu1 %v5959_v44  ;;  %v4405_v60 = vld [vmem:[#allocation22] sm:$0xff] }
 0x743   : > { %v3942_v3 = vmul.f32 %v3922_v7, %v3320_v27  ;;  %5982 = vmatpush3.bf16.msra.mxu0 %v5947_v25  ;;  %5962 = vmatpush3.bf16.msra.mxu1 %v5959_v44  ;;  %v4407_v7 = vld [vmem:[#allocation22 + $0x10] sm:$0xff] }
 0x744   : > { %5984 = vmatprep.subr.bf16.mxu0 %v5951_v63  ;;  %5964 = vmatprep.subr.bf16.mxu1 %v5963_v26 }
 0x745   : > { %v3926_v8 = vpop.f32.mrb[50].mxu0  ;;  %4170 = vmatprep.mubr.f32.mxu0 %v3942_v3 }
 0x746   : > { %v3945_v24 = vmul.f32 %v3926_v8, %v3323_v38  ;;  %v3928_v19 = vpop.f32.mrb[51].mxu0  ;;  %4171 = vmatmul.mubr.f32.gmra.mrb[56].mxu0 %v3941_v34  ;;  %v4406_v34 = vld [vmem:[#allocation22 + $0x8] sm:$0xff]  ;;  %v4408_v38 = vld [vmem:[#allocation22 + $0x18] sm:$0xff]  ;;  %v4409_v8 = vld [vmem:[#allocation22 + $0x20] sm:$0xff] }
 0x747   : > { %v3946_v17 = vmul.f32 %v3928_v19, %v3324_v56  ;;  %5986 = vmatpush3.bf16.msra.mxu0 %v5951_v63  ;;  %5966 = vmatpush3.bf16.msra.mxu1 %v5963_v26  ;;  %v6007_v3 = vpack.c.bf16 %v4406_v34, %v4405_v60  ;;  %v6011_v56 = vpack.c.bf16 %v4408_v38, %v4407_v7 }
 0x748   : > { %5988 = vmatprep.subr.bf16.mxu0 %v5955_v47  ;;  %5968 = vmatprep.subr.bf16.mxu1 %v5967_v14 }
 0x749   : > { %4175 = vmatprep.mubr.f32.mxu0 %v3946_v17 }
 0x74a   : > { %4176 = vmatmul.mubr.f32.gmra.mrb[58].mxu0 %v3945_v24  ;;  %v4410_v24 = vld [vmem:[#allocation22 + $0x28] sm:$0xff] }
 0x74b   : > { %5990 = vmatpush3.bf16.msra.mxu0 %v5955_v47  ;;  %5970 = vmatpush3.bf16.msra.mxu1 %v5967_v14  ;;  %v6015_v19 = vpack.c.bf16 %v4410_v24, %v4409_v8 }
 0x74c   : > { %5992 = vmatprep.subr.bf16.mxu0 %v5959_v44  ;;  %5972 = vmatprep.subr.bf16.mxu1 %v5971_v20 }
 0x74f   : > { %5994 = vmatpush3.bf16.msra.mxu0 %v5959_v44  ;;  %5974 = vmatpush3.bf16.msra.mxu1 %v5971_v20 }
 0x750   : > { %5996 = vmatprep.subr.bf16.mxu0 %v5963_v26  ;;  %6008 = vmatprep.subr.bf16.mxu1 %v6007_v3 }
 0x753   : > { %5998 = vmatpush3.bf16.msra.mxu0 %v5963_v26  ;;  %v4411_v26 = vld [vmem:[#allocation22 + $0x30] sm:$0xff] }
 0x754   : > { %6000 = vmatprep.subr.bf16.mxu0 %v5967_v14  ;;  %v6019_v52 = vpack.c.bf16 %v4412_v48, %v4411_v26 }
 0x757   : > { %6002 = vmatpush3.bf16.msra.mxu0 %v5967_v14  ;;  %v4413_v14 = vld [vmem:[#allocation22 + $0x40] sm:$0xff] }
 0x758   : > { %6004 = vmatprep.subr.bf16.mxu0 %v5971_v20  ;;  %v6023_v21 = vpack.c.bf16 %v4414_v15, %v4413_v14 }
 0x75b   : > { %6006 = vmatpush3.bf16.msra.mxu0 %v5971_v20  ;;  %v4415_v20 = vld [vmem:[#allocation22 + $0x50] sm:$0xff] }
 0x801   : > { %v4971_v43 = vpop.f32.mrb[32].mxu1 }
 0x802   : > { %v4972_v33 = vpop.f32.mrb[33].mxu1 }
 0x803   : > { %v4973_v25 = vadd.f32 %v4972_v33, %v4971_v43  ;;  %v4416_v43 = vld [vmem:[#allocation22 + $0x58] sm:$0xff] }
 0x804   : > { %v6027_v33 = vpack.c.bf16 %v4416_v43, %v4415_v20 }
 0x805   : > { %v4974_v59 = vpop.f32.mrb[34].mxu1  ;;  %v4078_v11 = vadd.f32 %v6343_v13, %v4973_v25  ;;  %v4417_v25 = vld [vmem:[#allocation22 + $0x60] sm:$0xff] }
 0x806   : > { %v4975_v51 = vpop.f32.mrb[35].mxu1 }
 0x807   : > { %v4976_v2 = vadd.f32 %v4975_v51, %v4974_v59  ;;  %v4418_v59 = vld [vmem:[#allocation22 + $0x68] sm:$0xff] }
 0x808   : > { %v6031_v51 = vpack.c.bf16 %v4418_v59, %v4417_v25 }
 0x809   : > { %v4977_v54 = vpop.f32.mrb[36].mxu1  ;;  %v4083_v36 = vadd.f32 %v6344_v6, %v4976_v2  ;;  %v4419_v2 = vld [vmem:[#allocation22 + $0x70] sm:$0xff] }
 0x80a   : > { %v4978_v61 = vpop.f32.mrb[37].mxu1 }
 0x80b   : > { %v4979_v28 = vadd.f32 %v4978_v61, %v4977_v54  ;;  %v4420_v54 = vld [vmem:[#allocation22 + $0x78] sm:$0xff] }
 0x80c   : > { %v6035_v61 = vpack.c.bf16 %v4420_v54, %v4419_v2 }
 0x80d   : > { %v4980_v12 = vpop.f32.mrb[38].mxu1  ;;  %v4088_v5 = vadd.f32 %v6345_v0, %v4979_v28 }
 0x80e   : > { %v4981_v58 = vpop.f32.mrb[39].mxu1 }
 0x80f   : > { %v4982_v42 = vadd.f32 %v4981_v58, %v4980_v12 }
 0x811   : > { %v5015_v40 = vpop.f32.mrb[52].mxu0  ;;  %v4093_v32 = vadd.f32 %v6346_v53, %v4982_v42 }
 0x812   : > { %v5016_v39 = vpop.f32.mrb[53].mxu0 }
 0x813   : > { %v5017_v31 = vadd.f32 %v5016_v39, %v5015_v40 }
 0x815   : > { %v4163_v23 = vadd.f32 %v5017_v31, %v4078_v11  ;;  %v5018_v9 = vpop.f32.mrb[54].mxu0 }
 0x816   : > { %v5019_v50 = vpop.f32.mrb[55].mxu0 }
 0x817   : > { %v5020_v22 = vadd.f32 %v5019_v50, %v5018_v9  ;;  %5133 = vmatprep.mubr.f32.mxu1 %v4163_v23 }
 0x819   : > { %v4168_v46 = vadd.f32 %v5020_v22, %v4083_v36  ;;  %v5021_v10 = vpop.f32.mrb[56].mxu0  ;;  %v4831_v36 = vld [vmem:[%s10073_s13] ss:$0 sm:$0xff]  ;;  %s6715_s13 = scalar_lea.vmem %s9568_s7, 512 }
 0x81a   : > { %v5022_v49 = vpop.f32.mrb[57].mxu0  ;;  %p6716_p8 = scmp.ne.s32.totalorder %s9568_s7, %s6715_s13  ;;  %p6723_p1 = scmp.lt.s32.totalorder %s6721_s21, %s6715_s13 }
 0x81b   : > { %v5023_v45 = vadd.f32 %v5022_v49, %v5021_v10  ;;  %5134 = vmatmul.mubr.f32.vlgmr.msra.gmra.mrb[40].mxu1 %v4168_v46 }
 0x81c   : > { %6010 = vmatpush3.bf16.msra.mxu1 %v6007_v3  ;;  %p6717_p0 = pnand %p6716_p8, %p10077_p11  ;;  %p6724_p3 = por %p6723_p1, %p6722_p13 }
 0x81d   : > { %v4173_v18 = vadd.f32 %v5023_v45, %v4088_v5  ;;  %v5024_v57 = vpop.f32.mrb[58].mxu0  ;;  %6012 = vmatprep.subr.bf16.mxu1 %v6011_v56 }
 0x81e   : > { %v5025_v35 = vpop.f32.mrb[59].mxu0  ;;  %p6718_p12 = pneg %p6717_p0 }
 0x81f   : > { %v5026_v29 = vadd.f32 %v5025_v35, %v5024_v57  ;;  %5136 = vmatprep.mubr.f32.mxu1 %v4173_v18 }
 0x820   : > { %6014 = vmatpush3.bf16.msra.mxu1 %v6011_v56  ;;  %p6725_p7 = pnand %p6724_p3, %p6718_p12 }
 0x821   : > { %v4178_v27 = vadd.f32 %v5026_v29, %v4093_v32  ;;  %6016 = vmatprep.subr.bf16.mxu1 %v6015_v19  ;;  %v4832_v29 = vld [vmem:[%s10074_s4] ss:$0 sm:$0xff] }
 0x823   : > { %5137 = vmatmul.mubr.f32.gmra.mrb[42].mxu1 %v4178_v27 }
 0x824   : > { %6018 = vmatpush3.bf16.msra.mxu1 %v6015_v19 }
 0x825   : > { %6020 = vmatprep.subr.bf16.mxu1 %v6019_v52 }
 0x828   : > { %6022 = vmatpush3.bf16.msra.mxu1 %v6019_v52 }
 0x829   : > { %6024 = vmatprep.subr.bf16.mxu1 %v6023_v21 }
 0x82c   : > { %6026 = vmatpush3.bf16.msra.mxu1 %v6023_v21 }
 0x82d   : > { %6028 = vmatprep.subr.bf16.mxu1 %v6027_v33 }
 0x830   : > { %6030 = vmatpush3.bf16.msra.mxu1 %v6027_v33 }
 0x831   : > { %6032 = vmatprep.subr.bf16.mxu1 %v6031_v51 }
 0x834   : > { %6034 = vmatpush3.bf16.msra.mxu1 %v6031_v51 }
 0x835   : > { %6036 = vmatprep.subr.bf16.mxu1 %v6035_v61 }
 0x838   : > { %6038 = vmatpush3.bf16.msra.mxu1 %v6035_v61 }
 0x8ee   : > { %v5135_v17 = vpop.f32.mrb[40].mxu1 }
 0x8ef   : > { %v4283_v16 = vsub.f32 %v4168_v46, %v5135_v17  ;;  %v4263_v55 = vpop.f32.mrb[41].mxu1 }
 0x8f0   : > { %v4282_v63 = vsub.f32 %v4163_v23, %v4263_v55  ;;  %v4830_v23 = vld [vmem:[%s10072_s12] ss:$0 sm:$0xff]  ;;  %s10076_s12 = sld [smem:[#allocation127_spill]] }
 0x8f1   : > { %v4287_v1 = vmul.f32 %v4283_v16, %v4283_v16 }
 0x8f2   : > { %v4286_v62 = vmul.f32 %v4282_v63, %v4282_v63 }
 0x8f4   : > { %5171 = vmatprep.mubr.f32.mxu0 %v4286_v62 }
 0x8f5   : > { %5172 = vmatmul.mubr.f32.vlgmr.msra.gmra.mrb[60].mxu0 %v4287_v1 }
 0x8f6   : > { %v5138_v47 = vpop.f32.mrb[42].mxu1  ;;  %s9573_s5 = scalar_lea.hbm %s10076_s12, %s4842_s14 }
 0x8f7   : > { %v4285_v30 = vsub.f32 %v4178_v27, %v5138_v47  ;;  %v4273_v4 = vpop.f32.mrb[43].mxu1 }
 0x8f8   : > { %v4284_v44 = vsub.f32 %v4173_v18, %v4273_v4 }
 0x8f9   : > { %v4289_v41 = vmul.f32 %v4285_v30, %v4285_v30 }
 0x8fa   : > { %v4288_v37 = vmul.f32 %v4284_v44, %v4284_v44 }
 0x8fc   : > { %5174 = vmatprep.mubr.f32.mxu0 %v4288_v37 }
 0x8fd   : > { %5175 = vmatmul.mubr.f32.gmra.mrb[62].mxu0 %v4289_v41 }
 0x9c8   : > { %v5173_v28 = vpop.f32.mrb[60].mxu0 }
 0x9c9   : > { %v4362_v12 = vadd.f32 1e-05, %v5173_v28  ;;  %v4356_v58 = vpop.f32.mrb[61].mxu0 }
 0x9ca   : > { %v4357_v42 = vadd.f32 1e-05, %v4356_v58 }
 0x9cb   : > { %6328 = vrsqrt.f32 %v4362_v12 }
 0x9cc   : > { %6330 = vrsqrt.f32 %v4357_v42 }
 0x9d0   : > { %v5176_v40 = vpop.f32.mrb[62].mxu0 }
 0x9d1   : > { %v4372_v39 = vadd.f32 1e-05, %v5176_v40  ;;  %v4366_v13 = vpop.f32.mrb[63].mxu0 }
 0x9d2   : > { %v4367_v11 = vadd.f32 1e-05, %v4366_v13 }
 0x9d3   : > { %6332 = vrsqrt.f32 %v4372_v39 }
 0x9d4   : > { %6334 = vrsqrt.f32 %v4367_v11 }
 0x9d5   : > { %v6329_v31 = vpop.eup %6328 }
 0x9d6   : > { %v6331_v9 = vpop.eup %6330  ;;  %v4380_v50 = vmul.f32 %v6329_v31, %v4283_v16 }
 0x9d7   : > { %v4379_v6 = vmul.f32 %v6331_v9, %v4282_v63 }
 0x9d8   : > { %v4391_v22 = vmul.f32 %v4830_v23, %v4380_v50 }
 0x9d9   : > { %v4390_v46 = vmul.f32 %v4830_v23, %v4379_v6 }
 0x9da   : > { %v4402_v49 = vadd.f32 %v4831_v36, %v4391_v22 }
 0x9db   : > { %v4401_v10 = vadd.f32 %v4831_v36, %v4390_v46 }
 0x9dd   : > { %v6333_v0 = vpop.eup %6332  ;;  %5209 = vmatprep.mubr.f32.mxu1 %v4401_v10 }
 0x9de   : > { %v6335_v5 = vpop.eup %6334  ;;  %5210 = vmatmul.mubr.f32.vlgmr.msra.gmra.mrb[44].mxu1 %v4402_v49  ;;  %v4382_v45 = vmul.f32 %v6333_v0, %v4285_v30 }
 0x9df   : > { %v4381_v18 = vmul.f32 %v6335_v5, %v4284_v44 }
 0x9e0   : > { %v4393_v57 = vmul.f32 %v4830_v23, %v4382_v45 }
 0x9e1   : > { %v4392_v35 = vmul.f32 %v4830_v23, %v4381_v18 }
 0x9e2   : > { %v4404_v32 = vadd.f32 %v4831_v36, %v4393_v57 }
 0x9e3   : > { %v4403_v53 = vadd.f32 %v4831_v36, %v4392_v35 }
 0x9e5   : > { %5212 = vmatprep.mubr.f32.mxu1 %v4403_v53 }
 0x9e6   : > { %5213 = vmatmul.mubr.f32.gmra.mrb[46].mxu1 %v4404_v32 }
 0xab1   : > { %v5211_v27 = vpop.f32.mrb[44].mxu1 }
 0xab2   : > { %v4500_v60 = vadd.f32 %v5211_v27, %v4832_v29  ;;  %v4494_v34 = vpop.f32.mrb[45].mxu1 }
 0xab3   : > { %v4495_v7 = vadd.f32 %v4832_v29, %v4494_v34 }
 0xab4   : > { %v4514_v3 = vmax.f32 %v4500_v60, 0.0 }
 0xab5   : > { %v4513_v38 = vmax.f32 %v4495_v7, 0.0 }
 0xab6   : > { %4518 = vst [vmem:[%s886_s3 + $0x8] sm:$0xff] %v4514_v3 }
 0xab7   : > { %4517 = vst [vmem:[%s886_s3] sm:$0xff] %v4513_v38 }
 0xab9   : > { %v5214_v56 = vpop.f32.mrb[46].mxu1 }
 0xaba   : > { %v4510_v8 = vadd.f32 %v5214_v56, %v4832_v29  ;;  %v4504_v24 = vpop.f32.mrb[47].mxu1 }
 0xabb   : > { %v4505_v19 = vadd.f32 %v4832_v29, %v4504_v24 }
 0xabc   : > { %v4516_v17 = vmax.f32 %v4510_v8, 0.0 }
 0xabd   : > { %v4515_v16 = vmax.f32 %v4505_v19, 0.0 }
 0xabe   : > { %4520 = vst [vmem:[%s886_s3 + $0x18] sm:$0xff] %v4516_v17 }
 0xabf   : > { %4519 = vst [vmem:[%s886_s3 + $0x10] sm:$0xff] %v4515_v16 }
 0xac0   : > { %6728 = shalt.err (!%p6725_p7)
}
 0xac1   : > { %s6729_s4 = scalar_lea.hbm %s9573_s5, 512  ;;  %s6733_s14 = scalar_lea.hbm %s10076_s12, 1024 }
 0xac2   : > { %p6730_p2 = scmp.ne.s32.totalorder %s9573_s5, %s6729_s4  ;;  %p6734_p5 = scmp.lt.u32.totalorder %s9573_s5, %s10076_s12 }
 0xac3   : > { %p6735_p9 = scmp.lt.u32.totalorder %s6733_s14, %s6729_s4  ;;  %p6737_p8 = scmp.lt.u32.totalorder %s6729_s4, %s9573_s5 }
 0xac4   : > { %p6731_p6 = pnand %p6730_p2, %p10077_p11 }
 0xac5   : > { %p6736_p4 = por %p6735_p9, %p6734_p5 }
 0xac6   : > { %p6732_p10 = pneg %p6731_p6 }
 0xac7   : > { %p6738_p0 = por %p6737_p8, %p6736_p4 }
 0xac9   : > { %p6739_p12 = pnand %p6738_p0, %p6732_p10 }
 0xacb   : > { %6742 = shalt.err (!%p6739_p12)
}
 0xacc   : > { %s6838_s13 = smov 128   ;;  %s6839_s9 = smov 8  }
 0xacd   : > { %6151 = dma.vmem_to_hbm [thread:$0]  (%p10077_p11), %s9568_s7, 512, %s9573_s5, %s4522_s18, %s6838_s13, %s6838_s13, %s6839_s9  }
 0xace PF: > { %s4550_s11 = sand.u32 1, %s6797_s2   ;;  %p10078_p13 = scmp.ne.s32.totalorder %s9796_s28, 0 }
 0xacf   : > { %p10079_p1 = scmp.ge.s32.totalorder %s6809_s27, 2  ;;  %s4551_s21 = scalar_lea.sflag [#allocation4], %s4550_s11 }
 0xad1   : > { %p6195_p3 = pnand %p10079_p1, %p10078_p13 }
 0xad3   : > { %6792 = dma.done.wait (!%p6195_p3), %s4551_s21, 512  }
 0xad4   : > { %6794 = vsyncadd (!%p6195_p3), %s4551_s21, 4294966784  ;;  %p42_p7 = scmp.ge.s32.totalorder %s7240_s17, 4   ;;  %s10080_s2 = smov %s6801_s25 }
 0xad5   : > { %s10081_s25 = smov %s6805_s26  ;;  %s10082_s26 = smov %s7252_s1 }
 0xad6   : > { %s10083_s27 = smov %s7240_s17  ;;  %44 = sbr.rel (!%p42_p7) target bundleno = 32 (0x20), region = 209 }
 0xadd   :  { %4556 = vsyncpa [#allocation3], 1 }
 0xade   :  { %4558 = vsyncpa [#allocation3 + $0x1], 1 }
 0xadf   :  { %4559 = vsyncpa [#allocation6], 1 }
 0xae0   :  { %4561 = vsyncpa [#allocation6 + $0x1], 1 }
 0xae1   :  { %4562 = vsyncpa [#allocation9], 1 }
 0xae2   :  { %4563 = vsyncpa [#allocation12], 1 }
 0xae3   :  { %4564 = vsyncpa [#allocation15], 1 }
 0xae4   :  { %4565 = vsyncpa [#allocation18], 1 }
 0xae5   :  { %4566 = vsyncpa [#allocation21], 1 }
 0xae6   :  { %4567 = vsyncpa [#allocation4], 1 }
 0xae7   :  { %4569 = vsyncpa [#allocation4 + $0x1], 1 }

</bundles_post_ra>
